<compile_context>
chip_gen: v5e
topology: v5e:2x2
jax: 0.10.0
libtpu: 0.0.40
codegen_flags: <defaults>
</compile_context>

<pallas_src>
import jax
import jax.numpy as jnp
import numpy as np
from jax.experimental import pallas as pl
from jax.experimental.pallas import tpu as pltpu

_BN_EPS = 1e-5
_PADL = 8   # left W-halo width: keeps the interior store sublane-tile aligned
_PADR = 8   # right W-halo (only 1 column is read; 8 keeps tiles tidy)


# ----------------------------- fused Pallas kernel -----------------------------

def _build_bottleneck_call(N, H, W, Cin, Cout, GB, Cg, nGb, stride, has_proj):
    s = stride
    Dblk = GB * Cg
    Hout = (H - 1) // s + 1
    Wout = (W - 1) // s + 1
    Hp = H + 2
    Wp = _PADL + W + _PADR

    def _bn(v, gamma, beta):
        # training-mode BatchNorm: per-channel stats over (N, H, W), biased var.
        mu = jnp.mean(v, axis=(0, 1, 2), keepdims=True)
        var = jnp.mean((v - mu) ** 2, axis=(0, 1, 2), keepdims=True)
        return (v - mu) * jax.lax.rsqrt(var + _BN_EPS) * gamma + beta

    def _tap(pad_ref, kh, kw):
        # tap[n, oh, ow, c] = a_padded[n, s*oh + kh - 1, s*ow + kw - 1, c]
        # buffer row = s*oh + kh (H halo = 1), buffer col = s*ow + kw - 1 + PADL
        col0 = _PADL + kw - 1
        if s == 1:
            return pad_ref[:, kh:kh + Hout, col0:col0 + Wout, :]
        # strided (sublane) load along W; row phase via leading-dim reshape.
        slab = pad_ref[:, kh:kh + s * Hout, pl.ds(col0, Wout, stride=s), :]
        return slab.reshape(N, Hout, s, Wout, Dblk)[:, :, 0, :, :]

    def _subsample_x(x_ref):
        # x[n, s*oh, s*ow, c] for the 1x1 stride-s shortcut conv (padding 0).
        if s == 1:
            return x_ref[...]
        slab = x_ref[:, 0:s * Hout, pl.ds(0, Wout, stride=s), :]
        return slab.reshape(N, Hout, s, Wout, Cin)[:, :, 0, :, :]

    def kernel(*refs):
        if has_proj:
            (x_ref, wr_ref, bnp1_ref, wct_ref, we_ref, bnp2_ref, wsc_ref,
             out_ref, pad_ref) = refs
        else:
            (x_ref, wr_ref, bnp1_ref, wct_ref, we_ref, bnp2_ref,
             out_ref, pad_ref) = refs

        gb = pl.program_id(0)

        @pl.when(gb == 0)
        def _():
            # halo zeros persist across group blocks; interior is fully
            # overwritten every step -> zero the pad scratch exactly once.
            pad_ref[...] = jnp.zeros_like(pad_ref)

        x = x_ref[...].astype(jnp.float32)
        bnp1 = bnp1_ref[0].astype(jnp.float32)      # (4, Dblk): g_r, b_r, g_c, b_c
        bnp2 = bnp2_ref[...].astype(jnp.float32)    # (2|4, Cout)

        # ---- conv_reduce (1x1) + BN + ReLU on the lane-dense Dblk slab ----
        a = jnp.einsum('nhwc,cd->nhwd', x, wr_ref[0].astype(jnp.float32),
                       preferred_element_type=jnp.float32)          # (N,H,W,Dblk)
        a = jnp.maximum(_bn(a, bnp1[0:1], bnp1[1:2]), 0.0)

        # stage into padded scratch; interior starts at aligned W-offset _PADL
        pad_ref[:, 1:H + 1, _PADL:_PADL + W, :] = a

        # ---- grouped 3x3 conv (stride s): 9 accumulating matmuls with
        #      block-diagonal per-tap weights (no lane-axis concatenate) ----
        h = None
        for kh in range(3):
            for kw in range(3):
                t = 3 * kh + kw
                contrib = jnp.einsum('nhwc,cd->nhwd', _tap(pad_ref, kh, kw),
                                     wct_ref[0, t].astype(jnp.float32),
                                     preferred_element_type=jnp.float32)
                h = contrib if h is None else h + contrib
        h = jnp.maximum(_bn(h, bnp1[2:3], bnp1[3:4]), 0.0)           # (N,Ho,Wo,Dblk)

        # ---- conv_expand (1x1): accumulate partial sums directly in out_ref ----
        partial = jnp.einsum('nhwc,co->nhwo', h, we_ref[0].astype(jnp.float32),
                             preferred_element_type=jnp.float32)

        @pl.when(gb == 0)
        def _():
            out_ref[...] = partial

        @pl.when(gb > 0)
        def _():
            out_ref[...] += partial

        @pl.when(gb == pl.num_programs(0) - 1)
        def _():
            y = _bn(out_ref[...], bnp2[0:1], bnp2[1:2])
            if has_proj:
                xs = _subsample_x(x_ref).astype(jnp.float32)
                r = jnp.einsum('nhwc,co->nhwo', xs,
                               wsc_ref[...].astype(jnp.float32),
                               preferred_element_type=jnp.float32)
                r = _bn(r, bnp2[2:3], bnp2[3:4])
            else:
                r = x                                               # identity shortcut
            out_ref[...] = jnp.maximum(y + r, 0.0).astype(out_ref.dtype)

    # All blocks keep their last two dims equal to full array dims -> safe
    # w.r.t. the (8,128) tiling rule; blocking only touches the leading axis.
    in_specs = [
        pl.BlockSpec((N, H, W, Cin), lambda g: (0, 0, 0, 0)),           # x (resident)
        pl.BlockSpec((1, Cin, Dblk), lambda g: (g, 0, 0)),              # w_reduce block
        pl.BlockSpec((1, 4, Dblk), lambda g: (g, 0, 0)),                # packed BN r/c
        pl.BlockSpec((1, 9, Dblk, Dblk), lambda g: (g, 0, 0, 0)),       # block-diag taps
        pl.BlockSpec((1, Dblk, Cout), lambda g: (g, 0, 0)),             # w_expand block
        pl.BlockSpec((4 if has_proj else 2, Cout), lambda g: (0, 0)),   # packed BN e/s
    ]
    if has_proj:
        in_specs.append(pl.BlockSpec((Cin, Cout), lambda g: (0, 0)))    # w_sc

    return pl.pallas_call(
        kernel,
        out_shape=jax.ShapeDtypeStruct((N, Hout, Wout, Cout), jnp.float32),
        grid=(nGb,),
        in_specs=in_specs,
        out_specs=pl.BlockSpec((N, Hout, Wout, Cout), lambda g: (0, 0, 0, 0)),
        scratch_shapes=[pltpu.VMEM((N, Hp, Wp, Dblk), jnp.float32)],    # padded act
        compiler_params=pltpu.CompilerParams(
            dimension_semantics=("arbitrary",),   # group-block axis is a reduction
            vmem_limit_bytes=32 * 1024 * 1024),   # ample here; re-derive at prod shapes
    )


# ------------------------------- module wrapper -------------------------------

def resnext_bottleneck_forward(x_nchw, p):
    """x_nchw: (N, in_channels, H, W) -> (N, out_channels, Hout, Wout)."""
    x = jnp.transpose(x_nchw, (0, 2, 3, 1)).astype(jnp.float32)     # NCHW -> NHWC
    N, H, W, Cin = x.shape
    s, G, D, Cout = p['stride'], p['cardinality'], p['D'], p['out_channels']
    Cg = D // G
    has_proj = (p['in_channels'] != Cout)
    if not has_proj:
        assert s == 1, "identity shortcut with stride>1 is shape-inconsistent"
    if s > 1:
        assert H % s == 0 and W % s == 0, "spatial dims must be divisible by stride"

    # Groups per block: make the activation lane dim Dblk >= 128 when possible.
    GB = min(G, max(1, -(-128 // Cg)))
    while G % GB:
        GB -= 1
    Dblk = GB * Cg
    nGb = G // GB

    # Pre-blocked parameter layouts (tiny arrays; leading block axis only).
    wr = p['w_reduce'].reshape(Cin, nGb, Dblk).transpose(1, 0, 2)       # (nGb,Cin,Dblk)
    bnp1 = jnp.stack([p['gamma_r'].reshape(nGb, Dblk),
                      p['beta_r'].reshape(nGb, Dblk),
                      p['gamma_c'].reshape(nGb, Dblk),
                      p['beta_c'].reshape(nGb, Dblk)], axis=1)          # (nGb,4,Dblk)
    # Block-diagonal per-tap 3x3 weights: (nGb, 9, Dblk, Dblk)
    wc = p['w_conv'].reshape(nGb, GB, 3, 3, Cg, Cg)
    wc = wc.transpose(0, 2, 3, 1, 4, 5).reshape(nGb, 9, GB, Cg, Cg)
    wct = jnp.einsum('btgio,gh->btgiho', wc,
                     jnp.eye(GB, dtype=wc.dtype)).reshape(nGb, 9, Dblk, Dblk)
    we = p['w_expand'].reshape(nGb, Dblk, Cout)                         # (nGb,Dblk,Cout)
    if has_proj:
        bnp2 = jnp.stack([p['gamma_e'], p['beta_e'],
                          p['gamma_s'], p['beta_s']], axis=0)           # (4,Cout)
    else:
        bnp2 = jnp.stack([p['gamma_e'], p['beta_e']], axis=0)           # (2,Cout)

    args = [x, wr, bnp1, wct, we, bnp2]
    if has_proj:
        args.append(p['w_sc'])

    call = _build_bottleneck_call(N, H, W, Cin, Cout, GB, Cg, nGb, s, has_proj)
    out = call(*args)                                                   # (N,Ho,Wo,Cout)
    return jnp.transpose(out, (0, 3, 1, 2))                             # NHWC -> NCHW


def init_resnext_bottleneck(key, in_channels, out_channels, stride,
                            cardinality, widen_factor):
    D = cardinality * out_channels // widen_factor
    assert D % cardinality == 0
    Cg = D // cardinality
    ks = jax.random.split(key, 12)

    def he(k, shape, fan_in):
        return ((2.0 / fan_in) ** 0.5) * jax.random.normal(k, shape, jnp.float32)

    p = {
        'in_channels': in_channels, 'out_channels': out_channels,
        'stride': stride, 'cardinality': cardinality, 'D': D,
        'w_reduce': he(ks[0], (in_channels, D), in_channels),
        'gamma_r': 1.0 + 0.1 * jax.random.normal(ks[1], (D,), jnp.float32),
        'beta_r': 0.1 * jax.random.normal(ks[2], (D,), jnp.float32),
        'w_conv': he(ks[3], (cardinality, 3, 3, Cg, Cg), 9 * Cg),
        'gamma_c': 1.0 + 0.1 * jax.random.normal(ks[4], (D,), jnp.float32),
        'beta_c': 0.1 * jax.random.normal(ks[5], (D,), jnp.float32),
        'w_expand': he(ks[6], (D, out_channels), D),
        'gamma_e': 1.0 + 0.1 * jax.random.normal(ks[7], (out_channels,), jnp.float32),
        'beta_e': 0.1 * jax.random.normal(ks[8], (out_channels,), jnp.float32),
    }
    if in_channels != out_channels:
        p['w_sc'] = he(ks[9], (in_channels, out_channels), in_channels)
        p['gamma_s'] = 1.0 + 0.1 * jax.random.normal(ks[10], (out_channels,), jnp.float32)
        p['beta_s'] = 0.1 * jax.random.normal(ks[11], (out_channels,), jnp.float32)
    return p


# ----------------------------- pure-JAX reference -----------------------------

def _ref_bn(v, gamma, beta):
    mu = v.mean(axis=(0, 1, 2), keepdims=True)
    var = ((v - mu) ** 2).mean(axis=(0, 1, 2), keepdims=True)
    return (v - mu) * jax.lax.rsqrt(var + _BN_EPS) * gamma + beta


def ref_forward(x_nchw, p):
    x = jnp.transpose(x_nchw, (0, 2, 3, 1)).astype(jnp.float32)
    s, G, D = p['stride'], p['cardinality'], p['D']
    Cg = D // G
    dn = ('NHWC', 'HWIO', 'NHWC')
    prec = jax.lax.Precision.HIGHEST

    y = jax.lax.conv_general_dilated(x, p['w_reduce'][None, None], (1, 1),
                                     ((0, 0), (0, 0)), dimension_numbers=dn,
                                     precision=prec)
    y = jnp.maximum(_ref_bn(y, p['gamma_r'], p['beta_r']), 0.0)

    wk = p['w_conv'].transpose(1, 2, 3, 0, 4).reshape(3, 3, Cg, D)
    y = jax.lax.conv_general_dilated(y, wk, (s, s), ((1, 1), (1, 1)),
                                     dimension_numbers=dn, feature_group_count=G,
                                     precision=prec)
    y = jnp.maximum(_ref_bn(y, p['gamma_c'], p['beta_c']), 0.0)

    y = jax.lax.conv_general_dilated(y, p['w_expand'][None, None], (1, 1),
                                     ((0, 0), (0, 0)), dimension_numbers=dn,
                                     precision=prec)
    y = _ref_bn(y, p['gamma_e'], p['beta_e'])

    if p['in_channels'] != p['out_channels']:
        r = jax.lax.conv_general_dilated(x, p['w_sc'][None, None], (s, s),
                                         ((0, 0), (0, 0)), dimension_numbers=dn,
                                         precision=prec)
        r = _ref_bn(r, p['gamma_s'], p['beta_s'])
    else:
        r = x
    return jnp.transpose(jnp.maximum(r + y, 0.0), (0, 3, 1, 2))


# ------------------------------------ main ------------------------------------

if __name__ == "__main__":
    key = jax.random.PRNGKey(0)
    kp1, kx1, kp2, kx2 = jax.random.split(key, 4)

    # Config A: projection shortcut + stride 2
    # ResNeXtBottleneck(in_channels=16, out_channels=32, stride=2,
    #                   cardinality=4, widen_factor=4)  -> D=32, 8 ch/group
    N, Cin, H, W = 2, 16, 16, 16
    p1 = init_resnext_bottleneck(kp1, Cin, 32, 2, 4, 4)
    x1 = jax.random.normal(kx1, (N, Cin, H, W), jnp.float32)
    out1 = jax.block_until_ready(resnext_bottleneck_forward(x1, p1))
    exp1 = jax.block_until_ready(ref_forward(x1, p1))
    assert out1.shape == (N, 32, H // 2, W // 2), out1.shape
    np.testing.assert_allclose(np.asarray(out1), np.asarray(exp1),
                               rtol=2e-3, atol=2e-3)

    # Config B: identity shortcut + stride 1
    p2 = init_resnext_bottleneck(kp2, 32, 32, 1, 4, 4)
    x2 = jax.random.normal(kx2, (N, 32, H, W), jnp.float32)
    out2 = jax.block_until_ready(resnext_bottleneck_forward(x2, p2))
    exp2 = jax.block_until_ready(ref_forward(x2, p2))
    assert out2.shape == (N, 32, H, W), out2.shape
    np.testing.assert_allclose(np.asarray(out2), np.asarray(exp2),
                               rtol=2e-3, atol=2e-3)

    print("KERNEL_OK")
</pallas_src>

<mosaic_0001>
module attributes {stable_mosaic.version = 11 : i64} {
  func.func @kernel(%arg0: i32, %arg1: memref<2x16x16x16xf32, #tpu.memory_space<vmem>>, %arg2: memref<1x16x32xf32, #tpu.memory_space<vmem>>, %arg3: memref<1x4x32xf32, #tpu.memory_space<vmem>>, %arg4: memref<1x9x32x32xf32, #tpu.memory_space<vmem>>, %arg5: memref<1x32x32xf32, #tpu.memory_space<vmem>>, %arg6: memref<4x32xf32, #tpu.memory_space<vmem>>, %arg7: memref<16x32xf32, #tpu.memory_space<vmem>>, %arg8: memref<2x8x8x32xf32, #tpu.memory_space<vmem>>, %arg9: memref<2x18x32x32xf32, #tpu.memory_space<vmem>>) attributes {dimension_semantics = [#tpu.dimension_semantics<arbitrary>], iteration_bounds = array<i64: 1>, scalar_prefetch = 0 : i64, scratch_operands = 1 : i64, tpu.core_type = #tpu.core_type<tc>, window_params = [{pipeline_mode = #tpu.pipeline_mode<synchronous>, transform_indices = @transform_0, window_bounds = array<i64: 2, 16, 16, 16>}, {transform_indices = @transform_1, window_bounds = array<i64: 1, 16, 32>}, {transform_indices = @transform_2, window_bounds = array<i64: 1, 4, 32>}, {transform_indices = @transform_3, window_bounds = array<i64: 1, 9, 32, 32>}, {transform_indices = @transform_4, window_bounds = array<i64: 1, 32, 32>}, {pipeline_mode = #tpu.pipeline_mode<synchronous>, transform_indices = @transform_5, window_bounds = array<i64: 4, 32>}, {pipeline_mode = #tpu.pipeline_mode<synchronous>, transform_indices = @transform_6, window_bounds = array<i64: 16, 32>}, {pipeline_mode = #tpu.pipeline_mode<synchronous>, transform_indices = @transform_7, window_bounds = array<i64: 2, 8, 8, 32>}]} {
    %c0_i32 = arith.constant 0 : i32
    %0 = arith.cmpi eq, %arg0, %c0_i32 : i32
    %1 = arith.extui %0 : i1 to i32
    %c0_i32_0 = arith.constant 0 : i32
    %2 = arith.cmpi ne, %1, %c0_i32_0 : i32
    scf.if %2 {
      %cst_110 = arith.constant 0.000000e+00 : f32
      %150 = vector.broadcast %cst_110 : f32 to vector<2x18x32x32xf32>
      %c0_111 = arith.constant 0 : index
      %c0_112 = arith.constant 0 : index
      %c0_113 = arith.constant 0 : index
      %c0_114 = arith.constant 0 : index
      %151 = vector.load %arg9[%c0_111, %c0_112, %c0_113, %c0_114] : memref<2x18x32x32xf32, #tpu.memory_space<vmem>>, vector<2x18x32x32xf32>
      tpu.vector_store %arg9[%c0_111, %c0_112, %c0_113, %c0_114], %150 {strides = array<i32>} : memref<2x18x32x32xf32, #tpu.memory_space<vmem>>, vector<2x18x32x32xf32>,
    } else {
    }
    %c0 = arith.constant 0 : index
    %c0_1 = arith.constant 0 : index
    %c0_2 = arith.constant 0 : index
    %c0_3 = arith.constant 0 : index
    %3 = vector.load %arg1[%c0, %c0_1, %c0_2, %c0_3] : memref<2x16x16x16xf32, #tpu.memory_space<vmem>>, vector<2x16x16x16xf32>
    %c0_4 = arith.constant 0 : index
    %c0_5 = arith.constant 0 : index
    %c0_6 = arith.constant 0 : index
    %4 = vector.load %arg3[%c0_4, %c0_5, %c0_6] : memref<1x4x32xf32, #tpu.memory_space<vmem>>, vector<1x4x32xf32>
    %5 = vector.shape_cast %4 : vector<1x4x32xf32> to vector<4x32xf32>
    %c0_7 = arith.constant 0 : index
    %c0_8 = arith.constant 0 : index
    %6 = vector.load %arg6[%c0_7, %c0_8] : memref<4x32xf32, #tpu.memory_space<vmem>>, vector<4x32xf32>
    %c0_9 = arith.constant 0 : index
    %c0_10 = arith.constant 0 : index
    %c0_11 = arith.constant 0 : index
    %7 = vector.load %arg2[%c0_9, %c0_10, %c0_11] : memref<1x16x32xf32, #tpu.memory_space<vmem>>, vector<1x16x32xf32>
    %8 = vector.shape_cast %7 : vector<1x16x32xf32> to vector<16x32xf32>
    "tpu.trace_start"() <{level = 10 : i32, message = "nhwc,cd->nhwd"}> : () -> ()
    %cst = arith.constant dense<0.000000e+00> : vector<2x16x16x32xf32>
    %9 = tpu.matmul %3, %8, %cst {dimension_numbers = #tpu.dot_dimension_numbers<[3], [0], [0, 1, 2], [1], [0, 0, 0, 1, 0, 2, 1, 1], [], []>} : vector<2x16x16x16xf32>, vector<16x32xf32>, vector<2x16x16x32xf32> -> vector<2x16x16x32xf32>
    "tpu.trace_stop"() : () -> ()
    %10 = vector.extract_strided_slice %5 {offsets = [0, 0], sizes = [1, 32], strides = [1, 1]} : vector<4x32xf32> to vector<1x32xf32>
    %11 = vector.extract_strided_slice %5 {offsets = [1, 0], sizes = [1, 32], strides = [1, 1]} : vector<4x32xf32> to vector<1x32xf32>
    %cst_12 = arith.constant dense<0.000000e+00> : vector<32xf32>
    %12 = vector.multi_reduction <add>, %9, %cst_12 [0, 1, 2] : vector<2x16x16x32xf32> to vector<32xf32>
    %13 = vector.shape_cast %12 : vector<32xf32> to vector<1x1x1x32xf32>
    %cst_13 = arith.constant 5.120000e+02 : f32
    %14 = vector.broadcast %cst_13 : f32 to vector<1x1x1x32xf32>
    %15 = arith.divf %13, %14 : vector<1x1x1x32xf32>
    %16 = vector.broadcast %15 : vector<1x1x1x32xf32> to vector<2x16x16x32xf32>
    %17 = arith.subf %9, %16 : vector<2x16x16x32xf32>
    %18 = arith.mulf %17, %17 : vector<2x16x16x32xf32>
    %cst_14 = arith.constant dense<0.000000e+00> : vector<32xf32>
    %19 = vector.multi_reduction <add>, %18, %cst_14 [0, 1, 2] : vector<2x16x16x32xf32> to vector<32xf32>
    %20 = vector.shape_cast %19 : vector<32xf32> to vector<1x1x1x32xf32>
    %cst_15 = arith.constant 5.120000e+02 : f32
    %21 = vector.broadcast %cst_15 : f32 to vector<1x1x1x32xf32>
    %22 = arith.divf %20, %21 : vector<1x1x1x32xf32>
    %23 = vector.broadcast %15 : vector<1x1x1x32xf32> to vector<2x16x16x32xf32>
    %24 = arith.subf %9, %23 : vector<2x16x16x32xf32>
    %cst_16 = arith.constant 9.99999974E-6 : f32
    %25 = vector.broadcast %cst_16 : f32 to vector<1x1x1x32xf32>
    %26 = arith.addf %22, %25 : vector<1x1x1x32xf32>
    %27 = math.rsqrt %26 : vector<1x1x1x32xf32>
    %28 = vector.broadcast %27 : vector<1x1x1x32xf32> to vector<2x16x16x32xf32>
    %29 = arith.mulf %24, %28 : vector<2x16x16x32xf32>
    %30 = vector.shape_cast %10 : vector<1x32xf32> to vector<1x1x1x32xf32>
    %31 = vector.broadcast %30 : vector<1x1x1x32xf32> to vector<2x16x16x32xf32>
    %32 = arith.mulf %29, %31 : vector<2x16x16x32xf32>
    %33 = vector.shape_cast %11 : vector<1x32xf32> to vector<1x1x1x32xf32>
    %34 = vector.broadcast %33 : vector<1x1x1x32xf32> to vector<2x16x16x32xf32>
    %35 = arith.addf %32, %34 : vector<2x16x16x32xf32>
    %cst_17 = arith.constant 0.000000e+00 : f32
    %36 = vector.broadcast %cst_17 : f32 to vector<2x16x16x32xf32>
    %37 = arith.maximumf %35, %36 : vector<2x16x16x32xf32>
    %c0_18 = arith.constant 0 : index
    %c1 = arith.constant 1 : index
    %c8 = arith.constant 8 : index
    %c0_19 = arith.constant 0 : index
    %38 = vector.load %arg9[%c0_18, %c1, %c8, %c0_19] : memref<2x18x32x32xf32, #tpu.memory_space<vmem>>, vector<2x16x16x32xf32>
    tpu.vector_store %arg9[%c0_18, %c1, %c8, %c0_19], %37 {strides = array<i32>} : memref<2x18x32x32xf32, #tpu.memory_space<vmem>>, vector<2x16x16x32xf32>,
    %c0_20 = arith.constant 0 : index
    %c0_21 = arith.constant 0 : index
    %c7 = arith.constant 7 : index
    %c0_22 = arith.constant 0 : index
    %39 = tpu.strided_load %arg9[%c0_20, %c0_21, %c7, %c0_22] {strides = array<i32: 1, 1, 2, 1>} : memref<2x18x32x32xf32, #tpu.memory_space<vmem>>, vector<2x16x8x32xf32>
    %40 = vector.shape_cast %39 : vector<2x16x8x32xf32> to vector<2x8x2x8x32xf32>
    %41 = vector.extract_strided_slice %40 {offsets = [0, 0, 0, 0, 0], sizes = [2, 8, 1, 8, 32], strides = [1, 1, 1, 1, 1]} : vector<2x8x2x8x32xf32> to vector<2x8x1x8x32xf32>
    %42 = vector.shape_cast %41 : vector<2x8x1x8x32xf32> to vector<2x8x8x32xf32>
    %c0_23 = arith.constant 0 : index
    %c0_24 = arith.constant 0 : index
    %c0_25 = arith.constant 0 : index
    %c0_26 = arith.constant 0 : index
    %43 = vector.load %arg4[%c0_23, %c0_24, %c0_25, %c0_26] : memref<1x9x32x32xf32, #tpu.memory_space<vmem>>, vector<1x1x32x32xf32>
    %44 = vector.shape_cast %43 : vector<1x1x32x32xf32> to vector<32x32xf32>
    "tpu.trace_start"() <{level = 10 : i32, message = "nhwc,cd->nhwd"}> : () -> ()
    %cst_27 = arith.constant dense<0.000000e+00> : vector<2x8x8x32xf32>
    %45 = tpu.matmul %42, %44, %cst_27 {dimension_numbers = #tpu.dot_dimension_numbers<[3], [0], [0, 1, 2], [1], [0, 0, 0, 1, 0, 2, 1, 1], [], []>} : vector<2x8x8x32xf32>, vector<32x32xf32>, vector<2x8x8x32xf32> -> vector<2x8x8x32xf32>
    "tpu.trace_stop"() : () -> ()
    %c0_28 = arith.constant 0 : index
    %c0_29 = arith.constant 0 : index
    %c8_30 = arith.constant 8 : index
    %c0_31 = arith.constant 0 : index
    %46 = tpu.strided_load %arg9[%c0_28, %c0_29, %c8_30, %c0_31] {strides = array<i32: 1, 1, 2, 1>} : memref<2x18x32x32xf32, #tpu.memory_space<vmem>>, vector<2x16x8x32xf32>
    %47 = vector.shape_cast %46 : vector<2x16x8x32xf32> to vector<2x8x2x8x32xf32>
    %48 = vector.extract_strided_slice %47 {offsets = [0, 0, 0, 0, 0], sizes = [2, 8, 1, 8, 32], strides = [1, 1, 1, 1, 1]} : vector<2x8x2x8x32xf32> to vector<2x8x1x8x32xf32>
    %49 = vector.shape_cast %48 : vector<2x8x1x8x32xf32> to vector<2x8x8x32xf32>
    %c0_32 = arith.constant 0 : index
    %c1_33 = arith.constant 1 : index
    %c0_34 = arith.constant 0 : index
    %c0_35 = arith.constant 0 : index
    %50 = vector.load %arg4[%c0_32, %c1_33, %c0_34, %c0_35] : memref<1x9x32x32xf32, #tpu.memory_space<vmem>>, vector<1x1x32x32xf32>
    %51 = vector.shape_cast %50 : vector<1x1x32x32xf32> to vector<32x32xf32>
    "tpu.trace_start"() <{level = 10 : i32, message = "nhwc,cd->nhwd"}> : () -> ()
    %cst_36 = arith.constant dense<0.000000e+00> : vector<2x8x8x32xf32>
    %52 = tpu.matmul %49, %51, %cst_36 {dimension_numbers = #tpu.dot_dimension_numbers<[3], [0], [0, 1, 2], [1], [0, 0, 0, 1, 0, 2, 1, 1], [], []>} : vector<2x8x8x32xf32>, vector<32x32xf32>, vector<2x8x8x32xf32> -> vector<2x8x8x32xf32>
    "tpu.trace_stop"() : () -> ()
    %53 = arith.addf %45, %52 : vector<2x8x8x32xf32>
    %c0_37 = arith.constant 0 : index
    %c0_38 = arith.constant 0 : index
    %c9 = arith.constant 9 : index
    %c0_39 = arith.constant 0 : index
    %54 = tpu.strided_load %arg9[%c0_37, %c0_38, %c9, %c0_39] {strides = array<i32: 1, 1, 2, 1>} : memref<2x18x32x32xf32, #tpu.memory_space<vmem>>, vector<2x16x8x32xf32>
    %55 = vector.shape_cast %54 : vector<2x16x8x32xf32> to vector<2x8x2x8x32xf32>
    %56 = vector.extract_strided_slice %55 {offsets = [0, 0, 0, 0, 0], sizes = [2, 8, 1, 8, 32], strides = [1, 1, 1, 1, 1]} : vector<2x8x2x8x32xf32> to vector<2x8x1x8x32xf32>
    %57 = vector.shape_cast %56 : vector<2x8x1x8x32xf32> to vector<2x8x8x32xf32>
    %c0_40 = arith.constant 0 : index
    %c2 = arith.constant 2 : index
    %c0_41 = arith.constant 0 : index
    %c0_42 = arith.constant 0 : index
    %58 = vector.load %arg4[%c0_40, %c2, %c0_41, %c0_42] : memref<1x9x32x32xf32, #tpu.memory_space<vmem>>, vector<1x1x32x32xf32>
    %59 = vector.shape_cast %58 : vector<1x1x32x32xf32> to vector<32x32xf32>
    "tpu.trace_start"() <{level = 10 : i32, message = "nhwc,cd->nhwd"}> : () -> ()
    %cst_43 = arith.constant dense<0.000000e+00> : vector<2x8x8x32xf32>
    %60 = tpu.matmul %57, %59, %cst_43 {dimension_numbers = #tpu.dot_dimension_numbers<[3], [0], [0, 1, 2], [1], [0, 0, 0, 1, 0, 2, 1, 1], [], []>} : vector<2x8x8x32xf32>, vector<32x32xf32>, vector<2x8x8x32xf32> -> vector<2x8x8x32xf32>
    "tpu.trace_stop"() : () -> ()
    %61 = arith.addf %53, %60 : vector<2x8x8x32xf32>
    %c0_44 = arith.constant 0 : index
    %c1_45 = arith.constant 1 : index
    %c7_46 = arith.constant 7 : index
    %c0_47 = arith.constant 0 : index
    %62 = tpu.strided_load %arg9[%c0_44, %c1_45, %c7_46, %c0_47] {strides = array<i32: 1, 1, 2, 1>} : memref<2x18x32x32xf32, #tpu.memory_space<vmem>>, vector<2x16x8x32xf32>
    %63 = vector.shape_cast %62 : vector<2x16x8x32xf32> to vector<2x8x2x8x32xf32>
    %64 = vector.extract_strided_slice %63 {offsets = [0, 0, 0, 0, 0], sizes = [2, 8, 1, 8, 32], strides = [1, 1, 1, 1, 1]} : vector<2x8x2x8x32xf32> to vector<2x8x1x8x32xf32>
    %65 = vector.shape_cast %64 : vector<2x8x1x8x32xf32> to vector<2x8x8x32xf32>
    %c0_48 = arith.constant 0 : index
    %c3 = arith.constant 3 : index
    %c0_49 = arith.constant 0 : index
    %c0_50 = arith.constant 0 : index
    %66 = vector.load %arg4[%c0_48, %c3, %c0_49, %c0_50] : memref<1x9x32x32xf32, #tpu.memory_space<vmem>>, vector<1x1x32x32xf32>
    %67 = vector.shape_cast %66 : vector<1x1x32x32xf32> to vector<32x32xf32>
    "tpu.trace_start"() <{level = 10 : i32, message = "nhwc,cd->nhwd"}> : () -> ()
    %cst_51 = arith.constant dense<0.000000e+00> : vector<2x8x8x32xf32>
    %68 = tpu.matmul %65, %67, %cst_51 {dimension_numbers = #tpu.dot_dimension_numbers<[3], [0], [0, 1, 2], [1], [0, 0, 0, 1, 0, 2, 1, 1], [], []>} : vector<2x8x8x32xf32>, vector<32x32xf32>, vector<2x8x8x32xf32> -> vector<2x8x8x32xf32>
    "tpu.trace_stop"() : () -> ()
    %69 = arith.addf %61, %68 : vector<2x8x8x32xf32>
    %c0_52 = arith.constant 0 : index
    %c1_53 = arith.constant 1 : index
    %c8_54 = arith.constant 8 : index
    %c0_55 = arith.constant 0 : index
    %70 = tpu.strided_load %arg9[%c0_52, %c1_53, %c8_54, %c0_55] {strides = array<i32: 1, 1, 2, 1>} : memref<2x18x32x32xf32, #tpu.memory_space<vmem>>, vector<2x16x8x32xf32>
    %71 = vector.shape_cast %70 : vector<2x16x8x32xf32> to vector<2x8x2x8x32xf32>
    %72 = vector.extract_strided_slice %71 {offsets = [0, 0, 0, 0, 0], sizes = [2, 8, 1, 8, 32], strides = [1, 1, 1, 1, 1]} : vector<2x8x2x8x32xf32> to vector<2x8x1x8x32xf32>
    %73 = vector.shape_cast %72 : vector<2x8x1x8x32xf32> to vector<2x8x8x32xf32>
    %c0_56 = arith.constant 0 : index
    %c4 = arith.constant 4 : index
    %c0_57 = arith.constant 0 : index
    %c0_58 = arith.constant 0 : index
    %74 = vector.load %arg4[%c0_56, %c4, %c0_57, %c0_58] : memref<1x9x32x32xf32, #tpu.memory_space<vmem>>, vector<1x1x32x32xf32>
    %75 = vector.shape_cast %74 : vector<1x1x32x32xf32> to vector<32x32xf32>
    "tpu.trace_start"() <{level = 10 : i32, message = "nhwc,cd->nhwd"}> : () -> ()
    %cst_59 = arith.constant dense<0.000000e+00> : vector<2x8x8x32xf32>
    %76 = tpu.matmul %73, %75, %cst_59 {dimension_numbers = #tpu.dot_dimension_numbers<[3], [0], [0, 1, 2], [1], [0, 0, 0, 1, 0, 2, 1, 1], [], []>} : vector<2x8x8x32xf32>, vector<32x32xf32>, vector<2x8x8x32xf32> -> vector<2x8x8x32xf32>
    "tpu.trace_stop"() : () -> ()
    %77 = arith.addf %69, %76 : vector<2x8x8x32xf32>
    %c0_60 = arith.constant 0 : index
    %c1_61 = arith.constant 1 : index
    %c9_62 = arith.constant 9 : index
    %c0_63 = arith.constant 0 : index
    %78 = tpu.strided_load %arg9[%c0_60, %c1_61, %c9_62, %c0_63] {strides = array<i32: 1, 1, 2, 1>} : memref<2x18x32x32xf32, #tpu.memory_space<vmem>>, vector<2x16x8x32xf32>
    %79 = vector.shape_cast %78 : vector<2x16x8x32xf32> to vector<2x8x2x8x32xf32>
    %80 = vector.extract_strided_slice %79 {offsets = [0, 0, 0, 0, 0], sizes = [2, 8, 1, 8, 32], strides = [1, 1, 1, 1, 1]} : vector<2x8x2x8x32xf32> to vector<2x8x1x8x32xf32>
    %81 = vector.shape_cast %80 : vector<2x8x1x8x32xf32> to vector<2x8x8x32xf32>
    %c0_64 = arith.constant 0 : index
    %c5 = arith.constant 5 : index
    %c0_65 = arith.constant 0 : index
    %c0_66 = arith.constant 0 : index
    %82 = vector.load %arg4[%c0_64, %c5, %c0_65, %c0_66] : memref<1x9x32x32xf32, #tpu.memory_space<vmem>>, vector<1x1x32x32xf32>
    %83 = vector.shape_cast %82 : vector<1x1x32x32xf32> to vector<32x32xf32>
    "tpu.trace_start"() <{level = 10 : i32, message = "nhwc,cd->nhwd"}> : () -> ()
    %cst_67 = arith.constant dense<0.000000e+00> : vector<2x8x8x32xf32>
    %84 = tpu.matmul %81, %83, %cst_67 {dimension_numbers = #tpu.dot_dimension_numbers<[3], [0], [0, 1, 2], [1], [0, 0, 0, 1, 0, 2, 1, 1], [], []>} : vector<2x8x8x32xf32>, vector<32x32xf32>, vector<2x8x8x32xf32> -> vector<2x8x8x32xf32>
    "tpu.trace_stop"() : () -> ()
    %85 = arith.addf %77, %84 : vector<2x8x8x32xf32>
    %c0_68 = arith.constant 0 : index
    %c2_69 = arith.constant 2 : index
    %c7_70 = arith.constant 7 : index
    %c0_71 = arith.constant 0 : index
    %86 = tpu.strided_load %arg9[%c0_68, %c2_69, %c7_70, %c0_71] {strides = array<i32: 1, 1, 2, 1>} : memref<2x18x32x32xf32, #tpu.memory_space<vmem>>, vector<2x16x8x32xf32>
    %87 = vector.shape_cast %86 : vector<2x16x8x32xf32> to vector<2x8x2x8x32xf32>
    %88 = vector.extract_strided_slice %87 {offsets = [0, 0, 0, 0, 0], sizes = [2, 8, 1, 8, 32], strides = [1, 1, 1, 1, 1]} : vector<2x8x2x8x32xf32> to vector<2x8x1x8x32xf32>
    %89 = vector.shape_cast %88 : vector<2x8x1x8x32xf32> to vector<2x8x8x32xf32>
    %c0_72 = arith.constant 0 : index
    %c6 = arith.constant 6 : index
    %c0_73 = arith.constant 0 : index
    %c0_74 = arith.constant 0 : index
    %90 = vector.load %arg4[%c0_72, %c6, %c0_73, %c0_74] : memref<1x9x32x32xf32, #tpu.memory_space<vmem>>, vector<1x1x32x32xf32>
    %91 = vector.shape_cast %90 : vector<1x1x32x32xf32> to vector<32x32xf32>
    "tpu.trace_start"() <{level = 10 : i32, message = "nhwc,cd->nhwd"}> : () -> ()
    %cst_75 = arith.constant dense<0.000000e+00> : vector<2x8x8x32xf32>
    %92 = tpu.matmul %89, %91, %cst_75 {dimension_numbers = #tpu.dot_dimension_numbers<[3], [0], [0, 1, 2], [1], [0, 0, 0, 1, 0, 2, 1, 1], [], []>} : vector<2x8x8x32xf32>, vector<32x32xf32>, vector<2x8x8x32xf32> -> vector<2x8x8x32xf32>
    "tpu.trace_stop"() : () -> ()
    %93 = arith.addf %85, %92 : vector<2x8x8x32xf32>
    %c0_76 = arith.constant 0 : index
    %c2_77 = arith.constant 2 : index
    %c8_78 = arith.constant 8 : index
    %c0_79 = arith.constant 0 : index
    %94 = tpu.strided_load %arg9[%c0_76, %c2_77, %c8_78, %c0_79] {strides = array<i32: 1, 1, 2, 1>} : memref<2x18x32x32xf32, #tpu.memory_space<vmem>>, vector<2x16x8x32xf32>
    %95 = vector.shape_cast %94 : vector<2x16x8x32xf32> to vector<2x8x2x8x32xf32>
    %96 = vector.extract_strided_slice %95 {offsets = [0, 0, 0, 0, 0], sizes = [2, 8, 1, 8, 32], strides = [1, 1, 1, 1, 1]} : vector<2x8x2x8x32xf32> to vector<2x8x1x8x32xf32>
    %97 = vector.shape_cast %96 : vector<2x8x1x8x32xf32> to vector<2x8x8x32xf32>
    %c0_80 = arith.constant 0 : index
    %c7_81 = arith.constant 7 : index
    %c0_82 = arith.constant 0 : index
    %c0_83 = arith.constant 0 : index
    %98 = vector.load %arg4[%c0_80, %c7_81, %c0_82, %c0_83] : memref<1x9x32x32xf32, #tpu.memory_space<vmem>>, vector<1x1x32x32xf32>
    %99 = vector.shape_cast %98 : vector<1x1x32x32xf32> to vector<32x32xf32>
    "tpu.trace_start"() <{level = 10 : i32, message = "nhwc,cd->nhwd"}> : () -> ()
    %cst_84 = arith.constant dense<0.000000e+00> : vector<2x8x8x32xf32>
    %100 = tpu.matmul %97, %99, %cst_84 {dimension_numbers = #tpu.dot_dimension_numbers<[3], [0], [0, 1, 2], [1], [0, 0, 0, 1, 0, 2, 1, 1], [], []>} : vector<2x8x8x32xf32>, vector<32x32xf32>, vector<2x8x8x32xf32> -> vector<2x8x8x32xf32>
    "tpu.trace_stop"() : () -> ()
    %101 = arith.addf %93, %100 : vector<2x8x8x32xf32>
    %c0_85 = arith.constant 0 : index
    %c2_86 = arith.constant 2 : index
    %c9_87 = arith.constant 9 : index
    %c0_88 = arith.constant 0 : index
    %102 = tpu.strided_load %arg9[%c0_85, %c2_86, %c9_87, %c0_88] {strides = array<i32: 1, 1, 2, 1>} : memref<2x18x32x32xf32, #tpu.memory_space<vmem>>, vector<2x16x8x32xf32>
    %103 = vector.shape_cast %102 : vector<2x16x8x32xf32> to vector<2x8x2x8x32xf32>
    %104 = vector.extract_strided_slice %103 {offsets = [0, 0, 0, 0, 0], sizes = [2, 8, 1, 8, 32], strides = [1, 1, 1, 1, 1]} : vector<2x8x2x8x32xf32> to vector<2x8x1x8x32xf32>
    %105 = vector.shape_cast %104 : vector<2x8x1x8x32xf32> to vector<2x8x8x32xf32>
    %c0_89 = arith.constant 0 : index
    %c8_90 = arith.constant 8 : index
    %c0_91 = arith.constant 0 : index
    %c0_92 = arith.constant 0 : index
    %106 = vector.load %arg4[%c0_89, %c8_90, %c0_91, %c0_92] : memref<1x9x32x32xf32, #tpu.memory_space<vmem>>, vector<1x1x32x32xf32>
    %107 = vector.shape_cast %106 : vector<1x1x32x32xf32> to vector<32x32xf32>
    "tpu.trace_start"() <{level = 10 : i32, message = "nhwc,cd->nhwd"}> : () -> ()
    %cst_93 = arith.constant dense<0.000000e+00> : vector<2x8x8x32xf32>
    %108 = tpu.matmul %105, %107, %cst_93 {dimension_numbers = #tpu.dot_dimension_numbers<[3], [0], [0, 1, 2], [1], [0, 0, 0, 1, 0, 2, 1, 1], [], []>} : vector<2x8x8x32xf32>, vector<32x32xf32>, vector<2x8x8x32xf32> -> vector<2x8x8x32xf32>
    "tpu.trace_stop"() : () -> ()
    %109 = arith.addf %101, %108 : vector<2x8x8x32xf32>
    %110 = vector.extract_strided_slice %5 {offsets = [2, 0], sizes = [1, 32], strides = [1, 1]} : vector<4x32xf32> to vector<1x32xf32>
    %111 = vector.extract_strided_slice %5 {offsets = [3, 0], sizes = [1, 32], strides = [1, 1]} : vector<4x32xf32> to vector<1x32xf32>
    %cst_94 = arith.constant dense<0.000000e+00> : vector<32xf32>
    %112 = vector.multi_reduction <add>, %109, %cst_94 [0, 1, 2] : vector<2x8x8x32xf32> to vector<32xf32>
    %113 = vector.shape_cast %112 : vector<32xf32> to vector<1x1x1x32xf32>
    %cst_95 = arith.constant 1.280000e+02 : f32
    %114 = vector.broadcast %cst_95 : f32 to vector<1x1x1x32xf32>
    %115 = arith.divf %113, %114 : vector<1x1x1x32xf32>
    %116 = vector.broadcast %115 : vector<1x1x1x32xf32> to vector<2x8x8x32xf32>
    %117 = arith.subf %109, %116 : vector<2x8x8x32xf32>
    %118 = arith.mulf %117, %117 : vector<2x8x8x32xf32>
    %cst_96 = arith.constant dense<0.000000e+00> : vector<32xf32>
    %119 = vector.multi_reduction <add>, %118, %cst_96 [0, 1, 2] : vector<2x8x8x32xf32> to vector<32xf32>
    %120 = vector.shape_cast %119 : vector<32xf32> to vector<1x1x1x32xf32>
    %cst_97 = arith.constant 1.280000e+02 : f32
    %121 = vector.broadcast %cst_97 : f32 to vector<1x1x1x32xf32>
    %122 = arith.divf %120, %121 : vector<1x1x1x32xf32>
    %123 = vector.broadcast %115 : vector<1x1x1x32xf32> to vector<2x8x8x32xf32>
    %124 = arith.subf %109, %123 : vector<2x8x8x32xf32>
    %cst_98 = arith.constant 9.99999974E-6 : f32
    %125 = vector.broadcast %cst_98 : f32 to vector<1x1x1x32xf32>
    %126 = arith.addf %122, %125 : vector<1x1x1x32xf32>
    %127 = math.rsqrt %126 : vector<1x1x1x32xf32>
    %128 = vector.broadcast %127 : vector<1x1x1x32xf32> to vector<2x8x8x32xf32>
    %129 = arith.mulf %124, %128 : vector<2x8x8x32xf32>
    %130 = vector.shape_cast %110 : vector<1x32xf32> to vector<1x1x1x32xf32>
    %131 = vector.broadcast %130 : vector<1x1x1x32xf32> to vector<2x8x8x32xf32>
    %132 = arith.mulf %129, %131 : vector<2x8x8x32xf32>
    %133 = vector.shape_cast %111 : vector<1x32xf32> to vector<1x1x1x32xf32>
    %134 = vector.broadcast %133 : vector<1x1x1x32xf32> to vector<2x8x8x32xf32>
    %135 = arith.addf %132, %134 : vector<2x8x8x32xf32>
    %cst_99 = arith.constant 0.000000e+00 : f32
    %136 = vector.broadcast %cst_99 : f32 to vector<2x8x8x32xf32>
    %137 = arith.maximumf %135, %136 : vector<2x8x8x32xf32>
    %c0_100 = arith.constant 0 : index
    %c0_101 = arith.constant 0 : index
    %c0_102 = arith.constant 0 : index
    %138 = vector.load %arg5[%c0_100, %c0_101, %c0_102] : memref<1x32x32xf32, #tpu.memory_space<vmem>>, vector<1x32x32xf32>
    %139 = vector.shape_cast %138 : vector<1x32x32xf32> to vector<32x32xf32>
    "tpu.trace_start"() <{level = 10 : i32, message = "nhwc,co->nhwo"}> : () -> ()
    %cst_103 = arith.constant dense<0.000000e+00> : vector<2x8x8x32xf32>
    %140 = tpu.matmul %137, %139, %cst_103 {dimension_numbers = #tpu.dot_dimension_numbers<[3], [0], [0, 1, 2], [1], [0, 0, 0, 1, 0, 2, 1, 1], [], []>} : vector<2x8x8x32xf32>, vector<32x32xf32>, vector<2x8x8x32xf32> -> vector<2x8x8x32xf32>
    %c0_i32_104 = arith.constant 0 : i32
    "tpu.trace_stop"() : () -> ()
    %141 = arith.cmpi eq, %arg0, %c0_i32_104 : i32
    %142 = arith.extui %141 : i1 to i32
    %c0_i32_105 = arith.constant 0 : i32
    %143 = arith.cmpi ne, %142, %c0_i32_105 : i32
    scf.if %143 {
      %c0_110 = arith.constant 0 : index
      %c0_111 = arith.constant 0 : index
      %c0_112 = arith.constant 0 : index
      %c0_113 = arith.constant 0 : index
      %150 = vector.load %arg8[%c0_110, %c0_111, %c0_112, %c0_113] : memref<2x8x8x32xf32, #tpu.memory_space<vmem>>, vector<2x8x8x32xf32>
      tpu.vector_store %arg8[%c0_110, %c0_111, %c0_112, %c0_113], %140 {strides = array<i32>} : memref<2x8x8x32xf32, #tpu.memory_space<vmem>>, vector<2x8x8x32xf32>,
    } else {
    }
    %c0_i32_106 = arith.constant 0 : i32
    %144 = arith.cmpi sgt, %arg0, %c0_i32_106 : i32
    %145 = arith.extui %144 : i1 to i32
    %c0_i32_107 = arith.constant 0 : i32
    %146 = arith.cmpi ne, %145, %c0_i32_107 : i32
    scf.if %146 {
      %c0_110 = arith.constant 0 : index
      %c0_111 = arith.constant 0 : index
      %c0_112 = arith.constant 0 : index
      %c0_113 = arith.constant 0 : index
      %150 = vector.load %arg8[%c0_110, %c0_111, %c0_112, %c0_113] : memref<2x8x8x32xf32, #tpu.memory_space<vmem>>, vector<2x8x8x32xf32>
      %151 = arith.addf %150, %140 : vector<2x8x8x32xf32>
      %c0_114 = arith.constant 0 : index
      %c0_115 = arith.constant 0 : index
      %c0_116 = arith.constant 0 : index
      %c0_117 = arith.constant 0 : index
      %152 = vector.load %arg8[%c0_114, %c0_115, %c0_116, %c0_117] : memref<2x8x8x32xf32, #tpu.memory_space<vmem>>, vector<2x8x8x32xf32>
      tpu.vector_store %arg8[%c0_114, %c0_115, %c0_116, %c0_117], %151 {strides = array<i32>} : memref<2x8x8x32xf32, #tpu.memory_space<vmem>>, vector<2x8x8x32xf32>,
    } else {
    }
    %c0_i32_108 = arith.constant 0 : i32
    %147 = arith.cmpi eq, %arg0, %c0_i32_108 : i32
    %148 = arith.extui %147 : i1 to i32
    %c0_i32_109 = arith.constant 0 : i32
    %149 = arith.cmpi ne, %148, %c0_i32_109 : i32
    scf.if %149 {
      %c0_110 = arith.constant 0 : index
      %c0_111 = arith.constant 0 : index
      %c0_112 = arith.constant 0 : index
      %c0_113 = arith.constant 0 : index
      %150 = vector.load %arg8[%c0_110, %c0_111, %c0_112, %c0_113] : memref<2x8x8x32xf32, #tpu.memory_space<vmem>>, vector<2x8x8x32xf32>
      %151 = vector.extract_strided_slice %6 {offsets = [0, 0], sizes = [1, 32], strides = [1, 1]} : vector<4x32xf32> to vector<1x32xf32>
      %152 = vector.extract_strided_slice %6 {offsets = [1, 0], sizes = [1, 32], strides = [1, 1]} : vector<4x32xf32> to vector<1x32xf32>
      %cst_114 = arith.constant dense<0.000000e+00> : vector<32xf32>
      %153 = vector.multi_reduction <add>, %150, %cst_114 [0, 1, 2] : vector<2x8x8x32xf32> to vector<32xf32>
      %154 = vector.shape_cast %153 : vector<32xf32> to vector<1x1x1x32xf32>
      %cst_115 = arith.constant 1.280000e+02 : f32
      %155 = vector.broadcast %cst_115 : f32 to vector<1x1x1x32xf32>
      %156 = arith.divf %154, %155 : vector<1x1x1x32xf32>
      %157 = vector.broadcast %156 : vector<1x1x1x32xf32> to vector<2x8x8x32xf32>
      %158 = arith.subf %150, %157 : vector<2x8x8x32xf32>
      %159 = arith.mulf %158, %158 : vector<2x8x8x32xf32>
      %cst_116 = arith.constant dense<0.000000e+00> : vector<32xf32>
      %160 = vector.multi_reduction <add>, %159, %cst_116 [0, 1, 2] : vector<2x8x8x32xf32> to vector<32xf32>
      %161 = vector.shape_cast %160 : vector<32xf32> to vector<1x1x1x32xf32>
      %cst_117 = arith.constant 1.280000e+02 : f32
      %162 = vector.broadcast %cst_117 : f32 to vector<1x1x1x32xf32>
      %163 = arith.divf %161, %162 : vector<1x1x1x32xf32>
      %164 = vector.broadcast %156 : vector<1x1x1x32xf32> to vector<2x8x8x32xf32>
      %165 = arith.subf %150, %164 : vector<2x8x8x32xf32>
      %cst_118 = arith.constant 9.99999974E-6 : f32
      %166 = vector.broadcast %cst_118 : f32 to vector<1x1x1x32xf32>
      %167 = arith.addf %163, %166 : vector<1x1x1x32xf32>
      %168 = math.rsqrt %167 : vector<1x1x1x32xf32>
      %169 = vector.broadcast %168 : vector<1x1x1x32xf32> to vector<2x8x8x32xf32>
      %170 = arith.mulf %165, %169 : vector<2x8x8x32xf32>
      %171 = vector.shape_cast %151 : vector<1x32xf32> to vector<1x1x1x32xf32>
      %172 = vector.broadcast %171 : vector<1x1x1x32xf32> to vector<2x8x8x32xf32>
      %173 = arith.mulf %170, %172 : vector<2x8x8x32xf32>
      %174 = vector.shape_cast %152 : vector<1x32xf32> to vector<1x1x1x32xf32>
      %175 = vector.broadcast %174 : vector<1x1x1x32xf32> to vector<2x8x8x32xf32>
      %176 = arith.addf %173, %175 : vector<2x8x8x32xf32>
      %c0_119 = arith.constant 0 : index
      %c0_120 = arith.constant 0 : index
      %c0_121 = arith.constant 0 : index
      %c0_122 = arith.constant 0 : index
      %177 = tpu.strided_load %arg1[%c0_119, %c0_120, %c0_121, %c0_122] {strides = array<i32: 1, 1, 2, 1>} : memref<2x16x16x16xf32, #tpu.memory_space<vmem>>, vector<2x16x8x16xf32>
      %178 = vector.shape_cast %177 : vector<2x16x8x16xf32> to vector<2x8x2x8x16xf32>
      %179 = vector.extract_strided_slice %178 {offsets = [0, 0, 0, 0, 0], sizes = [2, 8, 1, 8, 16], strides = [1, 1, 1, 1, 1]} : vector<2x8x2x8x16xf32> to vector<2x8x1x8x16xf32>
      %180 = vector.shape_cast %179 : vector<2x8x1x8x16xf32> to vector<2x8x8x16xf32>
      %c0_123 = arith.constant 0 : index
      %c0_124 = arith.constant 0 : index
      %181 = vector.load %arg7[%c0_123, %c0_124] : memref<16x32xf32, #tpu.memory_space<vmem>>, vector<16x32xf32>
      "tpu.trace_start"() <{level = 10 : i32, message = "nhwc,co->nhwo"}> : () -> ()
      %cst_125 = arith.constant dense<0.000000e+00> : vector<2x8x8x32xf32>
      %182 = tpu.matmul %180, %181, %cst_125 {dimension_numbers = #tpu.dot_dimension_numbers<[3], [0], [0, 1, 2], [1], [0, 0, 0, 1, 0, 2, 1, 1], [], []>} : vector<2x8x8x16xf32>, vector<16x32xf32>, vector<2x8x8x32xf32> -> vector<2x8x8x32xf32>
      "tpu.trace_stop"() : () -> ()
      %183 = vector.extract_strided_slice %6 {offsets = [2, 0], sizes = [1, 32], strides = [1, 1]} : vector<4x32xf32> to vector<1x32xf32>
      %184 = vector.extract_strided_slice %6 {offsets = [3, 0], sizes = [1, 32], strides = [1, 1]} : vector<4x32xf32> to vector<1x32xf32>
      %cst_126 = arith.constant dense<0.000000e+00> : vector<32xf32>
      %185 = vector.multi_reduction <add>, %182, %cst_126 [0, 1, 2] : vector<2x8x8x32xf32> to vector<32xf32>
      %186 = vector.shape_cast %185 : vector<32xf32> to vector<1x1x1x32xf32>
      %cst_127 = arith.constant 1.280000e+02 : f32
      %187 = vector.broadcast %cst_127 : f32 to vector<1x1x1x32xf32>
      %188 = arith.divf %186, %187 : vector<1x1x1x32xf32>
      %189 = vector.broadcast %188 : vector<1x1x1x32xf32> to vector<2x8x8x32xf32>
      %190 = arith.subf %182, %189 : vector<2x8x8x32xf32>
      %191 = arith.mulf %190, %190 : vector<2x8x8x32xf32>
      %cst_128 = arith.constant dense<0.000000e+00> : vector<32xf32>
      %192 = vector.multi_reduction <add>, %191, %cst_128 [0, 1, 2] : vector<2x8x8x32xf32> to vector<32xf32>
      %193 = vector.shape_cast %192 : vector<32xf32> to vector<1x1x1x32xf32>
      %cst_129 = arith.constant 1.280000e+02 : f32
      %194 = vector.broadcast %cst_129 : f32 to vector<1x1x1x32xf32>
      %195 = arith.divf %193, %194 : vector<1x1x1x32xf32>
      %196 = vector.broadcast %188 : vector<1x1x1x32xf32> to vector<2x8x8x32xf32>
      %197 = arith.subf %182, %196 : vector<2x8x8x32xf32>
      %cst_130 = arith.constant 9.99999974E-6 : f32
      %198 = vector.broadcast %cst_130 : f32 to vector<1x1x1x32xf32>
      %199 = arith.addf %195, %198 : vector<1x1x1x32xf32>
      %200 = math.rsqrt %199 : vector<1x1x1x32xf32>
      %201 = vector.broadcast %200 : vector<1x1x1x32xf32> to vector<2x8x8x32xf32>
      %202 = arith.mulf %197, %201 : vector<2x8x8x32xf32>
      %203 = vector.shape_cast %183 : vector<1x32xf32> to vector<1x1x1x32xf32>
      %204 = vector.broadcast %203 : vector<1x1x1x32xf32> to vector<2x8x8x32xf32>
      %205 = arith.mulf %202, %204 : vector<2x8x8x32xf32>
      %206 = vector.shape_cast %184 : vector<1x32xf32> to vector<1x1x1x32xf32>
      %207 = vector.broadcast %206 : vector<1x1x1x32xf32> to vector<2x8x8x32xf32>
      %208 = arith.addf %205, %207 : vector<2x8x8x32xf32>
      %209 = arith.addf %176, %208 : vector<2x8x8x32xf32>
      %cst_131 = arith.constant 0.000000e+00 : f32
      %210 = vector.broadcast %cst_131 : f32 to vector<2x8x8x32xf32>
      %211 = arith.maximumf %209, %210 : vector<2x8x8x32xf32>
      %c0_132 = arith.constant 0 : index
      %c0_133 = arith.constant 0 : index
      %c0_134 = arith.constant 0 : index
      %c0_135 = arith.constant 0 : index
      %212 = vector.load %arg8[%c0_132, %c0_133, %c0_134, %c0_135] : memref<2x8x8x32xf32, #tpu.memory_space<vmem>>, vector<2x8x8x32xf32>
      tpu.vector_store %arg8[%c0_132, %c0_133, %c0_134, %c0_135], %211 {strides = array<i32>} : memref<2x8x8x32xf32, #tpu.memory_space<vmem>>, vector<2x8x8x32xf32>,
    } else {
    }
    return
  }
  func.func @transform_0(%arg0: i32) -> (i32, i32, i32, i32) {
    %c0_i32 = arith.constant 0 : i32
    %c0_i32_0 = arith.constant 0 : i32
    %c0_i32_1 = arith.constant 0 : i32
    %c0_i32_2 = arith.constant 0 : i32
    %c0_i32_3 = arith.constant 0 : i32
    return %c0_i32, %c0_i32_0, %c0_i32_1, %c0_i32_2 : i32, i32, i32, i32
  }
  func.func @transform_1(%arg0: i32) -> (i32, i32, i32) {
    %c0_i32 = arith.constant 0 : i32
    %c0_i32_0 = arith.constant 0 : i32
    %c0_i32_1 = arith.constant 0 : i32
    return %arg0, %c0_i32, %c0_i32_0 : i32, i32, i32
  }
  func.func @transform_2(%arg0: i32) -> (i32, i32, i32) {
    %c0_i32 = arith.constant 0 : i32
    %c0_i32_0 = arith.constant 0 : i32
    %c0_i32_1 = arith.constant 0 : i32
    return %arg0, %c0_i32, %c0_i32_0 : i32, i32, i32
  }
  func.func @transform_3(%arg0: i32) -> (i32, i32, i32, i32) {
    %c0_i32 = arith.constant 0 : i32
    %c0_i32_0 = arith.constant 0 : i32
    %c0_i32_1 = arith.constant 0 : i32
    %c0_i32_2 = arith.constant 0 : i32
    return %arg0, %c0_i32, %c0_i32_0, %c0_i32_1 : i32, i32, i32, i32
  }
  func.func @transform_4(%arg0: i32) -> (i32, i32, i32) {
    %c0_i32 = arith.constant 0 : i32
    %c0_i32_0 = arith.constant 0 : i32
    %c0_i32_1 = arith.constant 0 : i32
    return %arg0, %c0_i32, %c0_i32_0 : i32, i32, i32
  }
  func.func @transform_5(%arg0: i32) -> (i32, i32) {
    %c0_i32 = arith.constant 0 : i32
    %c0_i32_0 = arith.constant 0 : i32
    %c0_i32_1 = arith.constant 0 : i32
    return %c0_i32, %c0_i32_0 : i32, i32
  }
  func.func @transform_6(%arg0: i32) -> (i32, i32) {
    %c0_i32 = arith.constant 0 : i32
    %c0_i32_0 = arith.constant 0 : i32
    %c0_i32_1 = arith.constant 0 : i32
    return %c0_i32, %c0_i32_0 : i32, i32
  }
  func.func @transform_7(%arg0: i32) -> (i32, i32, i32, i32) {
    %c0_i32 = arith.constant 0 : i32
    %c0_i32_0 = arith.constant 0 : i32
    %c0_i32_1 = arith.constant 0 : i32
    %c0_i32_2 = arith.constant 0 : i32
    %c0_i32_3 = arith.constant 0 : i32
    return %c0_i32, %c0_i32_0, %c0_i32_1, %c0_i32_2 : i32, i32, i32, i32
  }
}

</mosaic_0001>

<bundles_post_ra>
// kernel: tpu_custom_call.1
= control target key start
LH: loop header
LB: loop body
LE: loop exit
PB: predicated region body
PF: predicated region fallthrough
CT: control target
= control target key end

     0   :  { %12 = vsyncpa [#allocation4], 0  ;;  %s7070_s0 = inlined_call_operand.hbm [shape: f32[2,16,16,16], index: 0, kind: input, shape index: {}]   ;;  %s7071_s1 = inlined_call_operand.hbm [shape: f32[1,16,32], index: 1, kind: input, shape index: {}]   ;;  %s7072_s2 = inlined_call_operand.hbm [shape: f32[1,4,32], index: 2, kind: input, shape index: {}]   ;;  %s7073_s3 = inlined_call_operand.hbm [shape: f32[1,9,32,32], index: 3, kind: input, shape index: {}]   ;;  %s7074_s4 = inlined_call_operand.hbm [shape: f32[1,32,32], index: 4, kind: input, shape index: {}]   ;;  %s7075_s5 = inlined_call_operand.vmem [shape: f32[4,32], index: 5, kind: input, shape index: {}]   ;;  %s7076_s6 = inlined_call_operand.hbm [shape: f32[16,32], index: 6, kind: input, shape index: {}]   ;;  %s7077_s7 = inlined_call_operand.hbm [shape: f32[2,8,8,32], index: 7, kind: output, shape index: {}]  }
   0x1   :  { %13 = vsyncpa [#allocation7], 0 }
   0x2   :  { %14 = vsyncpa [#allocation10], 0 }
   0x3   :  { %15 = vsyncpa [#allocation13], 0 }
   0x4   :  { %16 = vsyncpa [#allocation5], 0  ;;  %s34_s26 = sshll.u32 %s7071_s1, 4  ;;  %s4440_s27 = smov [#allocation6]   ;;  %s35_s26 = int_to_ptr.hbm [resolvable:$true] %s34_s26 }
   0x5   :  { %s36_s28 = sshll.u32 %s4440_s27, 4  ;;  %s58_s8 = sshll.u32 %s7073_s3, 4  ;;  %s37_s28 = int_to_ptr.vmem [resolvable:$true] %s36_s28  ;;  %s59_s8 = int_to_ptr.hbm [resolvable:$true] %s58_s8 }
   0x6   :  { %s4441_s9 = smov 128   ;;  %s4442_s10 = smov 8  }
   0x7   :  { %42 = dma.hbm_to_vmem [thread:$0]  %s35_s26, 256, %s37_s28, [#allocation7], %s4441_s9, %s4441_s9, %s4442_s10  }
   0x8   :  { %s4443_s11 = smov [#allocation9]   ;;  %s21_s1 = sshll.u32 %s7070_s0, 4  ;;  %s22_s1 = int_to_ptr.hbm [resolvable:$true] %s21_s1 }
   0x9   :  { %s60_s12 = sshll.u32 %s4443_s11, 4  ;;  %s48_s16 = sshll.u32 %s7072_s2, 4  ;;  %s61_s12 = int_to_ptr.vmem [resolvable:$true] %s60_s12  ;;  %s49_s16 = int_to_ptr.hbm [resolvable:$true] %s48_s16 }
   0xa   :  { %66 = dma.hbm_to_vmem [thread:$0]  %s59_s8, 4608, %s61_s12, [#allocation10], %s4441_s9, %s4441_s9, %s4442_s10  }
   0xb   :  { %s4444_s17 = smov [#allocation3]   ;;  %s4445_s19 = smov [#allocation8]  }
   0xc   :  { %s23_s18 = sshll.u32 %s4444_s17, 4  ;;  %s50_s0 = sshll.u32 %s4445_s19, 4  ;;  %s24_s18 = int_to_ptr.vmem [resolvable:$true] %s23_s18  ;;  %s51_s0 = int_to_ptr.vmem [resolvable:$true] %s50_s0 }
   0xd   :  { %29 = dma.hbm_to_vmem [thread:$0]  %s22_s1, 8192, %s24_s18, [#allocation4], %s4441_s9, %s4441_s9, %s4442_s10  }
   0xe   :  { %s71_s22 = sshll.u32 %s7074_s4, 4  ;;  %s86_s2 = sshll.u32 %s7076_s6, 4  ;;  %s72_s22 = int_to_ptr.hbm [resolvable:$true] %s71_s22  ;;  %s87_s2 = int_to_ptr.hbm [resolvable:$true] %s86_s2 }
   0xf   :  { %53 = dma.hbm_to_vmem [thread:$0]  %s49_s16, 64, %s51_s0, [#allocation7]  }
  0x10   :  { %s4446_s25 = smov [#allocation11]   ;;  %s4447_s27 = smov [#allocation12]  }
  0x11   :  { %s73_s26 = sshll.u32 %s4446_s25, 4  ;;  %s88_s28 = sshll.u32 %s4447_s27, 4  ;;  %s74_s26 = int_to_ptr.vmem [resolvable:$true] %s73_s26  ;;  %s89_s28 = int_to_ptr.vmem [resolvable:$true] %s88_s28 }
  0x12   :  { %79 = dma.hbm_to_vmem [thread:$0]  %s72_s22, 512, %s74_s26, [#allocation10], %s4441_s9, %s4441_s9, %s4442_s10  }
  0x13   :  { %94 = dma.hbm_to_vmem [thread:$0]  %s87_s2, 256, %s89_s28, [#allocation13], %s4441_s9, %s4441_s9, %s4442_s10  }
  0x14   :  { %4430 = dma.done.wait [#allocation4], 8192  }
  0x15   :  { %4431 = vsyncadd [#allocation4], 4294959104 }
  0x16   :  { %4432 = dma.done.wait [#allocation7], 320  }
  0x17   :  { %4433 = vsyncadd [#allocation7], 4294966976 }
  0x18   :  { %4434 = dma.done.wait [#allocation10], 5120  }
  0x19   :  { %4435 = vsyncadd [#allocation10], 4294962176 }
  0x1a   :  { %4436 = dma.done.wait [#allocation13], 256  }
  0x1b   :  { %4437 = vsyncadd [#allocation13], 4294967040  ;;  %vm123_vm0 = vcmask 261120   ;;  %v335_v0 = vld [vmem:[#allocation6 + $0x8] sm:$0xff]  ;;  %v334_v1 = vld [vmem:[#allocation6] sm:$0xff]  ;;  %vm336_vm1 = vcmask 130048  }
  0x1c   :  { %543 = vmatpush.msra.mxu0 %v335_v0  ;;  %v268_v2 = vld [vmem:[#allocation3] sm:$0xff]  ;;  %4227 = vmatpush.msra.mxu3 %v335_v0  ;;  %v269_v3 = vld [vmem:[#allocation3 + $0x8] sm:$0xff]  ;;  %v270_v4 = vld [vmem:[#allocation3 + $0x10] sm:$0xff]  ;;  %v4448_v7 = vmov 0.0   ;;  %s3875_s11 = sshll.u32 %s7077_s7, 4  ;;  %s3876_s11 = int_to_ptr.hbm [resolvable:$true] %s3875_s11 }
  0x1d   :  { %v271_v5 = vld [vmem:[#allocation3 + $0x18] sm:$0xff]  ;;  %v272_v6 = vld [vmem:[#allocation3 + $0x20] sm:$0xff]  ;;  %124 = vst.msk [vmem:[#allocation2] sm:$0xff] %vm123_vm0, %v4448_v7  ;;  %v273_v8 = vld [vmem:[#allocation3 + $0x28] sm:$0xff] }
  0x1e   :  { %544 = vmatpush.msra.mxu0 %v334_v1  ;;  %4228 = vmatpush.msra.mxu3 %v334_v1  ;;  %125 = vst.msk [vmem:[#allocation2 + $0x8] sm:$0xff] %vm123_vm0, %v4448_v7  ;;  %v274_v9 = vld [vmem:[#allocation3 + $0x30] sm:$0xff]  ;;  %v275_v10 = vld [vmem:[#allocation3 + $0x38] sm:$0xff]  ;;  %v276_v11 = vld [vmem:[#allocation3 + $0x40] sm:$0xff] }
  0x1f   :  { %3987 = vmatmul.msk.f32.vlgmr.msra.gmra.mxu0 %vm336_vm1, %v268_v2  ;;  %126 = vst.msk [vmem:[#allocation2 + $0x10] sm:$0xff] %vm123_vm0, %v4448_v7  ;;  %v277_v12 = vld [vmem:[#allocation3 + $0x48] sm:$0xff]  ;;  %v278_v13 = vld [vmem:[#allocation3 + $0x50] sm:$0xff]  ;;  %v279_v14 = vld [vmem:[#allocation3 + $0x58] sm:$0xff] }
  0x20   :  { %128 = vst.msk [vmem:[#allocation2 + $0x20] sm:$0xff] %vm123_vm0, %v4448_v7  ;;  %v280_v15 = vld [vmem:[#allocation3 + $0x60] sm:$0xff]  ;;  %v281_v16 = vld [vmem:[#allocation3 + $0x68] sm:$0xff]  ;;  %v282_v17 = vld [vmem:[#allocation3 + $0x70] sm:$0xff] }
  0x21   :  { %129 = vst.msk [vmem:[#allocation2 + $0x28] sm:$0xff] %vm123_vm0, %v4448_v7  ;;  %v283_v18 = vld [vmem:[#allocation3 + $0x78] sm:$0xff]  ;;  %v284_v20 = vld [vmem:[#allocation3 + $0x80] sm:$0xff]  ;;  %v285_v22 = vld [vmem:[#allocation3 + $0x88] sm:$0xff] }
  0x22   :  { %130 = vst.msk [vmem:[#allocation2 + $0x30] sm:$0xff] %vm123_vm0, %v4448_v7  ;;  %v286_v24 = vld [vmem:[#allocation3 + $0x90] sm:$0xff]  ;;  %v287_v26 = vld [vmem:[#allocation3 + $0x98] sm:$0xff]  ;;  %v288_v28 = vld [vmem:[#allocation3 + $0xa0] sm:$0xff] }
  0x23   :  { %132 = vst.msk [vmem:[#allocation2 + $0x40] sm:$0xff] %vm123_vm0, %v4448_v7  ;;  %v289_v30 = vld [vmem:[#allocation3 + $0xa8] sm:$0xff]  ;;  %v290_v32 = vld [vmem:[#allocation3 + $0xb0] sm:$0xff]  ;;  %v291_v34 = vld [vmem:[#allocation3 + $0xb8] sm:$0xff] }
  0x24   :  { %133 = vst.msk [vmem:[#allocation2 + $0x48] sm:$0xff] %vm123_vm0, %v4448_v7  ;;  %v292_v36 = vld [vmem:[#allocation3 + $0xc0] sm:$0xff]  ;;  %v293_v38 = vld [vmem:[#allocation3 + $0xc8] sm:$0xff]  ;;  %v294_v40 = vld [vmem:[#allocation3 + $0xd0] sm:$0xff] }
  0x25   :  { %134 = vst.msk [vmem:[#allocation2 + $0x50] sm:$0xff] %vm123_vm0, %v4448_v7  ;;  %v295_v42 = vld [vmem:[#allocation3 + $0xd8] sm:$0xff]  ;;  %v296_v44 = vld [vmem:[#allocation3 + $0xe0] sm:$0xff]  ;;  %v297_v46 = vld [vmem:[#allocation3 + $0xe8] sm:$0xff] }
  0x26   :  { %136 = vst.msk [vmem:[#allocation2 + $0x60] sm:$0xff] %vm123_vm0, %v4448_v7  ;;  %v298_v48 = vld [vmem:[#allocation3 + $0xf0] sm:$0xff]  ;;  %v299_v50 = vld [vmem:[#allocation3 + $0xf8] sm:$0xff]  ;;  %v300_v52 = vld [vmem:[#allocation3 + $0x100] sm:$0xff] }
  0x27   :  { %3988 = vmatmul.msk.f32.gmra.mxu0 %vm336_vm1, %v269_v3  ;;  %137 = vst.msk [vmem:[#allocation2 + $0x68] sm:$0xff] %vm123_vm0, %v4448_v7  ;;  %v301_v54 = vld [vmem:[#allocation3 + $0x108] sm:$0xff]  ;;  %v302_v56 = vld [vmem:[#allocation3 + $0x110] sm:$0xff]  ;;  %v303_v58 = vld [vmem:[#allocation3 + $0x118] sm:$0xff] }
  0x28   :  { %138 = vst.msk [vmem:[#allocation2 + $0x70] sm:$0xff] %vm123_vm0, %v4448_v7  ;;  %v304_v60 = vld [vmem:[#allocation3 + $0x120] sm:$0xff]  ;;  %v305_v62 = vld [vmem:[#allocation3 + $0x128] sm:$0xff]  ;;  %v306_v0 = vld [vmem:[#allocation3 + $0x130] sm:$0xff] }
  0x29   :  { %140 = vst.msk [vmem:[#allocation2 + $0x80] sm:$0xff] %vm123_vm0, %v4448_v7  ;;  %v307_v2 = vld [vmem:[#allocation3 + $0x138] sm:$0xff] }
  0x2a   :  { %141 = vst.msk [vmem:[#allocation2 + $0x88] sm:$0xff] %vm123_vm0, %v4448_v7 }
  0x2b   :  { %142 = vst.msk [vmem:[#allocation2 + $0x90] sm:$0xff] %vm123_vm0, %v4448_v7 }
  0x2c   :  { %144 = vst.msk [vmem:[#allocation2 + $0xa0] sm:$0xff] %vm123_vm0, %v4448_v7 }
  0x2d   :  { %145 = vst.msk [vmem:[#allocation2 + $0xa8] sm:$0xff] %vm123_vm0, %v4448_v7 }
  0x2e   :  { %146 = vst.msk [vmem:[#allocation2 + $0xb0] sm:$0xff] %vm123_vm0, %v4448_v7 }
  0x2f   :  { %3989 = vmatmul.msk.f32.gmra.mxu0 %vm336_vm1, %v270_v4  ;;  %148 = vst.msk [vmem:[#allocation2 + $0xc0] sm:$0xff] %vm123_vm0, %v4448_v7  ;;  %v308_v4 = vld [vmem:[#allocation3 + $0x140] sm:$0xff] }
  0x30   :  { %149 = vst.msk [vmem:[#allocation2 + $0xc8] sm:$0xff] %vm123_vm0, %v4448_v7 }
  0x31   :  { %150 = vst.msk [vmem:[#allocation2 + $0xd0] sm:$0xff] %vm123_vm0, %v4448_v7 }
  0x32   :  { %152 = vst.msk [vmem:[#allocation2 + $0xe0] sm:$0xff] %vm123_vm0, %v4448_v7 }
  0x33   :  { %153 = vst.msk [vmem:[#allocation2 + $0xe8] sm:$0xff] %vm123_vm0, %v4448_v7 }
  0x34   :  { %154 = vst.msk [vmem:[#allocation2 + $0xf0] sm:$0xff] %vm123_vm0, %v4448_v7 }
  0x35   :  { %156 = vst.msk [vmem:[#allocation2 + $0x100] sm:$0xff] %vm123_vm0, %v4448_v7 }
  0x36   :  { %157 = vst.msk [vmem:[#allocation2 + $0x108] sm:$0xff] %vm123_vm0, %v4448_v7 }
  0x37   :  { %3990 = vmatmul.msk.f32.gmra.mxu0 %vm336_vm1, %v271_v5  ;;  %158 = vst.msk [vmem:[#allocation2 + $0x110] sm:$0xff] %vm123_vm0, %v4448_v7 }
  0x38   :  { %160 = vst.msk [vmem:[#allocation2 + $0x120] sm:$0xff] %vm123_vm0, %v4448_v7 }
  0x39   :  { %161 = vst.msk [vmem:[#allocation2 + $0x128] sm:$0xff] %vm123_vm0, %v4448_v7 }
  0x3a   :  { %162 = vst.msk [vmem:[#allocation2 + $0x130] sm:$0xff] %vm123_vm0, %v4448_v7 }
  0x3b   :  { %164 = vst.msk [vmem:[#allocation2 + $0x140] sm:$0xff] %vm123_vm0, %v4448_v7 }
  0x3c   :  { %165 = vst.msk [vmem:[#allocation2 + $0x148] sm:$0xff] %vm123_vm0, %v4448_v7 }
  0x3d   :  { %166 = vst.msk [vmem:[#allocation2 + $0x150] sm:$0xff] %vm123_vm0, %v4448_v7 }
  0x3e   :  { %168 = vst.msk [vmem:[#allocation2 + $0x160] sm:$0xff] %vm123_vm0, %v4448_v7 }
  0x3f   :  { %3991 = vmatmul.msk.f32.gmra.mxu0 %vm336_vm1, %v272_v6  ;;  %169 = vst.msk [vmem:[#allocation2 + $0x168] sm:$0xff] %vm123_vm0, %v4448_v7  ;;  %v309_v6 = vld [vmem:[#allocation3 + $0x148] sm:$0xff] }
  0x40   :  { %170 = vst.msk [vmem:[#allocation2 + $0x170] sm:$0xff] %vm123_vm0, %v4448_v7 }
  0x41   :  { %172 = vst.msk [vmem:[#allocation2 + $0x180] sm:$0xff] %vm123_vm0, %v4448_v7 }
  0x42   :  { %173 = vst.msk [vmem:[#allocation2 + $0x188] sm:$0xff] %vm123_vm0, %v4448_v7 }
  0x43   :  { %174 = vst.msk [vmem:[#allocation2 + $0x190] sm:$0xff] %vm123_vm0, %v4448_v7 }
  0x44   :  { %176 = vst.msk [vmem:[#allocation2 + $0x1a0] sm:$0xff] %vm123_vm0, %v4448_v7 }
  0x45   :  { %177 = vst.msk [vmem:[#allocation2 + $0x1a8] sm:$0xff] %vm123_vm0, %v4448_v7 }
  0x46   :  { %178 = vst.msk [vmem:[#allocation2 + $0x1b0] sm:$0xff] %vm123_vm0, %v4448_v7 }
  0x47   :  { %3992 = vmatmul.msk.f32.gmra.mxu0 %vm336_vm1, %v273_v8  ;;  %180 = vst.msk [vmem:[#allocation2 + $0x1c0] sm:$0xff] %vm123_vm0, %v4448_v7  ;;  %v310_v8 = vld [vmem:[#allocation3 + $0x150] sm:$0xff] }
  0x48   :  { %181 = vst.msk [vmem:[#allocation2 + $0x1c8] sm:$0xff] %vm123_vm0, %v4448_v7 }
  0x49   :  { %182 = vst.msk [vmem:[#allocation2 + $0x1d0] sm:$0xff] %vm123_vm0, %v4448_v7 }
  0x4a   :  { %184 = vst.msk [vmem:[#allocation2 + $0x1e0] sm:$0xff] %vm123_vm0, %v4448_v7 }
  0x4b   :  { %185 = vst.msk [vmem:[#allocation2 + $0x1e8] sm:$0xff] %vm123_vm0, %v4448_v7 }
  0x4c   :  { %186 = vst.msk [vmem:[#allocation2 + $0x1f0] sm:$0xff] %vm123_vm0, %v4448_v7 }
  0x4d   :  { %188 = vst.msk [vmem:[#allocation2 + $0x200] sm:$0xff] %vm123_vm0, %v4448_v7 }
  0x4e   :  { %189 = vst.msk [vmem:[#allocation2 + $0x208] sm:$0xff] %vm123_vm0, %v4448_v7 }
  0x4f   :  { %3993 = vmatmul.msk.f32.gmra.mxu0 %vm336_vm1, %v274_v9  ;;  %190 = vst.msk [vmem:[#allocation2 + $0x210] sm:$0xff] %vm123_vm0, %v4448_v7 }
  0x50   :  { %196 = vst.msk [vmem:[#allocation2 + $0x240] sm:$0xff] %vm123_vm0, %v4448_v7 }
  0x51   :  { %197 = vst.msk [vmem:[#allocation2 + $0x248] sm:$0xff] %vm123_vm0, %v4448_v7 }
  0x52   :  { %198 = vst.msk [vmem:[#allocation2 + $0x250] sm:$0xff] %vm123_vm0, %v4448_v7 }
  0x53   :  { %200 = vst.msk [vmem:[#allocation2 + $0x260] sm:$0xff] %vm123_vm0, %v4448_v7 }
  0x54   :  { %201 = vst.msk [vmem:[#allocation2 + $0x268] sm:$0xff] %vm123_vm0, %v4448_v7 }
  0x55   :  { %202 = vst.msk [vmem:[#allocation2 + $0x270] sm:$0xff] %vm123_vm0, %v4448_v7 }
  0x56   :  { %204 = vst.msk [vmem:[#allocation2 + $0x280] sm:$0xff] %vm123_vm0, %v4448_v7 }
  0x57   :  { %3994 = vmatmul.msk.f32.gmra.mxu0 %vm336_vm1, %v275_v10  ;;  %205 = vst.msk [vmem:[#allocation2 + $0x288] sm:$0xff] %vm123_vm0, %v4448_v7  ;;  %v311_v10 = vld [vmem:[#allocation3 + $0x158] sm:$0xff] }
  0x58   :  { %206 = vst.msk [vmem:[#allocation2 + $0x290] sm:$0xff] %vm123_vm0, %v4448_v7 }
  0x59   :  { %208 = vst.msk [vmem:[#allocation2 + $0x2a0] sm:$0xff] %vm123_vm0, %v4448_v7 }
  0x5a   :  { %209 = vst.msk [vmem:[#allocation2 + $0x2a8] sm:$0xff] %vm123_vm0, %v4448_v7 }
  0x5b   :  { %210 = vst.msk [vmem:[#allocation2 + $0x2b0] sm:$0xff] %vm123_vm0, %v4448_v7 }
  0x5c   :  { %212 = vst.msk [vmem:[#allocation2 + $0x2c0] sm:$0xff] %vm123_vm0, %v4448_v7 }
  0x5d   :  { %213 = vst.msk [vmem:[#allocation2 + $0x2c8] sm:$0xff] %vm123_vm0, %v4448_v7 }
  0x5e   :  { %214 = vst.msk [vmem:[#allocation2 + $0x2d0] sm:$0xff] %vm123_vm0, %v4448_v7 }
  0x5f   :  { %3995 = vmatmul.msk.f32.gmra.mxu0 %vm336_vm1, %v276_v11  ;;  %216 = vst.msk [vmem:[#allocation2 + $0x2e0] sm:$0xff] %vm123_vm0, %v4448_v7 }
  0x60   :  { %217 = vst.msk [vmem:[#allocation2 + $0x2e8] sm:$0xff] %vm123_vm0, %v4448_v7 }
  0x61   :  { %218 = vst.msk [vmem:[#allocation2 + $0x2f0] sm:$0xff] %vm123_vm0, %v4448_v7 }
  0x62   :  { %220 = vst.msk [vmem:[#allocation2 + $0x300] sm:$0xff] %vm123_vm0, %v4448_v7 }
  0x63   :  { %221 = vst.msk [vmem:[#allocation2 + $0x308] sm:$0xff] %vm123_vm0, %v4448_v7 }
  0x64   :  { %222 = vst.msk [vmem:[#allocation2 + $0x310] sm:$0xff] %vm123_vm0, %v4448_v7 }
  0x65   :  { %224 = vst.msk [vmem:[#allocation2 + $0x320] sm:$0xff] %vm123_vm0, %v4448_v7 }
  0x66   :  { %225 = vst.msk [vmem:[#allocation2 + $0x328] sm:$0xff] %vm123_vm0, %v4448_v7 }
  0x67   :  { %3996 = vmatmul.msk.f32.gmra.mxu0 %vm336_vm1, %v277_v12  ;;  %226 = vst.msk [vmem:[#allocation2 + $0x330] sm:$0xff] %vm123_vm0, %v4448_v7  ;;  %v312_v12 = vld [vmem:[#allocation3 + $0x160] sm:$0xff] }
  0x68   :  { %228 = vst.msk [vmem:[#allocation2 + $0x340] sm:$0xff] %vm123_vm0, %v4448_v7 }
  0x69   :  { %229 = vst.msk [vmem:[#allocation2 + $0x348] sm:$0xff] %vm123_vm0, %v4448_v7 }
  0x6a   :  { %230 = vst.msk [vmem:[#allocation2 + $0x350] sm:$0xff] %vm123_vm0, %v4448_v7 }
  0x6b   :  { %232 = vst.msk [vmem:[#allocation2 + $0x360] sm:$0xff] %vm123_vm0, %v4448_v7 }
  0x6c   :  { %233 = vst.msk [vmem:[#allocation2 + $0x368] sm:$0xff] %vm123_vm0, %v4448_v7 }
  0x6d   :  { %234 = vst.msk [vmem:[#allocation2 + $0x370] sm:$0xff] %vm123_vm0, %v4448_v7 }
  0x6e   :  { %236 = vst.msk [vmem:[#allocation2 + $0x380] sm:$0xff] %vm123_vm0, %v4448_v7 }
  0x6f   :  { %3997 = vmatmul.msk.f32.gmra.mxu0 %vm336_vm1, %v278_v13  ;;  %237 = vst.msk [vmem:[#allocation2 + $0x388] sm:$0xff] %vm123_vm0, %v4448_v7 }
  0x70   :  { %238 = vst.msk [vmem:[#allocation2 + $0x390] sm:$0xff] %vm123_vm0, %v4448_v7 }
  0x71   :  { %240 = vst.msk [vmem:[#allocation2 + $0x3a0] sm:$0xff] %vm123_vm0, %v4448_v7 }
  0x72   :  { %241 = vst.msk [vmem:[#allocation2 + $0x3a8] sm:$0xff] %vm123_vm0, %v4448_v7 }
  0x73   :  { %242 = vst.msk [vmem:[#allocation2 + $0x3b0] sm:$0xff] %vm123_vm0, %v4448_v7 }
  0x74   :  { %244 = vst.msk [vmem:[#allocation2 + $0x3c0] sm:$0xff] %vm123_vm0, %v4448_v7 }
  0x75   :  { %245 = vst.msk [vmem:[#allocation2 + $0x3c8] sm:$0xff] %vm123_vm0, %v4448_v7 }
  0x76   :  { %246 = vst.msk [vmem:[#allocation2 + $0x3d0] sm:$0xff] %vm123_vm0, %v4448_v7 }
  0x77   :  { %3998 = vmatmul.msk.f32.gmra.mxu0 %vm336_vm1, %v279_v14  ;;  %248 = vst.msk [vmem:[#allocation2 + $0x3e0] sm:$0xff] %vm123_vm0, %v4448_v7  ;;  %v313_v14 = vld [vmem:[#allocation3 + $0x168] sm:$0xff] }
  0x78   :  { %249 = vst.msk [vmem:[#allocation2 + $0x3e8] sm:$0xff] %vm123_vm0, %v4448_v7 }
  0x79   :  { %250 = vst.msk [vmem:[#allocation2 + $0x3f0] sm:$0xff] %vm123_vm0, %v4448_v7 }
  0x7a   :  { %252 = vst.msk [vmem:[#allocation2 + $0x400] sm:$0xff] %vm123_vm0, %v4448_v7 }
  0x7b   :  { %253 = vst.msk [vmem:[#allocation2 + $0x408] sm:$0xff] %vm123_vm0, %v4448_v7 }
  0x7c   :  { %254 = vst.msk [vmem:[#allocation2 + $0x410] sm:$0xff] %vm123_vm0, %v4448_v7 }
  0x7d   :  { %256 = vst.msk [vmem:[#allocation2 + $0x420] sm:$0xff] %vm123_vm0, %v4448_v7 }
  0x7e   :  { %257 = vst.msk [vmem:[#allocation2 + $0x428] sm:$0xff] %vm123_vm0, %v4448_v7 }
  0x7f   :  { %3999 = vmatmul.msk.f32.gmra.mxu0 %vm336_vm1, %v280_v15  ;;  %258 = vst.msk [vmem:[#allocation2 + $0x430] sm:$0xff] %vm123_vm0, %v4448_v7 }
  0x80   :  { %260 = vst.msk [vmem:[#allocation2 + $0x440] sm:$0xff] %vm123_vm0, %v4448_v7 }
  0x81   :  { %261 = vst.msk [vmem:[#allocation2 + $0x448] sm:$0xff] %vm123_vm0, %v4448_v7 }
  0x82   :  { %262 = vst.msk [vmem:[#allocation2 + $0x450] sm:$0xff] %vm123_vm0, %v4448_v7 }
  0x87   :  { %4000 = vmatmul.msk.f32.gmra.mxu0 %vm336_vm1, %v281_v16  ;;  %v314_v16 = vld [vmem:[#allocation3 + $0x170] sm:$0xff] }
  0x8f   :  { %4001 = vmatmul.msk.f32.gmra.mxu0 %vm336_vm1, %v282_v17 }
  0x97   :  { %4002 = vmatmul.msk.f32.gmra.mxu0 %vm336_vm1, %v283_v18  ;;  %v315_v18 = vld [vmem:[#allocation3 + $0x178] sm:$0xff] }
  0x9c   :  { %v4729_v19 = vpop.f32.mrf.mxu0 }
  0x9f   :  { %4003 = vmatmul.msk.f32.gmra.mxu0 %vm336_vm1, %v284_v20 }
  0xa4   :  { %v4748_v21 = vpop.f32.mrf.mxu0 }
  0xa7   :  { %4004 = vmatmul.msk.f32.gmra.mxu0 %vm336_vm1, %v285_v22  ;;  %v316_v22 = vld [vmem:[#allocation3 + $0x180] sm:$0xff] }
  0xac   :  { %v4751_v23 = vpop.f32.mrf.mxu0 }
  0xaf   :  { %4005 = vmatmul.msk.f32.gmra.mxu0 %vm336_vm1, %v286_v24 }
  0xb4   :  { %v4754_v25 = vpop.f32.mrf.mxu0 }
  0xb7   :  { %4006 = vmatmul.msk.f32.gmra.mxu0 %vm336_vm1, %v287_v26  ;;  %v317_v26 = vld [vmem:[#allocation3 + $0x188] sm:$0xff] }
  0xbc   :  { %v4757_v27 = vpop.f32.mrf.mxu0 }
  0xbf   :  { %4007 = vmatmul.msk.f32.gmra.mxu0 %vm336_vm1, %v288_v28 }
  0xc4   :  { %v4760_v29 = vpop.f32.mrf.mxu0 }
  0xc7   :  { %4008 = vmatmul.msk.f32.gmra.mxu0 %vm336_vm1, %v289_v30  ;;  %v318_v30 = vld [vmem:[#allocation3 + $0x190] sm:$0xff] }
  0xcc   :  { %v4763_v31 = vpop.f32.mrf.mxu0 }
  0xcf   :  { %4009 = vmatmul.msk.f32.gmra.mxu0 %vm336_vm1, %v290_v32 }
  0xd4   :  { %v4766_v33 = vpop.f32.mrf.mxu0 }
  0xd7   :  { %4010 = vmatmul.msk.f32.gmra.mxu0 %vm336_vm1, %v291_v34  ;;  %v319_v34 = vld [vmem:[#allocation3 + $0x198] sm:$0xff] }
  0xdc   :  { %v4769_v35 = vpop.f32.mrf.mxu0 }
  0xdf   :  { %4011 = vmatmul.msk.f32.gmra.mxu0 %vm336_vm1, %v292_v36 }
  0xe4   :  { %v4772_v37 = vpop.f32.mrf.mxu0 }
  0xe7   :  { %4012 = vmatmul.msk.f32.gmra.mxu0 %vm336_vm1, %v293_v38  ;;  %v320_v38 = vld [vmem:[#allocation3 + $0x1a0] sm:$0xff] }
  0xec   :  { %v4775_v39 = vpop.f32.mrf.mxu0 }
  0xef   :  { %4013 = vmatmul.msk.f32.gmra.mxu0 %vm336_vm1, %v294_v40 }
  0xf4   :  { %v4778_v41 = vpop.f32.mrf.mxu0 }
  0xf7   :  { %4014 = vmatmul.msk.f32.gmra.mxu0 %vm336_vm1, %v295_v42  ;;  %v321_v42 = vld [vmem:[#allocation3 + $0x1a8] sm:$0xff] }
  0xfc   :  { %v4781_v43 = vpop.f32.mrf.mxu0 }
  0xff   :  { %4015 = vmatmul.msk.f32.gmra.mxu0 %vm336_vm1, %v296_v44 }
 0x104   :  { %v4784_v45 = vpop.f32.mrf.mxu0 }
 0x107   :  { %4016 = vmatmul.msk.f32.gmra.mxu0 %vm336_vm1, %v297_v46  ;;  %v322_v46 = vld [vmem:[#allocation3 + $0x1b0] sm:$0xff] }
 0x10c   :  { %v4787_v47 = vpop.f32.mrf.mxu0 }
 0x10f   :  { %4017 = vmatmul.msk.f32.gmra.mxu0 %vm336_vm1, %v298_v48  ;;  %v329_v48 = vld [vmem:[#allocation3 + $0x1e8] sm:$0xff] }
 0x110   :  { %4048 = vmatmul.msk.f32.vlgmr.msra.gmra.mxu3 %vm336_vm1, %v329_v48  ;;  %v748_v48 = vsel %vm123_vm0, %v4760_v29, 0.0 }
 0x114   :  { %v4790_v49 = vpop.f32.mrf.mxu0 }
 0x117   :  { %4018 = vmatmul.msk.f32.gmra.mxu0 %vm336_vm1, %v299_v50 }
 0x11c   :  { %v4793_v51 = vpop.f32.mrf.mxu0 }
 0x11f   :  { %4019 = vmatmul.msk.f32.gmra.mxu0 %vm336_vm1, %v300_v52  ;;  %v323_v52 = vld [vmem:[#allocation3 + $0x1b8] sm:$0xff] }
 0x124   :  { %v4796_v53 = vpop.f32.mrf.mxu0 }
 0x127   :  { %4020 = vmatmul.msk.f32.gmra.mxu0 %vm336_vm1, %v301_v54  ;;  %v330_v54 = vld [vmem:[#allocation3 + $0x1f0] sm:$0xff] }
 0x128   :  { %4049 = vmatmul.msk.f32.gmra.mxu3 %vm336_vm1, %v330_v54  ;;  %v750_v54 = vsel %vm123_vm0, %v4763_v31, 0.0 }
 0x12c   :  { %v4799_v55 = vpop.f32.mrf.mxu0 }
 0x12f   :  { %4021 = vmatmul.msk.f32.gmra.mxu0 %vm336_vm1, %v302_v56 }
 0x134   :  { %v4802_v57 = vpop.f32.mrf.mxu0 }
 0x137   :  { %4022 = vmatmul.msk.f32.gmra.mxu0 %vm336_vm1, %v303_v58  ;;  %v324_v58 = vld [vmem:[#allocation3 + $0x1c0] sm:$0xff] }
 0x13c   :  { %v4805_v59 = vpop.f32.mrf.mxu0 }
 0x13f   :  { %4023 = vmatmul.msk.f32.gmra.mxu0 %vm336_vm1, %v304_v60  ;;  %v331_v60 = vld [vmem:[#allocation3 + $0x1f8] sm:$0xff] }
 0x140   :  { %4050 = vmatmul.msk.f32.gmra.mxu3 %vm336_vm1, %v331_v60  ;;  %v752_v60 = vsel %vm123_vm0, %v4766_v33, 0.0 }
 0x144   :  { %v4808_v61 = vpop.f32.mrf.mxu0 }
 0x147   :  { %4024 = vmatmul.msk.f32.gmra.mxu0 %vm336_vm1, %v305_v62 }
 0x14c   :  { %v4811_v63 = vpop.f32.mrf.mxu0 }
 0x14f   :  { %4025 = vmatmul.msk.f32.gmra.mxu0 %vm336_vm1, %v306_v0  ;;  %v325_v0 = vld [vmem:[#allocation3 + $0x1c8] sm:$0xff] }
 0x154   :  { %v4814_v1 = vpop.f32.mrf.mxu0 }
 0x157   :  { %4026 = vmatmul.msk.f32.gmra.mxu0 %vm336_vm1, %v307_v2 }
 0x15c   :  { %v4817_v3 = vpop.f32.mrf.mxu0 }
 0x15d   :  { %7122 = vst [vmem:[#allocation20_spill] sm:$0xff] %v4817_v3 }
 0x15f   :  { %4027 = vmatmul.msk.f32.gmra.mxu0 %vm336_vm1, %v308_v4  ;;  %v326_v4 = vld [vmem:[#allocation3 + $0x1d0] sm:$0xff] }
 0x164   :  { %v4820_v5 = vpop.f32.mrf.mxu0 }
 0x167   :  { %4028 = vmatmul.msk.f32.gmra.mxu0 %vm336_vm1, %v309_v6 }
 0x16c   :  { %v4823_v7 = vpop.f32.mrf.mxu0 }
 0x16f   :  { %4029 = vmatmul.msk.f32.gmra.mxu0 %vm336_vm1, %v310_v8  ;;  %v327_v8 = vld [vmem:[#allocation3 + $0x1d8] sm:$0xff] }
 0x174   :  { %v4826_v9 = vpop.f32.mrf.mxu0 }
 0x177   :  { %4030 = vmatmul.msk.f32.gmra.mxu0 %vm336_vm1, %v311_v10 }
 0x17c   :  { %v4829_v11 = vpop.f32.mrf.mxu0 }
 0x17d   :  { %7123 = vst [vmem:[#allocation21_spill] sm:$0xff] %v4829_v11 }
 0x17f   :  { %4031 = vmatmul.msk.f32.gmra.mxu0 %vm336_vm1, %v312_v12  ;;  %v328_v12 = vld [vmem:[#allocation3 + $0x1e0] sm:$0xff] }
 0x184   :  { %v4832_v13 = vpop.f32.mrf.mxu0 }
 0x187   :  { %4032 = vmatmul.msk.f32.gmra.mxu0 %vm336_vm1, %v313_v14 }
 0x18c   :  { %v4835_v15 = vpop.f32.mrf.mxu0 }
 0x18f   :  { %4033 = vmatmul.msk.f32.gmra.mxu0 %vm336_vm1, %v314_v16  ;;  %v740_v16 = vsel %vm123_vm0, %v4748_v21, 0.0 }
 0x194   :  { %v4838_v17 = vpop.f32.mrf.mxu0 }
 0x197   :  { %4034 = vmatmul.msk.f32.gmra.mxu0 %vm336_vm1, %v315_v18  ;;  %v739_v18 = vsel %vm123_vm0, %v4729_v19, 0.0 }
 0x19c   :  { %v4841_v20 = vpop.f32.mrf.mxu0 }
 0x19d   :  { %7124 = vst [vmem:[#allocation22_spill] sm:$0xff] %v4841_v20 }
 0x19f   :  { %4035 = vmatmul.msk.f32.gmra.mxu0 %vm336_vm1, %v316_v22  ;;  %v742_v22 = vsel %vm123_vm0, %v4751_v23, 0.0 }
 0x1a4   :  { %v4844_v24 = vpop.f32.mrf.mxu0 }
 0x1a7   :  { %4036 = vmatmul.msk.f32.gmra.mxu0 %vm336_vm1, %v317_v26  ;;  %v741_v26 = vadd.f32 %v740_v16, %v739_v18  ;;  %v756_v16 = vsel %vm123_vm0, %v4772_v37, 0.0 }
 0x1ac   :  { %v4847_v28 = vpop.f32.mrf.mxu0 }
 0x1af   :  { %4037 = vmatmul.msk.f32.gmra.mxu0 %vm336_vm1, %v318_v30  ;;  %v744_v30 = vsel %vm123_vm0, %v4754_v25, 0.0 }
 0x1b4   :  { %v4850_v32 = vpop.f32.mrf.mxu0 }
 0x1b7   :  { %4038 = vmatmul.msk.f32.gmra.mxu0 %vm336_vm1, %v319_v34  ;;  %v743_v34 = vadd.f32 %v742_v22, %v741_v26  ;;  %v758_v22 = vsel %vm123_vm0, %v4775_v39, 0.0 }
 0x1bc   :  { %v4853_v36 = vpop.f32.mrf.mxu0 }
 0x1bd   :  { %7125 = vst [vmem:[#allocation23_spill] sm:$0xff] %v4853_v36 }
 0x1bf   :  { %4039 = vmatmul.msk.f32.gmra.mxu0 %vm336_vm1, %v320_v38  ;;  %v746_v38 = vsel %vm123_vm0, %v4757_v27, 0.0 }
 0x1c4   :  { %v4856_v40 = vpop.f32.mrf.mxu0 }
 0x1c7   :  { %4040 = vmatmul.msk.f32.gmra.mxu0 %vm336_vm1, %v321_v42  ;;  %v745_v42 = vadd.f32 %v744_v30, %v743_v34  ;;  %v760_v30 = vsel %vm123_vm0, %v4778_v41, 0.0 }
 0x1cc   :  { %v4859_v44 = vpop.f32.mrf.mxu0 }
 0x1cf   :  { %4041 = vmatmul.msk.f32.gmra.mxu0 %vm336_vm1, %v322_v46 }
 0x1d4   :  { %v4863_v50 = vpop.f32.mrf.mxu0 }
 0x1d7   :  { %4042 = vmatmul.msk.f32.gmra.mxu0 %vm336_vm1, %v323_v52  ;;  %v747_v52 = vadd.f32 %v746_v38, %v745_v42  ;;  %v762_v38 = vsel %vm123_vm0, %v4781_v43, 0.0 }
 0x1dc   :  { %v4867_v56 = vpop.f32.mrf.mxu0 }
 0x1dd   :  { %7126 = vst [vmem:[#allocation24_spill] sm:$0xff] %v4867_v56 }
 0x1df   :  { %4043 = vmatmul.msk.f32.gmra.mxu0 %vm336_vm1, %v324_v58  ;;  %v749_v58 = vadd.f32 %v748_v48, %v747_v52  ;;  %v764_v52 = vsel %vm123_vm0, %v4784_v45, 0.0 }
 0x1e4   :  { %v4871_v62 = vpop.f32.mrf.mxu0 }
 0x1e7   :  { %4044 = vmatmul.msk.f32.gmra.mxu0 %vm336_vm1, %v325_v0  ;;  %v751_v0 = vadd.f32 %v750_v54, %v749_v58  ;;  %v766_v58 = vsel %vm123_vm0, %v4787_v47, 0.0 }
 0x1ec   :  { %v4874_v2 = vpop.f32.mrf.mxu0 }
 0x1ef   :  { %4045 = vmatmul.msk.f32.gmra.mxu0 %vm336_vm1, %v326_v4  ;;  %v754_v4 = vsel %vm123_vm0, %v4769_v35, 0.0 }
 0x1f4   :  { %v4877_v6 = vpop.f32.mrf.mxu0 }
 0x1f7   :  { %4046 = vmatmul.msk.f32.gmra.mxu0 %vm336_vm1, %v327_v8  ;;  %v753_v8 = vadd.f32 %v752_v60, %v751_v0  ;;  %v768_v0 = vsel %vm123_vm0, %v4790_v49, 0.0 }
 0x1f9   :  { %v755_v18 = vadd.f32 %v754_v4, %v753_v8  ;;  %v770_v8 = vsel %vm123_vm0, %v4793_v51, 0.0 }
 0x1fb   :  { %v757_v26 = vadd.f32 %v756_v16, %v755_v18 }
 0x1fc   :  { %v4880_v10 = vpop.f32.mrf.mxu0 }
 0x1fd   :  { %7127 = vst [vmem:[#allocation25_spill] sm:$0xff] %v4880_v10  ;;  %v759_v34 = vadd.f32 %v758_v22, %v757_v26  ;;  %v772_v22 = vsel %vm123_vm0, %v4796_v53, 0.0 }
 0x1ff   :  { %4047 = vmatmul.msk.f32.gmra.mxu0 %vm336_vm1, %v328_v12  ;;  %v761_v42 = vadd.f32 %v760_v30, %v759_v34  ;;  %v774_v30 = vsel %vm123_vm0, %v4799_v55, 0.0 }
 0x201   :  { %v763_v54 = vadd.f32 %v762_v38, %v761_v42  ;;  %v776_v38 = vsel %vm123_vm0, %v4802_v57, 0.0 }
 0x203   :  { %v765_v60 = vadd.f32 %v764_v52, %v763_v54  ;;  %v778_v52 = vsel %vm123_vm0, %v4805_v59, 0.0 }
 0x204   :  { %v4883_v14 = vpop.f32.mrf.mxu0 }
 0x205   :  { %v767_v4 = vadd.f32 %v766_v58, %v765_v60  ;;  %v780_v60 = vsel %vm123_vm0, %v4808_v61, 0.0 }
 0x207   :  { %v769_v16 = vadd.f32 %v768_v0, %v767_v4  ;;  %v782_v4 = vsel %vm123_vm0, %v4811_v63, 0.0 }
 0x209   :  { %v771_v26 = vadd.f32 %v770_v8, %v769_v16  ;;  %v784_v16 = vsel %vm123_vm0, %v4814_v1, 0.0 }
 0x20b   :  { %v773_v34 = vadd.f32 %v772_v22, %v771_v26  ;;  %v786_v26 = vsel %vm123_vm0, %v4817_v3, 0.0 }
 0x20c   :  { %v4895_v46 = vpop.f32.mrf.mxu0 }
 0x20d   :  { %7128 = vst [vmem:[#allocation26_spill] sm:$0xff] %v4895_v46  ;;  %v775_v42 = vadd.f32 %v774_v30, %v773_v34 }
 0x20f   :  { %v777_v54 = vadd.f32 %v776_v38, %v775_v42  ;;  %v788_v38 = vsel %vm123_vm0, %v4820_v5, 0.0 }
 0x211   :  { %v779_v0 = vadd.f32 %v778_v52, %v777_v54  ;;  %v790_v52 = vsel %vm123_vm0, %v4823_v7, 0.0 }
 0x213   :  { %v781_v8 = vadd.f32 %v780_v60, %v779_v0  ;;  %v792_v60 = vsel %vm123_vm0, %v4826_v9, 0.0 }
 0x214   :  { %v4905_v12 = vpop.f32.mrf.mxu0 }
 0x215   :  { %v783_v22 = vadd.f32 %v782_v4, %v781_v8  ;;  %v794_v4 = vsel %vm123_vm0, %v4829_v11, 0.0 }
 0x217   :  { %v785_v30 = vadd.f32 %v784_v16, %v783_v22  ;;  %v796_v16 = vsel %vm123_vm0, %v4832_v13, 0.0 }
 0x219   :  { %v787_v42 = vadd.f32 %v786_v26, %v785_v30  ;;  %v798_v26 = vsel %vm123_vm0, %v4835_v15, 0.0 }
 0x21b   :  { %v789_v54 = vadd.f32 %v788_v38, %v787_v42  ;;  %v800_v38 = vsel %vm123_vm0, %v4838_v17, 0.0 }
 0x21c   :  { %v4915_v48 = vpop.f32.mrf.mxu0 }
 0x21d   :  { %7129 = vst [vmem:[#allocation27_spill] sm:$0xff] %v4915_v48  ;;  %v791_v0 = vadd.f32 %v790_v52, %v789_v54  ;;  %v802_v52 = vsel %vm123_vm0, %v4841_v20, 0.0 }
 0x21f   :  { %v793_v8 = vadd.f32 %v792_v60, %v791_v0  ;;  %v804_v60 = vsel %vm123_vm0, %v4844_v24, 0.0 }
 0x221   :  { %v795_v22 = vadd.f32 %v794_v4, %v793_v8  ;;  %v806_v4 = vsel %vm123_vm0, %v4847_v28, 0.0 }
 0x223   :  { %v797_v30 = vadd.f32 %v796_v16, %v795_v22  ;;  %v808_v16 = vsel %vm123_vm0, %v4850_v32, 0.0 }
 0x224   :  { %v4925_v18 = vpop.f32.mrf.mxu0 }
 0x225   :  { %7130 = vst [vmem:[#allocation28_spill] sm:$0xff] %v4925_v18  ;;  %v799_v42 = vadd.f32 %v798_v26, %v797_v30  ;;  %v810_v26 = vsel %vm123_vm0, %v4853_v36, 0.0 }
 0x227   :  { %v801_v54 = vadd.f32 %v800_v38, %v799_v42  ;;  %v812_v38 = vsel %vm123_vm0, %v4856_v40, 0.0 }
 0x229   :  { %v803_v0 = vadd.f32 %v802_v52, %v801_v54  ;;  %v814_v52 = vsel %vm123_vm0, %v4859_v44, 0.0 }
 0x22b   :  { %v805_v8 = vadd.f32 %v804_v60, %v803_v0  ;;  %v816_v60 = vsel %vm123_vm0, %v4863_v50, 0.0 }
 0x22c   :  { %v4935_v58 = vpop.f32.mrf.mxu0 }
 0x22d   :  { %7131 = vst [vmem:[#allocation29_spill] sm:$0xff] %v4935_v58  ;;  %v807_v22 = vadd.f32 %v806_v4, %v805_v8  ;;  %v818_v4 = vsel %vm123_vm0, %v4867_v56, 0.0 }
 0x22f   :  { %v809_v30 = vadd.f32 %v808_v16, %v807_v22  ;;  %v820_v16 = vsel %vm123_vm0, %v4871_v62, 0.0 }
 0x231   :  { %v811_v42 = vadd.f32 %v810_v26, %v809_v30  ;;  %v822_v26 = vsel %vm123_vm0, %v4874_v2, 0.0 }
 0x233   :  { %v813_v54 = vadd.f32 %v812_v38, %v811_v42  ;;  %v824_v38 = vsel %vm123_vm0, %v4877_v6, 0.0 }
 0x234   :  { %v4945_v34 = vpop.f32.mrf.mxu0 }
 0x235   :  { %7132 = vst [vmem:[#allocation30_spill] sm:$0xff] %v4945_v34  ;;  %v815_v0 = vadd.f32 %v814_v52, %v813_v54  ;;  %v826_v52 = vsel %vm123_vm0, %v4880_v10, 0.0 }
 0x237   :  { %v817_v8 = vadd.f32 %v816_v60, %v815_v0  ;;  %v828_v60 = vsel %vm123_vm0, %v4883_v14, 0.0 }
 0x239   :  { %v819_v22 = vadd.f32 %v818_v4, %v817_v8  ;;  %v830_v4 = vsel %vm123_vm0, %v4895_v46, 0.0  ;;  %v5011_v46 = vpop.f32.mrf.mxu3 }
 0x23a   :  { %7138 = vst [vmem:[#allocation36_spill] sm:$0xff] %v5011_v46 }
 0x23b   :  { %v821_v30 = vadd.f32 %v820_v16, %v819_v22  ;;  %v832_v16 = vsel %vm123_vm0, %v4905_v12, 0.0 }
 0x23c   :  { %v4955_v3 = vpop.f32.mrf.mxu0 }
 0x23d   :  { %7133 = vst [vmem:[#allocation31_spill] sm:$0xff] %v4955_v3  ;;  %v823_v42 = vadd.f32 %v822_v26, %v821_v30  ;;  %v834_v26 = vsel %vm123_vm0, %v4915_v48, 0.0 }
 0x23f   :  { %v825_v54 = vadd.f32 %v824_v38, %v823_v42  ;;  %v836_v38 = vsel %vm123_vm0, %v4925_v18, 0.0 }
 0x241   :  { %v827_v0 = vadd.f32 %v826_v52, %v825_v54  ;;  %v838_v52 = vsel %vm123_vm0, %v4935_v58, 0.0 }
 0x243   :  { %v829_v8 = vadd.f32 %v828_v60, %v827_v0  ;;  %v840_v60 = vsel %vm123_vm0, %v4945_v34, 0.0 }
 0x244   :  { %v4965_v11 = vpop.f32.mrf.mxu0 }
 0x245   :  { %7134 = vst [vmem:[#allocation32_spill] sm:$0xff] %v4965_v11  ;;  %v831_v22 = vadd.f32 %v830_v4, %v829_v8  ;;  %v842_v4 = vsel %vm123_vm0, %v4955_v3, 0.0  ;;  %v5023_v3 = vpop.f32.mrf.mxu3 }
 0x246   :  { %7139 = vst [vmem:[#allocation37_spill] sm:$0xff] %v5023_v3 }
 0x247   :  { %v833_v30 = vadd.f32 %v832_v16, %v831_v22  ;;  %v844_v22 = vsel %vm123_vm0, %v4965_v11, 0.0 }
 0x249   :  { %v835_v42 = vadd.f32 %v834_v26, %v833_v30 }
 0x24b   :  { %v837_v54 = vadd.f32 %v836_v38, %v835_v42 }
 0x24c   :  { %v4975_v20 = vpop.f32.mrf.mxu0 }
 0x24d   :  { %7135 = vst [vmem:[#allocation33_spill] sm:$0xff] %v4975_v20  ;;  %v839_v0 = vadd.f32 %v838_v52, %v837_v54  ;;  %v846_v26 = vsel %vm123_vm0, %v4975_v20, 0.0 }
 0x24f   :  { %v841_v8 = vadd.f32 %v840_v60, %v839_v0 }
 0x251   :  { %v843_v18 = vadd.f32 %v842_v4, %v841_v8 }
 0x253   :  { %v845_v30 = vadd.f32 %v844_v22, %v843_v18 }
 0x254   :  { %v4985_v36 = vpop.f32.mrf.mxu0 }
 0x255   :  { %7136 = vst [vmem:[#allocation34_spill] sm:$0xff] %v4985_v36  ;;  %v848_v38 = vsel %vm123_vm0, %v4985_v36, 0.0  ;;  %v847_v42 = vadd.f32 %v846_v26, %v845_v30  ;;  %v5029_v36 = vpop.f32.mrf.mxu3 }
 0x256   :  { %7140 = vst [vmem:[#allocation38_spill] sm:$0xff] %v5029_v36 }
 0x257   :  { %v849_v54 = vadd.f32 %v848_v38, %v847_v42  ;;  %v860_v38 = vsel %vm123_vm0, %v5011_v46, 0.0 }
 0x25c   :  { %v4995_v56 = vpop.f32.mrf.mxu0 }
 0x25d   :  { %7137 = vst [vmem:[#allocation35_spill] sm:$0xff] %v4995_v56  ;;  %v850_v52 = vsel %vm123_vm0, %v4995_v56, 0.0 }
 0x25e   :  { %v851_v0 = vadd.f32 %v850_v52, %v849_v54  ;;  %v862_v52 = vsel %vm123_vm0, %v5023_v3, 0.0  ;;  %v864_v54 = vsel %vm123_vm0, %v5029_v36, 0.0 }
 0x264   :  { %v717_v10 = vpop.f32.mrf.mxu0 }
 0x265   :  { %v852_v60 = vsel %vm123_vm0, %v717_v10, 0.0 }
 0x266   :  { %v853_v8 = vadd.f32 %v852_v60, %v851_v0  ;;  %v4449_v0 = vmov 512.0  }
 0x267   :  { %4249 = vrcp.f32 %v4449_v0 }
 0x26c   :  { %v720_v16 = vpop.f32.mrf.mxu0 }
 0x26d   :  { %v854_v4 = vsel %vm123_vm0, %v720_v16, 0.0 }
 0x26e   :  { %v855_v18 = vadd.f32 %v854_v4, %v853_v8  ;;  %v4250_v8 = vpop.eup %4249 }
 0x26f   :  { %vm877_vm2 = vweird.f32 %v4250_v8 }
 0x274   :  { %v723_v34 = vpop.f32.mrf.mxu0 }
 0x275   :  { %v856_v20 = vsel %vm123_vm0, %v723_v34, 0.0 }
 0x276   :  { %v857_v22 = vadd.f32 %v856_v20, %v855_v18 }
 0x27c   :  { %v726_v11 = vpop.f32.mrf.mxu0 }
 0x27d   :  { %v858_v26 = vsel %vm123_vm0, %v726_v11, 0.0 }
 0x27e   :  { %v859_v30 = vadd.f32 %v858_v26, %v857_v22  ;;  %v873_v22 = vmul.f32 512.0, %v4250_v8 }
 0x280   :  { %v861_v42 = vadd.f32 %v860_v38, %v859_v30  ;;  %v874_v56 = vsub.f32 1.0, %v873_v22 }
 0x282   :  { %v863_v60 = vadd.f32 %v862_v52, %v861_v42  ;;  %v875_v48 = vmul.f32 %v4250_v8, %v874_v56 }
 0x284   :  { %v865_v20 = vadd.f32 %v864_v54, %v863_v60  ;;  %v876_v30 = vadd.f32 %v4250_v8, %v875_v48 }
 0x286   :  { %v866_v4 = vrot.slane %v865_v20, 4  ;;  %v5037_v3 = vsel %vm877_vm2, %v4250_v8, %v876_v30 }
 0x288   :  { %v867_v18 = vadd.f32 %v866_v4, %v865_v20 }
 0x28a   :  { %v868_v26 = vrot.slane %v867_v18, 2 }
 0x28c   :  { %v869_v58 = vadd.f32 %v868_v26, %v867_v18 }
 0x28e   :  { %v870_v46 = vrot.slane %v869_v58, 1 }
 0x290   :  { %v871_v38 = vadd.f32 %v870_v46, %v869_v58 }
 0x292   :  { %v5040_v36 = vmul.f32 %v5037_v3, %v871_v38 }
 0x294   :  { %v5043_v42 = vsub.f32 %v717_v10, %v5040_v36  ;;  %v5046_v52 = vsub.f32 %v720_v16, %v5040_v36  ;;  %v5049_v54 = vsub.f32 %v723_v34, %v5040_v36  ;;  %v5052_v56 = vsub.f32 %v726_v11, %v5040_v36 }
 0x295   :  { %v5056_v46 = vsub.f32 %v4729_v19, %v5040_v36  ;;  %v5060_v48 = vsub.f32 %v4748_v21, %v5040_v36  ;;  %v5064_v10 = vsub.f32 %v4751_v23, %v5040_v36  ;;  %v5068_v58 = vsub.f32 %v4754_v25, %v5040_v36 }
 0x296   :  { %7141 = vst [vmem:[#allocation39_spill] sm:$0xff] %v5043_v42  ;;  %v5076_v19 = vsub.f32 %v4757_v27, %v5040_v36  ;;  %v5082_v23 = vsub.f32 %v4760_v29, %v5040_v36  ;;  %v5090_v20 = vsub.f32 %v4763_v31, %v5040_v36  ;;  %v5097_v29 = vsub.f32 %v4766_v33, %v5040_v36 }
 0x297   :  { %7142 = vst [vmem:[#allocation40_spill] sm:$0xff] %v5046_v52  ;;  %v944_v11 = vmul.f32 %v5056_v46, %v5056_v46  ;;  %v945_v34 = vmul.f32 %v5060_v48, %v5060_v48  ;;  %v946_v21 = vmul.f32 %v5064_v10, %v5064_v10  ;;  %v947_v25 = vmul.f32 %v5068_v58, %v5068_v58 }
 0x298   :  { %7143 = vst [vmem:[#allocation41_spill] sm:$0xff] %v5049_v54  ;;  %v948_v27 = vmul.f32 %v5076_v19, %v5076_v19  ;;  %v949_v18 = vmul.f32 %v5082_v23, %v5082_v23  ;;  %v5104_v31 = vsub.f32 %v4769_v35, %v5040_v36  ;;  %v950_v30 = vmul.f32 %v5090_v20, %v5090_v20 }
 0x299   :  { %7144 = vst [vmem:[#allocation42_spill] sm:$0xff] %v5052_v56  ;;  %v1008_v16 = vsel %vm123_vm0, %v944_v11, 0.0  ;;  %v1009_v60 = vsel %vm123_vm0, %v945_v34, 0.0  ;;  %v1011_v4 = vsel %vm123_vm0, %v946_v21, 0.0  ;;  %v1013_v22 = vsel %vm123_vm0, %v947_v25, 0.0 }
 0x29a   :  { %v1010_v0 = vadd.f32 %v1009_v60, %v1008_v16  ;;  %v1015_v38 = vsel %vm123_vm0, %v948_v27, 0.0  ;;  %v5111_v33 = vsub.f32 %v4772_v37, %v5040_v36  ;;  %v951_v34 = vmul.f32 %v5097_v29, %v5097_v29 }
 0x29b   :  { %v1017_v21 = vsel %vm123_vm0, %v949_v18, 0.0  ;;  %v5118_v35 = vsub.f32 %v4775_v39, %v5040_v36  ;;  %v952_v16 = vmul.f32 %v5104_v31, %v5104_v31  ;;  %v1019_v60 = vsel %vm123_vm0, %v950_v30, 0.0 }
 0x29c   :  { %v1012_v8 = vadd.f32 %v1011_v4, %v1010_v0  ;;  %v5125_v37 = vsub.f32 %v4778_v41, %v5040_v36  ;;  %v953_v27 = vmul.f32 %v5111_v33, %v5111_v33  ;;  %v1021_v4 = vsel %vm123_vm0, %v951_v34, 0.0 }
 0x29d   :  { %v5132_v39 = vsub.f32 %v4781_v43, %v5040_v36  ;;  %v954_v18 = vmul.f32 %v5118_v35, %v5118_v35  ;;  %v5139_v41 = vsub.f32 %v4784_v45, %v5040_v36  ;;  %v5146_v43 = vsub.f32 %v4787_v47, %v5040_v36 }
 0x29e   :  { %v1014_v26 = vadd.f32 %v1013_v22, %v1012_v8  ;;  %7145 = vst [vmem:[#allocation43_spill] sm:$0xff] %v5125_v37  ;;  %v1023_v22 = vsel %vm123_vm0, %v952_v16, 0.0  ;;  %v955_v30 = vmul.f32 %v5125_v37, %v5125_v37  ;;  %v5153_v45 = vsub.f32 %v4790_v49, %v5040_v36 }
 0x29f   :  { %7146 = vst [vmem:[#allocation44_spill] sm:$0xff] %v5132_v39  ;;  %v956_v34 = vmul.f32 %v5132_v39, %v5132_v39  ;;  %v957_v16 = vmul.f32 %v5139_v41, %v5139_v41  ;;  %v5160_v47 = vsub.f32 %v4793_v51, %v5040_v36  ;;  %v5167_v49 = vsub.f32 %v4796_v53, %v5040_v36 }
 0x2a0   :  { %v1016_v11 = vadd.f32 %v1015_v38, %v1014_v26  ;;  %7147 = vst [vmem:[#allocation45_spill] sm:$0xff] %v5139_v41  ;;  %v1025_v38 = vsel %vm123_vm0, %v953_v27, 0.0  ;;  %v958_v27 = vmul.f32 %v5146_v43, %v5146_v43  ;;  %v5174_v51 = vsub.f32 %v4799_v55, %v5040_v36 }
 0x2a1   :  { %7148 = vst [vmem:[#allocation46_spill] sm:$0xff] %v5146_v43  ;;  %v5181_v53 = vsub.f32 %v4802_v57, %v5040_v36  ;;  %v5188_v55 = vsub.f32 %v4805_v59, %v5040_v36  ;;  %v5195_v57 = vsub.f32 %v4808_v61, %v5040_v36  ;;  %v5202_v59 = vsub.f32 %v4811_v63, %v5040_v36 }
 0x2a2   :  { %v1018_v25 = vadd.f32 %v1017_v21, %v1016_v11  ;;  %v1027_v21 = vsel %vm123_vm0, %v954_v18, 0.0  ;;  %7149 = vst [vmem:[#allocation47_spill] sm:$0xff] %v5153_v45  ;;  %v959_v18 = vmul.f32 %v5153_v45, %v5153_v45  ;;  %v5209_v61 = vsub.f32 %v4814_v1, %v5040_v36 }
 0x2a3   :  { %7150 = vst [vmem:[#allocation48_spill] sm:$0xff] %v5160_v47  ;;  %v5223_v1 = vsub.f32 %v4820_v5, %v5040_v36  ;;  %v5237_v5 = vsub.f32 %v4826_v9, %v5040_v36  ;;  %v5251_v9 = vsub.f32 %v4832_v13, %v5040_v36  ;;  %v5265_v13 = vsub.f32 %v4838_v17, %v5040_v36 }
 0x2a4   :  { %v1020_v0 = vadd.f32 %v1019_v60, %v1018_v25  ;;  %v1029_v60 = vsel %vm123_vm0, %v955_v30, 0.0  ;;  %7151 = vst [vmem:[#allocation49_spill] sm:$0xff] %v5167_v49  ;;  %v960_v30 = vmul.f32 %v5160_v47, %v5160_v47  ;;  %v5279_v17 = vsub.f32 %v4844_v24, %v5040_v36 }
 0x2a5   :  { %7152 = vst [vmem:[#allocation50_spill] sm:$0xff] %v5174_v51  ;;  %v5293_v24 = vsub.f32 %v4850_v32, %v5040_v36  ;;  %v5307_v32 = vsub.f32 %v4856_v40, %v5040_v36  ;;  %v5321_v40 = vsub.f32 %v4863_v50, %v5040_v36  ;;  %v5335_v50 = vsub.f32 %v4871_v62, %v5040_v36 }
 0x2a6   :  { %v1022_v8 = vadd.f32 %v1021_v4, %v1020_v0  ;;  %v1031_v4 = vsel %vm123_vm0, %v956_v34, 0.0  ;;  %7153 = vst [vmem:[#allocation51_spill] sm:$0xff] %v5181_v53  ;;  %v961_v34 = vmul.f32 %v5167_v49, %v5167_v49  ;;  %v5349_v62 = vsub.f32 %v4877_v6, %v5040_v36 }
 0x2a7   :  { %7154 = vst [vmem:[#allocation52_spill] sm:$0xff] %v5188_v55  ;;  %v5363_v6 = vsub.f32 %v4883_v14, %v5040_v36  ;;  %v5377_v14 = vsub.f32 %v4905_v12, %v5040_v36 }
 0x2a8   :  { %v1024_v26 = vadd.f32 %v1023_v22, %v1022_v8  ;;  %v1033_v22 = vsel %vm123_vm0, %v957_v16, 0.0  ;;  %v962_v16 = vmul.f32 %v5174_v51, %v5174_v51 }
 0x2a9   :  { %v991_v49 = vmul.f32 %v5377_v14, %v5377_v14 }
 0x2aa   :  { %v1026_v11 = vadd.f32 %v1025_v38, %v1024_v26  ;;  %v1035_v38 = vsel %vm123_vm0, %v958_v27, 0.0  ;;  %v963_v27 = vmul.f32 %v5181_v53, %v5181_v53 }
 0x2ac   :  { %v1028_v25 = vadd.f32 %v1027_v21, %v1026_v11  ;;  %v1037_v21 = vsel %vm123_vm0, %v959_v18, 0.0  ;;  %v964_v18 = vmul.f32 %v5188_v55, %v5188_v55 }
 0x2ae   :  { %v1030_v0 = vadd.f32 %v1029_v60, %v1028_v25  ;;  %v1039_v60 = vsel %vm123_vm0, %v960_v30, 0.0  ;;  %v965_v30 = vmul.f32 %v5195_v57, %v5195_v57 }
 0x2b0   :  { %v1032_v8 = vadd.f32 %v1031_v4, %v1030_v0  ;;  %v1041_v4 = vsel %vm123_vm0, %v961_v34, 0.0  ;;  %v7155_v34 = vld [vmem:[#allocation20_spill] sm:$0xff] }
 0x2b1   :  { %v5216_v63 = vsub.f32 %v7155_v34, %v5040_v36 }
 0x2b2   :  { %v1034_v26 = vadd.f32 %v1033_v22, %v1032_v8  ;;  %v1043_v22 = vsel %vm123_vm0, %v962_v16, 0.0 }
 0x2b4   :  { %v1036_v11 = vadd.f32 %v1035_v38, %v1034_v26  ;;  %v1045_v38 = vsel %vm123_vm0, %v963_v27, 0.0 }
 0x2b6   :  { %v1038_v25 = vadd.f32 %v1037_v21, %v1036_v11  ;;  %v966_v21 = vmul.f32 %v5202_v59, %v5202_v59 }
 0x2b8   :  { %v1040_v0 = vadd.f32 %v1039_v60, %v1038_v25  ;;  %v1047_v25 = vsel %vm123_vm0, %v964_v18, 0.0  ;;  %v967_v60 = vmul.f32 %v5209_v61, %v5209_v61  ;;  %v1051_v18 = vsel %vm123_vm0, %v966_v21, 0.0 }
 0x2ba   :  { %v1042_v8 = vadd.f32 %v1041_v4, %v1040_v0  ;;  %v1049_v0 = vsel %vm123_vm0, %v965_v30, 0.0  ;;  %v5230_v4 = vsub.f32 %v4823_v7, %v5040_v36  ;;  %v1053_v30 = vsel %vm123_vm0, %v967_v60, 0.0 }
 0x2bc   :  { %v1044_v26 = vadd.f32 %v1043_v22, %v1042_v8  ;;  %v968_v8 = vmul.f32 %v5216_v63, %v5216_v63  ;;  %v970_v34 = vmul.f32 %v5230_v4, %v5230_v4 }
 0x2be   :  { %v1046_v11 = vadd.f32 %v1045_v38, %v1044_v26  ;;  %v969_v26 = vmul.f32 %v5223_v1, %v5223_v1  ;;  %v1055_v21 = vsel %vm123_vm0, %v968_v8, 0.0  ;;  %v1059_v8 = vsel %vm123_vm0, %v970_v34, 0.0 }
 0x2c0   :  { %v1048_v16 = vadd.f32 %v1047_v25, %v1046_v11  ;;  %v7156_v11 = vld [vmem:[#allocation21_spill] sm:$0xff]  ;;  %v1057_v60 = vsel %vm123_vm0, %v969_v26, 0.0 }
 0x2c1   :  { %v5244_v7 = vsub.f32 %v7156_v11, %v5040_v36  ;;  %v7157_v11 = vld [vmem:[#allocation22_spill] sm:$0xff] }
 0x2c2   :  { %v1050_v27 = vadd.f32 %v1049_v0, %v1048_v16  ;;  %v971_v16 = vmul.f32 %v5237_v5, %v5237_v5 }
 0x2c4   :  { %v1052_v22 = vadd.f32 %v1051_v18, %v1050_v27  ;;  %v5258_v27 = vsub.f32 %v4835_v15, %v5040_v36  ;;  %v972_v18 = vmul.f32 %v5244_v7, %v5244_v7  ;;  %v1061_v26 = vsel %vm123_vm0, %v971_v16, 0.0 }
 0x2c5   :  { %v5272_v15 = vsub.f32 %v7157_v11, %v5040_v36 }
 0x2c6   :  { %v1054_v38 = vadd.f32 %v1053_v30, %v1052_v22  ;;  %v973_v30 = vmul.f32 %v5251_v9, %v5251_v9  ;;  %v1063_v34 = vsel %vm123_vm0, %v972_v18, 0.0 }
 0x2c8   :  { %v1056_v25 = vadd.f32 %v1055_v21, %v1054_v38  ;;  %v974_v21 = vmul.f32 %v5258_v27, %v5258_v27  ;;  %v1065_v16 = vsel %vm123_vm0, %v973_v30, 0.0 }
 0x2ca   :  { %v1058_v0 = vadd.f32 %v1057_v60, %v1056_v25  ;;  %v975_v60 = vmul.f32 %v5265_v13, %v5265_v13  ;;  %v1067_v18 = vsel %vm123_vm0, %v974_v21, 0.0 }
 0x2cc   :  { %v1060_v22 = vadd.f32 %v1059_v8, %v1058_v0  ;;  %v5286_v8 = vsub.f32 %v4847_v28, %v5040_v36  ;;  %v1069_v30 = vsel %vm123_vm0, %v975_v60, 0.0 }
 0x2ce   :  { %v1062_v38 = vadd.f32 %v1061_v26, %v1060_v22  ;;  %v976_v22 = vmul.f32 %v5272_v15, %v5272_v15 }
 0x2d0   :  { %v1064_v25 = vadd.f32 %v1063_v34, %v1062_v38  ;;  %v977_v38 = vmul.f32 %v5279_v17, %v5279_v17  ;;  %v7158_v34 = vld [vmem:[#allocation23_spill] sm:$0xff]  ;;  %v1071_v21 = vsel %vm123_vm0, %v976_v22, 0.0 }
 0x2d1   :  { %v5300_v28 = vsub.f32 %v7158_v34, %v5040_v36  ;;  %v981_v34 = vmul.f32 %v5307_v32, %v5307_v32 }
 0x2d2   :  { %v1066_v0 = vadd.f32 %v1065_v16, %v1064_v25  ;;  %v978_v25 = vmul.f32 %v5286_v8, %v5286_v8  ;;  %v1073_v60 = vsel %vm123_vm0, %v977_v38, 0.0 }
 0x2d4   :  { %v1068_v26 = vadd.f32 %v1067_v18, %v1066_v0  ;;  %v979_v0 = vmul.f32 %v5293_v24, %v5293_v24  ;;  %v1075_v22 = vsel %vm123_vm0, %v978_v25, 0.0 }
 0x2d6   :  { %v1070_v11 = vadd.f32 %v1069_v30, %v1068_v26  ;;  %v5314_v26 = vsub.f32 %v4859_v44, %v5040_v36  ;;  %v980_v30 = vmul.f32 %v5300_v28, %v5300_v28  ;;  %v1077_v38 = vsel %vm123_vm0, %v979_v0, 0.0 }
 0x2d7   :  { %v1081_v0 = vsel %vm123_vm0, %v981_v34, 0.0 }
 0x2d8   :  { %v1072_v16 = vadd.f32 %v1071_v21, %v1070_v11  ;;  %v1079_v25 = vsel %vm123_vm0, %v980_v30, 0.0 }
 0x2da   :  { %v1074_v18 = vadd.f32 %v1073_v60, %v1072_v16  ;;  %v7159_v16 = vld [vmem:[#allocation24_spill] sm:$0xff]  ;;  %v982_v60 = vmul.f32 %v5314_v26, %v5314_v26 }
 0x2db   :  { %v5328_v44 = vsub.f32 %v7159_v16, %v5040_v36 }
 0x2dc   :  { %v1076_v11 = vadd.f32 %v1075_v22, %v1074_v18  ;;  %v983_v22 = vmul.f32 %v5321_v40, %v5321_v40  ;;  %v1083_v30 = vsel %vm123_vm0, %v982_v60, 0.0 }
 0x2dd   :  { %v984_v16 = vmul.f32 %v5328_v44, %v5328_v44 }
 0x2de   :  { %v1078_v21 = vadd.f32 %v1077_v38, %v1076_v11  ;;  %v5342_v38 = vsub.f32 %v4874_v2, %v5040_v36  ;;  %v1085_v34 = vsel %vm123_vm0, %v983_v22, 0.0 }
 0x2df   :  { %v1087_v60 = vsel %vm123_vm0, %v984_v16, 0.0 }
 0x2e0   :  { %v1080_v18 = vadd.f32 %v1079_v25, %v1078_v21  ;;  %v985_v25 = vmul.f32 %v5335_v50, %v5335_v50  ;;  %v986_v55 = vmul.f32 %v5342_v38, %v5342_v38 }
 0x2e2   :  { %v1082_v11 = vadd.f32 %v1081_v0, %v1080_v18  ;;  %v7160_v0 = vld [vmem:[#allocation25_spill] sm:$0xff]  ;;  %v1089_v22 = vsel %vm123_vm0, %v985_v25, 0.0  ;;  %v1091_v16 = vsel %vm123_vm0, %v986_v55, 0.0 }
 0x2e3   :  { %v5356_v2 = vsub.f32 %v7160_v0, %v5040_v36 }
 0x2e4   :  { %v1084_v21 = vadd.f32 %v1083_v30, %v1082_v11  ;;  %v987_v30 = vmul.f32 %v5349_v62, %v5349_v62 }
 0x2e5   :  { %v988_v53 = vmul.f32 %v5356_v2, %v5356_v2 }
 0x2e6   :  { %v1086_v18 = vadd.f32 %v1085_v34, %v1084_v21  ;;  %v7161_v34 = vld [vmem:[#allocation26_spill] sm:$0xff]  ;;  %v1093_v25 = vsel %vm123_vm0, %v987_v30, 0.0 }
 0x2e7   :  { %v5370_v0 = vsub.f32 %v7161_v34, %v5040_v36  ;;  %v1095_v55 = vsel %vm123_vm0, %v988_v53, 0.0 }
 0x2e8   :  { %v1088_v11 = vadd.f32 %v1087_v60, %v1086_v18  ;;  %v989_v60 = vmul.f32 %v5363_v6, %v5363_v6 }
 0x2e9   :  { %v990_v51 = vmul.f32 %v5370_v0, %v5370_v0 }
 0x2ea   :  { %v1090_v21 = vadd.f32 %v1089_v22, %v1088_v11  ;;  %v7162_v22 = vld [vmem:[#allocation27_spill] sm:$0xff]  ;;  %v1097_v30 = vsel %vm123_vm0, %v989_v60, 0.0  ;;  %v1101_v60 = vsel %vm123_vm0, %v991_v49, 0.0 }
 0x2eb   :  { %v5384_v34 = vsub.f32 %v7162_v22, %v5040_v36  ;;  %v1099_v53 = vsel %vm123_vm0, %v990_v51, 0.0 }
 0x2ec   :  { %v1092_v18 = vadd.f32 %v1091_v16, %v1090_v21  ;;  %v7163_v16 = vld [vmem:[#allocation28_spill] sm:$0xff] }
 0x2ed   :  { %v5391_v12 = vsub.f32 %v7163_v16, %v5040_v36  ;;  %v992_v47 = vmul.f32 %v5384_v34, %v5384_v34 }
 0x2ee   :  { %v1094_v11 = vadd.f32 %v1093_v25, %v1092_v18  ;;  %v7164_v25 = vld [vmem:[#allocation29_spill] sm:$0xff] }
 0x2ef   :  { %v5398_v22 = vsub.f32 %v7164_v25, %v5040_v36  ;;  %v993_v45 = vmul.f32 %v5391_v12, %v5391_v12  ;;  %v1103_v51 = vsel %vm123_vm0, %v992_v47, 0.0 }
 0x2f0   :  { %v1096_v21 = vadd.f32 %v1095_v55, %v1094_v11  ;;  %v7165_v55 = vld [vmem:[#allocation30_spill] sm:$0xff] }
 0x2f1   :  { %v5405_v16 = vsub.f32 %v7165_v55, %v5040_v36  ;;  %v994_v43 = vmul.f32 %v5398_v22, %v5398_v22  ;;  %v1105_v49 = vsel %vm123_vm0, %v993_v45, 0.0 }
 0x2f2   :  { %v1098_v18 = vadd.f32 %v1097_v30, %v1096_v21  ;;  %v7167_v30 = vld [vmem:[#allocation31_spill] sm:$0xff] }
 0x2f3   :  { %7166 = vst [vmem:[#allocation20_spill] sm:$0xff] %v5405_v16  ;;  %v5412_v25 = vsub.f32 %v7167_v30, %v5040_v36  ;;  %v995_v41 = vmul.f32 %v5405_v16, %v5405_v16  ;;  %v1107_v47 = vsel %vm123_vm0, %v994_v43, 0.0 }
 0x2f4   :  { %v1100_v11 = vadd.f32 %v1099_v53, %v1098_v18  ;;  %v7169_v53 = vld [vmem:[#allocation32_spill] sm:$0xff] }
 0x2f5   :  { %7168 = vst [vmem:[#allocation21_spill] sm:$0xff] %v5412_v25  ;;  %v5419_v55 = vsub.f32 %v7169_v53, %v5040_v36  ;;  %v996_v39 = vmul.f32 %v5412_v25, %v5412_v25  ;;  %v1109_v45 = vsel %vm123_vm0, %v995_v41, 0.0 }
 0x2f6   :  { %v1102_v21 = vadd.f32 %v1101_v60, %v1100_v11  ;;  %v7171_v60 = vld [vmem:[#allocation33_spill] sm:$0xff] }
 0x2f7   :  { %7170 = vst [vmem:[#allocation22_spill] sm:$0xff] %v5419_v55  ;;  %v5426_v30 = vsub.f32 %v7171_v60, %v5040_v36  ;;  %v997_v37 = vmul.f32 %v5419_v55, %v5419_v55  ;;  %v1111_v43 = vsel %vm123_vm0, %v996_v39, 0.0  ;;  %v1002_v39 = vmul.f32 %v5046_v52, %v5046_v52 }
 0x2f8   :  { %v1104_v18 = vadd.f32 %v1103_v51, %v1102_v21  ;;  %v7173_v51 = vld [vmem:[#allocation34_spill] sm:$0xff] }
 0x2f9   :  { %7172 = vst [vmem:[#allocation23_spill] sm:$0xff] %v5426_v30  ;;  %v5433_v53 = vsub.f32 %v7173_v51, %v5040_v36  ;;  %v998_v25 = vmul.f32 %v5426_v30, %v5426_v30  ;;  %v1113_v51 = vsel %vm123_vm0, %v997_v37, 0.0  ;;  %v7176_v37 = vld [vmem:[#allocation36_spill] sm:$0xff] }
 0x2fa   :  { %v1106_v11 = vadd.f32 %v1105_v49, %v1104_v18  ;;  %v7174_v49 = vld [vmem:[#allocation35_spill] sm:$0xff] }
 0x2fb   :  { %v5440_v60 = vsub.f32 %v7174_v49, %v5040_v36  ;;  %v1001_v49 = vmul.f32 %v5043_v42, %v5043_v42 }
 0x2fc   :  { %v1108_v21 = vadd.f32 %v1107_v47, %v1106_v11  ;;  %v999_v47 = vmul.f32 %v5433_v53, %v5433_v53 }
 0x2fd   :  { %7175 = vst [vmem:[#allocation24_spill] sm:$0xff] %v5440_v60  ;;  %v1000_v41 = vmul.f32 %v5440_v60, %v5440_v60 }
 0x2fe   :  { %v1110_v18 = vadd.f32 %v1109_v45, %v1108_v21  ;;  %v1115_v21 = vsel %vm123_vm0, %v998_v25, 0.0  ;;  %v1117_v30 = vsel %vm123_vm0, %v999_v47, 0.0  ;;  %v1003_v25 = vmul.f32 %v5049_v54, %v5049_v54 }
 0x300   :  { %v1112_v11 = vadd.f32 %v1111_v43, %v1110_v18  ;;  %v1119_v18 = vsel %vm123_vm0, %v1000_v41, 0.0  ;;  %v1123_v41 = vsel %vm123_vm0, %v1002_v39, 0.0  ;;  %v1125_v54 = vsel %vm123_vm0, %v1003_v25, 0.0 }
 0x302   :  { %v1114_v16 = vadd.f32 %v1113_v51, %v1112_v11  ;;  %v5459_v11 = vsub.f32 %v7176_v37, %v5040_v36 }
 0x304   :  { %v1116_v45 = vadd.f32 %v1115_v21, %v1114_v16  ;;  %7177 = vst [vmem:[#allocation25_spill] sm:$0xff] %v5459_v11  ;;  %v1121_v16 = vsel %vm123_vm0, %v1001_v49, 0.0  ;;  %v7178_v21 = vld [vmem:[#allocation37_spill] sm:$0xff]  ;;  %v1005_v37 = vmul.f32 %v5459_v11, %v5459_v11 }
 0x305   :  { %v5466_v47 = vsub.f32 %v7178_v21, %v5040_v36 }
 0x306   :  { %v1118_v55 = vadd.f32 %v1117_v30, %v1116_v45  ;;  %v1004_v30 = vmul.f32 %v5052_v56, %v5052_v56  ;;  %v7180_v45 = vld [vmem:[#allocation38_spill] sm:$0xff]  ;;  %v1129_v56 = vsel %vm123_vm0, %v1005_v37, 0.0 }
 0x307   :  { %7179 = vst [vmem:[#allocation26_spill] sm:$0xff] %v5466_v47 }
 0x308   :  { %v1120_v43 = vadd.f32 %v1119_v18, %v1118_v55  ;;  %v943_v18 = vsub.f32 %v7180_v45, %v5040_v36 }
 0x30a   :  { %v1122_v51 = vadd.f32 %v1121_v16, %v1120_v43  ;;  %v1006_v43 = vmul.f32 %v5466_v47, %v5466_v47  ;;  %v1127_v16 = vsel %vm123_vm0, %v1004_v30, 0.0  ;;  %v1007_v52 = vmul.f32 %v943_v18, %v943_v18 }
 0x30c   :  { %v1124_v55 = vadd.f32 %v1123_v41, %v1122_v51  ;;  %v1131_v51 = vsel %vm123_vm0, %v1006_v43, 0.0  ;;  %v1133_v36 = vsel %vm123_vm0, %v1007_v52, 0.0 }
 0x30e   :  { %v1126_v49 = vadd.f32 %v1125_v54, %v1124_v55 }
 0x310   :  { %v1128_v21 = vadd.f32 %v1127_v16, %v1126_v49  ;;  %v1548_v49 = vld [vmem:[#allocation9 + $0x38] sm:$0xff] }
 0x311   :  { %4229 = vmatpush.msrb.mxu3 %v1548_v49  ;;  %1609 = vmatpush.msra.mxu1 %v1548_v49 }
 0x312   :  { %v1130_v39 = vadd.f32 %v1129_v56, %v1128_v21  ;;  %v332_v21 = vld [vmem:[#allocation8] sm:$0xf] }
 0x314   :  { %v1132_v41 = vadd.f32 %v1131_v51, %v1130_v39 }
 0x316   :  { %v1134_v45 = vadd.f32 %v1133_v36, %v1132_v41 }
 0x318   :  { %v1135_v11 = vrot.slane %v1134_v45, 4 }
 0x31a   :  { %v1136_v42 = vadd.f32 %v1135_v11, %v1134_v45  ;;  %v5483_v11 = vperm.slane %v332_v21, 0 }
 0x31c   :  { %v1137_v25 = vrot.slane %v1136_v42, 2 }
 0x31e   :  { %v1138_v54 = vadd.f32 %v1137_v25, %v1136_v42 }
 0x320   :  { %v1139_v55 = vrot.slane %v1138_v54, 1 }
 0x322   :  { %v1140_v60 = vadd.f32 %v1139_v55, %v1138_v54 }
 0x324   :  { %v1141_v47 = vmul.f32 %v1140_v60, %v5037_v3  ;;  %v5487_v3 = vperm.slane %v332_v21, 1  ;;  %v7188_v21 = vld [vmem:[#allocation24_spill] sm:$0xff] }
 0x326   :  { %v1142_v30 = vadd.f32 1e-05, %v1141_v47  ;;  %7182 = vst [vmem:[#allocation28_spill] sm:$0xff] %v5487_v3  ;;  %v1547_v47 = vld [vmem:[#allocation9 + $0x30] sm:$0xff] }
 0x327   :  { %4230 = vmatpush.msrb.mxu3 %v1547_v47  ;;  %1610 = vmatpush.msra.mxu1 %v1547_v47  ;;  %v7191_v47 = vld [vmem:[#allocation41_spill] sm:$0xff] }
 0x328   :  { %4251 = vrsqrt.f32 %v1142_v30  ;;  %vm1149_vm4 = vweird.f32 %v1142_v30 }
 0x32e   :  { %v4252_v56 = vpop.eup %4251 }
 0x32f   :  { %v1144_v37 = vmul.f32 %v4252_v56, %v1142_v30  ;;  %vm1150_vm3 = vweird.f32 %v4252_v56 }
 0x330   :  { %vm1151_vm5 = vmor %vm1149_vm4, %vm1150_vm3 }
 0x331   :  { %v1145_v43 = vmul.f32 %v4252_v56, %v1144_v37  ;;  %v7185_v37 = vld [vmem:[#allocation21_spill] sm:$0xff] }
 0x333   :  { %v1146_v16 = vmul.f32 0.5, %v1145_v43  ;;  %v7186_v43 = vld [vmem:[#allocation22_spill] sm:$0xff] }
 0x335   :  { %v1147_v52 = vsub.f32 1.5, %v1146_v16  ;;  %v7187_v16 = vld [vmem:[#allocation23_spill] sm:$0xff] }
 0x337   :  { %v1148_v39 = vmul.f32 %v4252_v56, %v1147_v52  ;;  %v7189_v52 = vld [vmem:[#allocation39_spill] sm:$0xff] }
 0x339   :  { %v5485_v42 = vsel %vm1151_vm5, %v4252_v56, %v1148_v39  ;;  %v7184_v56 = vld [vmem:[#allocation20_spill] sm:$0xff] }
 0x33a   :  { %7181 = vst [vmem:[#allocation27_spill] sm:$0xff] %v5485_v42  ;;  %v1216_v60 = vmul.f32 %v5485_v42, %v943_v18  ;;  %v1153_v45 = vmul.f32 %v5485_v42, %v5056_v46  ;;  %v1154_v25 = vmul.f32 %v5485_v42, %v5060_v48  ;;  %v5499_v54 = vmul.f32 %v5485_v42, %v5064_v10  ;;  %v7190_v39 = vld [vmem:[#allocation40_spill] sm:$0xff] }
 0x33b   :  { %v5503_v18 = vmul.f32 %v5485_v42, %v5068_v58  ;;  %v5507_v55 = vmul.f32 %v5485_v42, %v5076_v19  ;;  %v5511_v30 = vmul.f32 %v5485_v42, %v5082_v23  ;;  %v5515_v46 = vmul.f32 %v5485_v42, %v5090_v20 }
 0x33c   :  { %v1281_v51 = vmul.f32 %v5483_v11, %v1216_v60  ;;  %v5519_v48 = vmul.f32 %v5485_v42, %v5097_v29  ;;  %v5523_v10 = vmul.f32 %v5485_v42, %v5104_v31  ;;  %v5527_v58 = vmul.f32 %v5485_v42, %v5111_v33 }
 0x33d   :  { %v5531_v19 = vmul.f32 %v5485_v42, %v5118_v35  ;;  %v1174_v23 = vmul.f32 %v5485_v42, %v5195_v57  ;;  %v1175_v20 = vmul.f32 %v5485_v42, %v5202_v59  ;;  %v1176_v29 = vmul.f32 %v5485_v42, %v5209_v61 }
 0x33e   :  { %v1346_v41 = vadd.f32 %v5487_v3, %v1281_v51  ;;  %v1177_v31 = vmul.f32 %v5485_v42, %v5216_v63  ;;  %v1178_v33 = vmul.f32 %v5485_v42, %v5223_v1  ;;  %v1179_v49 = vmul.f32 %v5485_v42, %v5230_v4 }
 0x33f   :  { %7183 = vst [vmem:[#allocation29_spill] sm:$0xff] %v5531_v19  ;;  %v1180_v35 = vmul.f32 %v5485_v42, %v5237_v5  ;;  %v1181_v57 = vmul.f32 %v5485_v42, %v5244_v7  ;;  %v1182_v59 = vmul.f32 %v5485_v42, %v5251_v9  ;;  %v1183_v61 = vmul.f32 %v5485_v42, %v5258_v27 }
 0x340   :  { %v1410_v36 = vmax.f32 %v1346_v41, 0.0  ;;  %v1184_v63 = vmul.f32 %v5485_v42, %v5265_v13  ;;  %v1185_v1 = vmul.f32 %v5485_v42, %v5272_v15  ;;  %v1186_v4 = vmul.f32 %v5485_v42, %v5279_v17  ;;  %v7192_v41 = vld [vmem:[#allocation42_spill] sm:$0xff] }
 0x341   :  { %v1187_v5 = vmul.f32 %v5485_v42, %v5286_v8  ;;  %v1188_v7 = vmul.f32 %v5485_v42, %v5293_v24  ;;  %v1189_v9 = vmul.f32 %v5485_v42, %v5300_v28  ;;  %v1190_v27 = vmul.f32 %v5485_v42, %v5307_v32 }
 0x342   :  { %1475 = vst.msk [vmem:[#allocation2 + $0x450] sm:$0xff] %vm123_vm0, %v1410_v36  ;;  %v1191_v13 = vmul.f32 %v5485_v42, %v5314_v26  ;;  %v1192_v15 = vmul.f32 %v5485_v42, %v5321_v40  ;;  %v1193_v17 = vmul.f32 %v5485_v42, %v5328_v44  ;;  %v1194_v8 = vmul.f32 %v5485_v42, %v5335_v50 }
 0x343   :  { %v1195_v24 = vmul.f32 %v5485_v42, %v5342_v38  ;;  %v1196_v28 = vmul.f32 %v5485_v42, %v5349_v62  ;;  %v1197_v32 = vmul.f32 %v5485_v42, %v5356_v2  ;;  %v1198_v26 = vmul.f32 %v5485_v42, %v5363_v6 }
 0x344   :  { %v1199_v40 = vmul.f32 %v5485_v42, %v5370_v0  ;;  %v1200_v44 = vmul.f32 %v5485_v42, %v5377_v14  ;;  %v1201_v50 = vmul.f32 %v5485_v42, %v5384_v34  ;;  %v1202_v38 = vmul.f32 %v5485_v42, %v5391_v12 }
 0x345   :  { %v1203_v62 = vmul.f32 %v5485_v42, %v5398_v22  ;;  %v1204_v2 = vmul.f32 %v5485_v42, %v7184_v56  ;;  %v1205_v6 = vmul.f32 %v5485_v42, %v7185_v37  ;;  %v1206_v0 = vmul.f32 %v5485_v42, %v7186_v43  ;;  %v7193_v56 = vld [vmem:[#allocation25_spill] sm:$0xff]  ;;  %v7194_v43 = vld [vmem:[#allocation26_spill] sm:$0xff] }
 0x346   :  { %v1207_v14 = vmul.f32 %v5485_v42, %v7187_v16  ;;  %v1208_v34 = vmul.f32 %v5485_v42, %v5433_v53  ;;  %v1209_v12 = vmul.f32 %v5485_v42, %v7188_v21  ;;  %v1210_v22 = vmul.f32 %v5485_v42, %v7189_v52 }
 0x347   :  { %v1211_v60 = vmul.f32 %v5485_v42, %v7190_v39  ;;  %v1212_v51 = vmul.f32 %v5485_v42, %v7191_v47  ;;  %v1213_v36 = vmul.f32 %v5485_v42, %v7192_v41  ;;  %v1214_v37 = vmul.f32 %v5485_v42, %v7193_v56 }
 0x348   :  { %v1215_v53 = vmul.f32 %v5485_v42, %v7194_v43  ;;  %v1218_v16 = vmul.f32 %v5483_v11, %v1153_v45  ;;  %v1219_v21 = vmul.f32 %v5483_v11, %v1154_v25  ;;  %v1239_v52 = vmul.f32 %v5483_v11, %v1174_v23 }
 0x349   :  { %v1240_v39 = vmul.f32 %v5483_v11, %v1175_v20  ;;  %v1241_v3 = vmul.f32 %v5483_v11, %v1176_v29  ;;  %v1242_v47 = vmul.f32 %v5483_v11, %v1177_v31  ;;  %v1243_v41 = vmul.f32 %v5483_v11, %v1178_v33 }
 0x34a   :  { %v1244_v19 = vmul.f32 %v5483_v11, %v1179_v49  ;;  %v1245_v56 = vmul.f32 %v5483_v11, %v1180_v35  ;;  %v1246_v43 = vmul.f32 %v5483_v11, %v1181_v57  ;;  %v1247_v45 = vmul.f32 %v5483_v11, %v1182_v59 }
 0x34b   :  { %v1248_v25 = vmul.f32 %v5483_v11, %v1183_v61  ;;  %v1249_v23 = vmul.f32 %v5483_v11, %v1184_v63  ;;  %v1250_v20 = vmul.f32 %v5483_v11, %v1185_v1  ;;  %v1251_v29 = vmul.f32 %v5483_v11, %v1186_v4 }
 0x34c   :  { %v1252_v31 = vmul.f32 %v5483_v11, %v1187_v5  ;;  %v1253_v33 = vmul.f32 %v5483_v11, %v1188_v7  ;;  %v1254_v49 = vmul.f32 %v5483_v11, %v1189_v9  ;;  %v1255_v35 = vmul.f32 %v5483_v11, %v1190_v27 }
 0x34d   :  { %v1256_v57 = vmul.f32 %v5483_v11, %v1191_v13  ;;  %v1257_v59 = vmul.f32 %v5483_v11, %v1192_v15  ;;  %v1258_v61 = vmul.f32 %v5483_v11, %v1193_v17  ;;  %v1259_v63 = vmul.f32 %v5483_v11, %v1194_v8 }
 0x34e   :  { %v1260_v1 = vmul.f32 %v5483_v11, %v1195_v24  ;;  %v1261_v4 = vmul.f32 %v5483_v11, %v1196_v28  ;;  %v1262_v5 = vmul.f32 %v5483_v11, %v1197_v32  ;;  %v1263_v7 = vmul.f32 %v5483_v11, %v1198_v26 }
 0x34f   :  { %v1264_v9 = vmul.f32 %v5483_v11, %v1199_v40  ;;  %v1265_v27 = vmul.f32 %v5483_v11, %v1200_v44  ;;  %v1266_v13 = vmul.f32 %v5483_v11, %v1201_v50  ;;  %v1267_v15 = vmul.f32 %v5483_v11, %v1202_v38 }
 0x350   :  { %v1268_v17 = vmul.f32 %v5483_v11, %v1203_v62  ;;  %v1269_v8 = vmul.f32 %v5483_v11, %v1204_v2  ;;  %v1270_v24 = vmul.f32 %v5483_v11, %v1205_v6  ;;  %v1271_v28 = vmul.f32 %v5483_v11, %v1206_v0 }
 0x351   :  { %v1272_v32 = vmul.f32 %v5483_v11, %v1207_v14  ;;  %v1273_v26 = vmul.f32 %v5483_v11, %v1208_v34  ;;  %v1274_v40 = vmul.f32 %v5483_v11, %v1209_v12  ;;  %v1275_v44 = vmul.f32 %v5483_v11, %v1210_v22 }
 0x352   :  { %v1276_v50 = vmul.f32 %v5483_v11, %v1211_v60  ;;  %v1277_v38 = vmul.f32 %v5483_v11, %v1212_v51  ;;  %v1278_v62 = vmul.f32 %v5483_v11, %v1213_v36  ;;  %v1220_v2 = vmul.f32 %v5483_v11, %v5499_v54  ;;  %v7195_v60 = vld [vmem:[#allocation43_spill] sm:$0xff]  ;;  %v7196_v54 = vld [vmem:[#allocation44_spill] sm:$0xff] }
 0x353   :  { %v1221_v6 = vmul.f32 %v5483_v11, %v5503_v18  ;;  %v1279_v0 = vmul.f32 %v5483_v11, %v1214_v37  ;;  %v1280_v14 = vmul.f32 %v5483_v11, %v1215_v53  ;;  %v1222_v34 = vmul.f32 %v5483_v11, %v5507_v55  ;;  %v7198_v18 = vld [vmem:[#allocation45_spill] sm:$0xff]  ;;  %v7200_v53 = vld [vmem:[#allocation46_spill] sm:$0xff] }
 0x354   :  { %v1223_v12 = vmul.f32 %v5483_v11, %v5511_v30  ;;  %v1224_v22 = vmul.f32 %v5483_v11, %v5515_v46  ;;  %v1164_v51 = vmul.f32 %v5485_v42, %v7195_v60  ;;  %v5675_v36 = vmul.f32 %v5485_v42, %v7196_v54  ;;  %v7201_v54 = vld [vmem:[#allocation29_spill] sm:$0xff] }
 0x355   :  { %v5679_v37 = vmul.f32 %v5485_v42, %v7198_v18  ;;  %v5683_v55 = vmul.f32 %v5485_v42, %v7200_v53  ;;  %v1225_v30 = vmul.f32 %v5483_v11, %v5519_v48  ;;  %v1226_v46 = vmul.f32 %v5483_v11, %v5523_v10  ;;  %v7202_v18 = vld [vmem:[#allocation28_spill] sm:$0xff] }
 0x356   :  { %7197 = vst [vmem:[#allocation30_spill] sm:$0xff] %v5675_v36  ;;  %v5691_v60 = vmul.f32 %v5483_v11, %v5527_v58  ;;  %v5695_v36 = vmul.f32 %v5483_v11, %v7201_v54  ;;  %v5699_v42 = vadd.f32 %v7202_v18, %v1219_v21  ;;  %v5702_v53 = vadd.f32 %v7202_v18, %v1220_v2 }
 0x357   :  { %7199 = vst [vmem:[#allocation31_spill] sm:$0xff] %v5679_v37  ;;  %v1283_v37 = vadd.f32 %v7202_v18, %v1218_v16  ;;  %v5705_v48 = vadd.f32 %v7202_v18, %v1221_v6  ;;  %v5708_v10 = vadd.f32 %v7202_v18, %v1222_v34  ;;  %v5711_v58 = vadd.f32 %v7202_v18, %v1223_v12 }
 0x358   :  { %v5714_v54 = vadd.f32 %v7202_v18, %v1224_v22  ;;  %v5717_v16 = vadd.f32 %v7202_v18, %v1239_v52  ;;  %v5720_v21 = vadd.f32 %v7202_v18, %v1240_v39  ;;  %v5723_v2 = vadd.f32 %v7202_v18, %v1241_v3 }
 0x359   :  { %v5726_v6 = vadd.f32 %v7202_v18, %v1242_v47  ;;  %v5729_v34 = vadd.f32 %v7202_v18, %v1243_v41  ;;  %v5732_v12 = vadd.f32 %v7202_v18, %v1244_v19  ;;  %v5735_v22 = vadd.f32 %v7202_v18, %v1245_v56 }
 0x35a   :  { %v5738_v52 = vadd.f32 %v7202_v18, %v1246_v43  ;;  %v5741_v39 = vadd.f32 %v7202_v18, %v1247_v45  ;;  %v5744_v3 = vadd.f32 %v7202_v18, %v1248_v25  ;;  %v5747_v47 = vadd.f32 %v7202_v18, %v1249_v23 }
 0x35b   :  { %v5750_v41 = vadd.f32 %v7202_v18, %v1250_v20  ;;  %v5753_v19 = vadd.f32 %v7202_v18, %v1251_v29  ;;  %v5756_v56 = vadd.f32 %v7202_v18, %v1252_v31  ;;  %v5759_v43 = vadd.f32 %v7202_v18, %v1253_v33 }
 0x35c   :  { %v5762_v45 = vadd.f32 %v7202_v18, %v1254_v49  ;;  %v5765_v25 = vadd.f32 %v7202_v18, %v1255_v35  ;;  %v5768_v23 = vadd.f32 %v7202_v18, %v1256_v57  ;;  %v5771_v20 = vadd.f32 %v7202_v18, %v1257_v59 }
 0x35d   :  { %v5774_v29 = vadd.f32 %v7202_v18, %v1258_v61  ;;  %v5777_v31 = vadd.f32 %v7202_v18, %v1259_v63  ;;  %v5780_v33 = vadd.f32 %v7202_v18, %v1260_v1  ;;  %v5783_v49 = vadd.f32 %v7202_v18, %v1261_v4 }
 0x35e   :  { %v5786_v35 = vadd.f32 %v7202_v18, %v1262_v5  ;;  %v5789_v57 = vadd.f32 %v7202_v18, %v1263_v7  ;;  %v5792_v59 = vadd.f32 %v7202_v18, %v1264_v9  ;;  %v5795_v61 = vadd.f32 %v7202_v18, %v1265_v27 }
 0x35f   :  { %v5798_v63 = vadd.f32 %v7202_v18, %v1266_v13  ;;  %v5801_v1 = vadd.f32 %v7202_v18, %v1267_v15  ;;  %v5804_v4 = vadd.f32 %v7202_v18, %v1268_v17  ;;  %v5807_v5 = vadd.f32 %v7202_v18, %v1269_v8 }
 0x360   :  { %v5810_v7 = vadd.f32 %v7202_v18, %v1270_v24  ;;  %v5813_v9 = vadd.f32 %v7202_v18, %v1271_v28  ;;  %v5816_v27 = vadd.f32 %v7202_v18, %v1272_v32  ;;  %v5819_v13 = vadd.f32 %v7202_v18, %v1273_v26 }
 0x361   :  { %v5822_v15 = vadd.f32 %v7202_v18, %v1274_v40  ;;  %v5825_v17 = vadd.f32 %v7202_v18, %v1275_v44  ;;  %v5828_v8 = vadd.f32 %v7202_v18, %v1276_v50  ;;  %v5831_v24 = vadd.f32 %v7202_v18, %v1277_v38  ;;  %v7212_v50 = vld [vmem:[#allocation27_spill] sm:$0xff] }
 0x362   :  { %7203 = vst [vmem:[#allocation32_spill] sm:$0xff] %v5819_v13  ;;  %v5834_v28 = vadd.f32 %v7202_v18, %v1278_v62  ;;  %v5837_v32 = vadd.f32 %v7202_v18, %v1279_v0  ;;  %v5840_v26 = vadd.f32 %v7202_v18, %v1280_v14  ;;  %v1347_v40 = vmax.f32 %v1283_v37, 0.0 }
 0x363   :  { %7204 = vst [vmem:[#allocation33_spill] sm:$0xff] %v5822_v15  ;;  %v1348_v15 = vmax.f32 %v5699_v42, 0.0  ;;  %v1349_v44 = vmax.f32 %v5702_v53, 0.0  ;;  %v1229_v38 = vmul.f32 %v5483_v11, %v1164_v51  ;;  %v1350_v62 = vmax.f32 %v5705_v48, 0.0  ;;  %v7215_v53 = vld [vmem:[#allocation49_spill] sm:$0xff]  ;;  %v7216_v51 = vld [vmem:[#allocation31_spill] sm:$0xff] }
 0x364   :  { %7205 = vst [vmem:[#allocation34_spill] sm:$0xff] %v5825_v17  ;;  %v7211_v17 = vld [vmem:[#allocation47_spill] sm:$0xff]  ;;  %v1291_v37 = vadd.f32 %v7202_v18, %v1226_v46  ;;  %v1351_v42 = vmax.f32 %v5708_v10, 0.0  ;;  %v1292_v48 = vadd.f32 %v7202_v18, %v5691_v60  ;;  %v1232_v10 = vmul.f32 %v5483_v11, %v5683_v55 }
 0x365   :  { %7206 = vst [vmem:[#allocation35_spill] sm:$0xff] %v5828_v8  ;;  %v1168_v8 = vmul.f32 %v7212_v50, %v7211_v17  ;;  %v1170_v17 = vmul.f32 %v7212_v50, %v7215_v53  ;;  %v1353_v53 = vmax.f32 %v5714_v54, 0.0 }
 0x366   :  { %7207 = vst [vmem:[#allocation36_spill] sm:$0xff] %v5831_v24  ;;  %v1290_v24 = vadd.f32 %v7202_v18, %v1225_v30  ;;  %v1231_v30 = vmul.f32 %v5483_v11, %v7216_v51  ;;  %v7218_v51 = vld [vmem:[#allocation51_spill] sm:$0xff]  ;;  %v1355_v54 = vmax.f32 %v1291_v37, 0.0 }
 0x367   :  { %7208 = vst [vmem:[#allocation37_spill] sm:$0xff] %v5834_v28  ;;  %v7213_v28 = vld [vmem:[#allocation48_spill] sm:$0xff]  ;;  %v1172_v60 = vmul.f32 %v7212_v50, %v7218_v51 }
 0x368   :  { %7209 = vst [vmem:[#allocation38_spill] sm:$0xff] %v5837_v32  ;;  %v1169_v0 = vmul.f32 %v7212_v50, %v7213_v28  ;;  %v7214_v32 = vld [vmem:[#allocation30_spill] sm:$0xff]  ;;  %v1352_v28 = vmax.f32 %v5711_v58, 0.0  ;;  %v1233_v58 = vmul.f32 %v5483_v11, %v1168_v8  ;;  %v1296_v51 = vadd.f32 %v7202_v18, %v1231_v30 }
 0x369   :  { %7210 = vst [vmem:[#allocation20_spill] sm:$0xff] %v5840_v26  ;;  %v1230_v14 = vmul.f32 %v5483_v11, %v7214_v32  ;;  %v7217_v32 = vld [vmem:[#allocation50_spill] sm:$0xff]  ;;  %v1354_v26 = vmax.f32 %v1290_v24, 0.0  ;;  %v1356_v8 = vmax.f32 %v1292_v48, 0.0 }
 0x36a   :  { %1412 = vst.msk [vmem:[#allocation2 + $0x28] sm:$0xff] %vm123_vm0, %v1347_v40  ;;  %v1171_v46 = vmul.f32 %v7212_v50, %v7217_v32  ;;  %v1293_v40 = vadd.f32 %v7202_v18, %v5695_v36  ;;  %v7219_v32 = vld [vmem:[#allocation52_spill] sm:$0xff]  ;;  %v1234_v13 = vmul.f32 %v5483_v11, %v1169_v0  ;;  %v1298_v0 = vadd.f32 %v7202_v18, %v1233_v58 }
 0x36b   :  { %1413 = vst.msk [vmem:[#allocation2 + $0x30] sm:$0xff] %vm123_vm0, %v1348_v15  ;;  %v1294_v15 = vadd.f32 %v7202_v18, %v1229_v38  ;;  %v1173_v55 = vmul.f32 %v7212_v50, %v7219_v32  ;;  %v1295_v36 = vadd.f32 %v7202_v18, %v1230_v14  ;;  %v1297_v38 = vadd.f32 %v7202_v18, %v1232_v10 }
 0x36c   :  { %1414 = vst.msk [vmem:[#allocation2 + $0x48] sm:$0xff] %vm123_vm0, %v1349_v44  ;;  %v1235_v44 = vmul.f32 %v5483_v11, %v1170_v17  ;;  %v1236_v24 = vmul.f32 %v5483_v11, %v1171_v46  ;;  %v1237_v50 = vmul.f32 %v5483_v11, %v1172_v60  ;;  %v1360_v48 = vmax.f32 %v1296_v51, 0.0  ;;  %v1509_v51 = vld [vmem:[#allocation9 + $0x8] sm:$0xff] }
 0x36d   :  { %1415 = vst.msk [vmem:[#allocation2 + $0x50] sm:$0xff] %vm123_vm0, %v1350_v62  ;;  %v1357_v62 = vmax.f32 %v1293_v40, 0.0  ;;  %v1358_v14 = vmax.f32 %v1294_v15, 0.0  ;;  %v1238_v37 = vmul.f32 %v5483_v11, %v1173_v55  ;;  %v1359_v17 = vmax.f32 %v1295_v36, 0.0 }
 0x36e   :  { %1416 = vst.msk [vmem:[#allocation2 + $0x68] sm:$0xff] %vm123_vm0, %v1351_v42  ;;  %v1299_v42 = vadd.f32 %v7202_v18, %v1234_v13  ;;  %v1300_v30 = vadd.f32 %v7202_v18, %v1235_v44  ;;  %v1361_v46 = vmax.f32 %v1297_v38, 0.0  ;;  %v1302_v10 = vadd.f32 %v7202_v18, %v1237_v50  ;;  %v1477_v38 = vld [vmem:[#allocation2 + $0x7] ss:$2 sm:$0xff] }
 0x36f   :  { %1417 = vst.msk [vmem:[#allocation2 + $0x70] sm:$0xff] %vm123_vm0, %v1352_v28  ;;  %v1301_v28 = vadd.f32 %v7202_v18, %v1236_v24  ;;  %v1303_v11 = vadd.f32 %v7202_v18, %v1238_v37  ;;  %v1368_v15 = vmax.f32 %v5717_v16, 0.0  ;;  %v1369_v18 = vmax.f32 %v5720_v21, 0.0 }
 0x370   :  { %1418 = vst.msk [vmem:[#allocation2 + $0x88] sm:$0xff] %vm123_vm0, %v1353_v53  ;;  %v1363_v13 = vmax.f32 %v1299_v42, 0.0  ;;  %v1364_v40 = vmax.f32 %v1300_v30, 0.0  ;;  %v1366_v60 = vmax.f32 %v1302_v10, 0.0  ;;  %v1370_v32 = vmax.f32 %v5723_v2, 0.0  ;;  %v7220_v42 = vld [vmem:[#allocation32_spill] sm:$0xff] }
 0x371   :  { %1419 = vst.msk [vmem:[#allocation2 + $0x90] sm:$0xff] %vm123_vm0, %v1354_v26  ;;  %v1362_v26 = vmax.f32 %v1298_v0, 0.0  ;;  %v1365_v53 = vmax.f32 %v1301_v28, 0.0  ;;  %v1367_v58 = vmax.f32 %v1303_v11, 0.0  ;;  %v1371_v55 = vmax.f32 %v5726_v6, 0.0  ;;  %v1510_v6 = vld [vmem:[#allocation9 + $0x10] sm:$0xff] }
 0x372   :  { %1420 = vst.msk [vmem:[#allocation2 + $0xa8] sm:$0xff] %vm123_vm0, %v1355_v54  ;;  %v1372_v36 = vmax.f32 %v5729_v34, 0.0  ;;  %v1373_v16 = vmax.f32 %v5732_v12, 0.0  ;;  %v1511_v54 = vld [vmem:[#allocation9 + $0x18] sm:$0xff]  ;;  %v1374_v21 = vmax.f32 %v5735_v22, 0.0  ;;  %v1375_v2 = vmax.f32 %v5738_v52, 0.0 }
 0x373   :  { %1421 = vst.msk [vmem:[#allocation2 + $0xb0] sm:$0xff] %vm123_vm0, %v1356_v8  ;;  %1722 = vmatpush.msra.mxu2 %v1511_v54  ;;  %v1376_v44 = vmax.f32 %v5741_v39, 0.0  ;;  %v1377_v34 = vmax.f32 %v5744_v3, 0.0  ;;  %v1546_v12 = vld [vmem:[#allocation9 + $0x28] sm:$0xff]  ;;  %v1378_v22 = vmax.f32 %v5747_v47, 0.0  ;;  %v1379_v52 = vmax.f32 %v5750_v41, 0.0 }
 0x374   :  { %1422 = vst.msk [vmem:[#allocation2 + $0xc8] sm:$0xff] %vm123_vm0, %v1357_v62  ;;  %4231 = vmatpush.msrb.mxu3 %v1546_v12  ;;  %1611 = vmatpush.msra.mxu1 %v1546_v12  ;;  %v1545_v39 = vld [vmem:[#allocation9 + $0x20] sm:$0xff]  ;;  %v1380_v24 = vmax.f32 %v5753_v19, 0.0  ;;  %v1381_v47 = vmax.f32 %v5756_v56, 0.0  ;;  %v1382_v41 = vmax.f32 %v5759_v43, 0.0  ;;  %v1383_v19 = vmax.f32 %v5762_v45, 0.0 }
 0x375   :  { %1423 = vst.msk [vmem:[#allocation2 + $0xd0] sm:$0xff] %vm123_vm0, %v1358_v14  ;;  %1723 = vmatpush.msra.mxu2 %v1510_v6  ;;  %v1508_v8 = vld [vmem:[#allocation9] sm:$0xff]  ;;  %v1384_v62 = vmax.f32 %v5765_v25, 0.0  ;;  %v1385_v56 = vmax.f32 %v5768_v23, 0.0  ;;  %v1386_v43 = vmax.f32 %v5771_v20, 0.0  ;;  %v1387_v0 = vmax.f32 %v5774_v29, 0.0 }
 0x376   :  { %1424 = vst.msk [vmem:[#allocation2 + $0xe8] sm:$0xff] %vm123_vm0, %v1359_v17  ;;  %1612 = vmatpush.msra.mxu1 %v1545_v39  ;;  %v1513_v3 = vld [vmem:[#allocation2 + $0x8] ss:$2 sm:$0xff]  ;;  %4232 = vmatpush.msrb.mxu3 %v1545_v39  ;;  %v1479_v45 = vld [vmem:[#allocation2 + $0x47] ss:$2 sm:$0xff]  ;;  %v1388_v25 = vmax.f32 %v5777_v31, 0.0 }
 0x377   :  { %1425 = vst.msk [vmem:[#allocation2 + $0xf0] sm:$0xff] %vm123_vm0, %v1360_v48  ;;  %1724 = vmatpush.msra.mxu2 %v1509_v51  ;;  %4051 = vmatmul.msk.f32.vlgmr.msra.gmra.mxu1 %vm123_vm0, %v1513_v3  ;;  %v1515_v50 = vld [vmem:[#allocation2 + $0x48] ss:$2 sm:$0xff]  ;;  %v1389_v23 = vmax.f32 %v5780_v33, 0.0  ;;  %v1390_v20 = vmax.f32 %v5783_v49, 0.0  ;;  %v1391_v29 = vmax.f32 %v5786_v35, 0.0 }
 0x378   :  { %1426 = vst.msk [vmem:[#allocation2 + $0x108] sm:$0xff] %vm123_vm0, %v1361_v46  ;;  %4233 = vmatpush.msra.mxu3 %v1511_v54  ;;  %v1392_v31 = vmax.f32 %v5789_v57, 0.0  ;;  %v1393_v33 = vmax.f32 %v5792_v59, 0.0  ;;  %v1394_v14 = vmax.f32 %v5795_v61, 0.0  ;;  %v1395_v49 = vmax.f32 %v5798_v63, 0.0  ;;  %v7222_v48 = vld [vmem:[#allocation34_spill] sm:$0xff] }
 0x379   :  { %1427 = vst.msk [vmem:[#allocation2 + $0x110] sm:$0xff] %vm123_vm0, %v1362_v26  ;;  %1725 = vmatpush.msra.mxu2 %v1508_v8  ;;  %v1396_v35 = vmax.f32 %v5801_v1, 0.0  ;;  %v1517_v37 = vld [vmem:[#allocation2 + $0x88] ss:$2 sm:$0xff]  ;;  %v1397_v57 = vmax.f32 %v5804_v4, 0.0  ;;  %v1398_v61 = vmax.f32 %v5807_v5, 0.0 }
 0x37a   :  { %1428 = vst.msk [vmem:[#allocation2 + $0x128] sm:$0xff] %vm123_vm0, %v1363_v13  ;;  %4067 = vmatmul.msk.f32.vlgmr.msra.gmra.mxu2 %vm123_vm0, %v1477_v38  ;;  %4234 = vmatpush.msra.mxu3 %v1510_v6  ;;  %v1481_v59 = vld [vmem:[#allocation2 + $0x87] ss:$2 sm:$0xff]  ;;  %v1399_v63 = vmax.f32 %v5810_v7, 0.0  ;;  %v1400_v1 = vmax.f32 %v5813_v9, 0.0  ;;  %v1401_v4 = vmax.f32 %v5816_v27, 0.0 }
 0x37b   :  { %1429 = vst.msk [vmem:[#allocation2 + $0x130] sm:$0xff] %vm123_vm0, %v1364_v40  ;;  %v1402_v17 = vmax.f32 %v7220_v42, 0.0  ;;  %v7221_v5 = vld [vmem:[#allocation33_spill] sm:$0xff]  ;;  %v1404_v7 = vmax.f32 %v7222_v48, 0.0  ;;  %v7223_v9 = vld [vmem:[#allocation35_spill] sm:$0xff]  ;;  %v7224_v26 = vld [vmem:[#allocation36_spill] sm:$0xff] }
 0x37c   :  { %1430 = vst.msk [vmem:[#allocation2 + $0x148] sm:$0xff] %vm123_vm0, %v1365_v53  ;;  %4235 = vmatpush.msra.mxu3 %v1509_v51  ;;  %v1403_v30 = vmax.f32 %v7221_v5, 0.0  ;;  %v1519_v28 = vld [vmem:[#allocation2 + $0xc8] ss:$2 sm:$0xff]  ;;  %v1405_v46 = vmax.f32 %v7223_v9, 0.0  ;;  %v1406_v11 = vmax.f32 %v7224_v26, 0.0 }
 0x37d   :  { %1431 = vst.msk [vmem:[#allocation2 + $0x150] sm:$0xff] %vm123_vm0, %v1366_v60  ;;  %v1483_v10 = vld [vmem:[#allocation2 + $0xc7] ss:$2 sm:$0xff]  ;;  %v1809_v6 = vld [vmem:[#allocation9 + $0x48] sm:$0xff] }
 0x37e   :  { %1432 = vst.msk [vmem:[#allocation2 + $0x168] sm:$0xff] %vm123_vm0, %v1367_v58  ;;  %4236 = vmatpush.msra.mxu3 %v1508_v8  ;;  %v1811_v13 = vld [vmem:[#allocation9 + $0x58] sm:$0xff]  ;;  %v7226_v60 = vld [vmem:[#allocation38_spill] sm:$0xff] }
 0x37f   :  { %1433 = vst.msk [vmem:[#allocation2 + $0x170] sm:$0xff] %vm123_vm0, %v1368_v15  ;;  %4052 = vmatmul.msk.f32.gmra.mxu1 %vm123_vm0, %v1515_v50  ;;  %v7225_v40 = vld [vmem:[#allocation37_spill] sm:$0xff]  ;;  %v1408_v58 = vmax.f32 %v7226_v60, 0.0  ;;  %v7227_v15 = vld [vmem:[#allocation20_spill] sm:$0xff]  ;;  %v1808_v51 = vld [vmem:[#allocation9 + $0x40] sm:$0xff] }
 0x380   :  { %1434 = vst.msk [vmem:[#allocation2 + $0x188] sm:$0xff] %vm123_vm0, %v1369_v18  ;;  %v1407_v53 = vmax.f32 %v7225_v40, 0.0  ;;  %v1409_v18 = vmax.f32 %v7227_v15, 0.0  ;;  %v2309_v8 = vld [vmem:[#allocation9 + $0xb8] sm:$0xff]  ;;  %v2142_v50 = vld [vmem:[#allocation9 + $0x90] sm:$0xff] }
 0x381   :  { %1435 = vst.msk [vmem:[#allocation2 + $0x190] sm:$0xff] %vm123_vm0, %v1370_v32  ;;  %v1521_v32 = vld [vmem:[#allocation2 + $0x108] ss:$2 sm:$0xff]  ;;  %v1493_v3 = vld [vmem:[#allocation2 + $0x247] ss:$2 sm:$0xff] }
 0x382   :  { %1436 = vst.msk [vmem:[#allocation2 + $0x1a8] sm:$0xff] %vm123_vm0, %v1371_v55  ;;  %4068 = vmatmul.msk.f32.gmra.mxu2 %vm123_vm0, %v1479_v45  ;;  %v2141_v45 = vld [vmem:[#allocation9 + $0x88] sm:$0xff]  ;;  %v1782_v42 = vld [vmem:[#allocation2 + $0xc9] ss:$2 sm:$0xff]  ;;  %v2114_v48 = vld [vmem:[#allocation2 + $0xe8] ss:$2 sm:$0xff] }
 0x383   :  { %1437 = vst.msk [vmem:[#allocation2 + $0x1b0] sm:$0xff] %vm123_vm0, %v1372_v36  ;;  %v1485_v36 = vld [vmem:[#allocation2 + $0x107] ss:$2 sm:$0xff] }
 0x384   :  { %1438 = vst.msk [vmem:[#allocation2 + $0x1c8] sm:$0xff] %vm123_vm0, %v1373_v16  ;;  %v1810_v16 = vld [vmem:[#allocation9 + $0x50] sm:$0xff] }
 0x385   :  { %1439 = vst.msk [vmem:[#allocation2 + $0x1d0] sm:$0xff] %vm123_vm0, %v1374_v21  ;;  %v1523_v54 = vld [vmem:[#allocation2 + $0x148] ss:$2 sm:$0xff]  ;;  %v1948_v5 = vld [vmem:[#allocation2 + $0xe7] ss:$2 sm:$0xff] }
 0x386   :  { %1440 = vst.msk [vmem:[#allocation2 + $0x1e8] sm:$0xff] %vm123_vm0, %v1375_v2  ;;  %v1487_v2 = vld [vmem:[#allocation2 + $0x147] ss:$2 sm:$0xff] }
 0x387   :  { %1441 = vst.msk [vmem:[#allocation2 + $0x1f0] sm:$0xff] %vm123_vm0, %v1376_v44  ;;  %4053 = vmatmul.msk.f32.gmra.mxu1 %vm123_vm0, %v1517_v37  ;;  %v1942_v37 = vld [vmem:[#allocation2 + $0x27] ss:$2 sm:$0xff] }
 0x388   :  { %1442 = vst.msk [vmem:[#allocation2 + $0x208] sm:$0xff] %vm123_vm0, %v1377_v34  ;;  %v1525_v44 = vld [vmem:[#allocation2 + $0x188] ss:$2 sm:$0xff]  ;;  %v1489_v12 = vld [vmem:[#allocation2 + $0x187] ss:$2 sm:$0xff] }
 0x389   :  { %1443 = vst.msk [vmem:[#allocation2 + $0x210] sm:$0xff] %vm123_vm0, %v1378_v22  ;;  %v1950_v9 = vld [vmem:[#allocation2 + $0x127] ss:$2 sm:$0xff] }
 0x38a   :  { %1444 = vst.msk [vmem:[#allocation2 + $0x268] sm:$0xff] %vm123_vm0, %v1379_v52  ;;  %4069 = vmatmul.msk.f32.gmra.mxu2 %vm123_vm0, %v1481_v59  ;;  %v2108_v59 = vld [vmem:[#allocation2 + $0x28] ss:$2 sm:$0xff]  ;;  %v1788_v40 = vld [vmem:[#allocation2 + $0x189] ss:$2 sm:$0xff] }
 0x38b   :  { %1445 = vst.msk [vmem:[#allocation2 + $0x270] sm:$0xff] %vm123_vm0, %v1380_v24  ;;  %v1529_v24 = vld [vmem:[#allocation2 + $0x248] ss:$2 sm:$0xff] }
 0x38c   :  { %1446 = vst.msk [vmem:[#allocation2 + $0x288] sm:$0xff] %vm123_vm0, %v1381_v47  ;;  %v1527_v22 = vld [vmem:[#allocation2 + $0x1c8] ss:$2 sm:$0xff]  ;;  %v1491_v39 = vld [vmem:[#allocation2 + $0x1c7] ss:$2 sm:$0xff] }
 0x38d   :  { %1447 = vst.msk [vmem:[#allocation2 + $0x290] sm:$0xff] %vm123_vm0, %v1382_v41 }
 0x38e   :  { %1448 = vst.msk [vmem:[#allocation2 + $0x2a8] sm:$0xff] %vm123_vm0, %v1383_v19 }
 0x38f   :  { %1449 = vst.msk [vmem:[#allocation2 + $0x2b0] sm:$0xff] %vm123_vm0, %v1384_v62  ;;  %4054 = vmatmul.msk.f32.gmra.mxu1 %vm123_vm0, %v1519_v28  ;;  %v1977_v62 = vld [vmem:[#allocation9 + $0x78] sm:$0xff] }
 0x390   :  { %1450 = vst.msk [vmem:[#allocation2 + $0x2c8] sm:$0xff] %vm123_vm0, %v1385_v56  ;;  %v2143_v56 = vld [vmem:[#allocation9 + $0x98] sm:$0xff]  ;;  %2038 = vmatpush.msrb.mxu1 %v1977_v62 }
 0x391   :  { %1451 = vst.msk [vmem:[#allocation2 + $0x2d0] sm:$0xff] %vm123_vm0, %v1386_v43  ;;  %v1976_v43 = vld [vmem:[#allocation9 + $0x70] sm:$0xff]  ;;  %2204 = vmatpush.msrb.mxu2 %v2143_v56 }
 0x392   :  { %1452 = vst.msk [vmem:[#allocation2 + $0x2e8] sm:$0xff] %vm123_vm0, %v1387_v0  ;;  %4070 = vmatmul.msk.f32.gmra.mxu2 %vm123_vm0, %v1483_v10  ;;  %v1975_v0 = vld [vmem:[#allocation9 + $0x68] sm:$0xff]  ;;  %2039 = vmatpush.msrb.mxu1 %v1976_v43 }
 0x393   :  { %1453 = vst.msk [vmem:[#allocation2 + $0x2f0] sm:$0xff] %vm123_vm0, %v1388_v25  ;;  %2205 = vmatpush.msrb.mxu2 %v2142_v50  ;;  %v2140_v25 = vld [vmem:[#allocation9 + $0x80] sm:$0xff] }
 0x394   :  { %1454 = vst.msk [vmem:[#allocation2 + $0x308] sm:$0xff] %vm123_vm0, %v1389_v23  ;;  %v1531_v47 = vld [vmem:[#allocation2 + $0x288] ss:$2 sm:$0xff]  ;;  %v1495_v19 = vld [vmem:[#allocation2 + $0x287] ss:$2 sm:$0xff]  ;;  %2040 = vmatpush.msrb.mxu1 %v1975_v0 }
 0x395   :  { %1455 = vst.msk [vmem:[#allocation2 + $0x310] sm:$0xff] %vm123_vm0, %v1390_v20  ;;  %2206 = vmatpush.msrb.mxu2 %v2141_v45  ;;  %v1974_v20 = vld [vmem:[#allocation9 + $0x60] sm:$0xff] }
 0x396   :  { %1456 = vst.msk [vmem:[#allocation2 + $0x328] sm:$0xff] %vm123_vm0, %v1391_v29  ;;  %2041 = vmatpush.msrb.mxu1 %v1974_v20  ;;  %v2126_v62 = vld [vmem:[#allocation2 + $0x2a8] ss:$2 sm:$0xff] }
 0x397   :  { %1457 = vst.msk [vmem:[#allocation2 + $0x330] sm:$0xff] %vm123_vm0, %v1392_v31  ;;  %4055 = vmatmul.msk.f32.gmra.mxu1 %vm123_vm0, %v1521_v32  ;;  %2207 = vmatpush.msrb.mxu2 %v2140_v25  ;;  %v1790_v32 = vld [vmem:[#allocation2 + $0x1c9] ss:$2 sm:$0xff] }
 0x398   :  { %1458 = vst.msk [vmem:[#allocation2 + $0x348] sm:$0xff] %vm123_vm0, %v1393_v33  ;;  %v1533_v23 = vld [vmem:[#allocation2 + $0x2c8] ss:$2 sm:$0xff]  ;;  %v1497_v31 = vld [vmem:[#allocation2 + $0x2c7] ss:$2 sm:$0xff] }
 0x399   :  { %1459 = vst.msk [vmem:[#allocation2 + $0x350] sm:$0xff] %vm123_vm0, %v1394_v14  ;;  %v1776_v33 = vld [vmem:[#allocation2 + $0x9] ss:$2 sm:$0xff] }
 0x39a   :  { %1460 = vst.msk [vmem:[#allocation2 + $0x368] sm:$0xff] %vm123_vm0, %v1395_v49  ;;  %4071 = vmatmul.msk.f32.gmra.mxu2 %vm123_vm0, %v1485_v36  ;;  %v1962_v45 = vld [vmem:[#allocation2 + $0x2e7] ss:$2 sm:$0xff] }
 0x39b   :  { %1461 = vst.msk [vmem:[#allocation2 + $0x370] sm:$0xff] %vm123_vm0, %v1396_v35  ;;  %v2308_v35 = vld [vmem:[#allocation9 + $0xb0] sm:$0xff] }
 0x39c   :  { %1462 = vst.msk [vmem:[#allocation2 + $0x388] sm:$0xff] %vm123_vm0, %v1397_v57  ;;  %v1535_v14 = vld [vmem:[#allocation2 + $0x308] ss:$2 sm:$0xff]  ;;  %v1499_v49 = vld [vmem:[#allocation2 + $0x307] ss:$2 sm:$0xff] }
 0x39d   :  { %1463 = vst.msk [vmem:[#allocation2 + $0x390] sm:$0xff] %vm123_vm0, %v1398_v61  ;;  %v1778_v57 = vld [vmem:[#allocation2 + $0x49] ss:$2 sm:$0xff] }
 0x39e   :  { %1464 = vst.msk [vmem:[#allocation2 + $0x3a8] sm:$0xff] %vm123_vm0, %v1399_v63  ;;  %v1944_v61 = vld [vmem:[#allocation2 + $0x67] ss:$2 sm:$0xff] }
 0x39f   :  { %1465 = vst.msk [vmem:[#allocation2 + $0x3b0] sm:$0xff] %vm123_vm0, %v1400_v1  ;;  %4056 = vmatmul.msk.f32.gmra.mxu1 %vm123_vm0, %v1523_v54  ;;  %v1780_v63 = vld [vmem:[#allocation2 + $0x89] ss:$2 sm:$0xff]  ;;  %v2110_v1 = vld [vmem:[#allocation2 + $0x68] ss:$2 sm:$0xff] }
 0x3a0   :  { %1466 = vst.msk [vmem:[#allocation2 + $0x3c8] sm:$0xff] %vm123_vm0, %v1401_v4  ;;  %v1537_v27 = vld [vmem:[#allocation2 + $0x348] ss:$2 sm:$0xff]  ;;  %v1501_v52 = vld [vmem:[#allocation2 + $0x347] ss:$2 sm:$0xff] }
 0x3a1   :  { %1467 = vst.msk [vmem:[#allocation2 + $0x3d0] sm:$0xff] %vm123_vm0, %v1402_v17  ;;  %4063 = vmatmul.msk.f32.vlgmr.msrb.gmra.mxu3 %vm123_vm0, %v1537_v27  ;;  %v1946_v4 = vld [vmem:[#allocation2 + $0xa7] ss:$2 sm:$0xff]  ;;  %v2112_v17 = vld [vmem:[#allocation2 + $0xa8] ss:$2 sm:$0xff] }
 0x3a2   :  { %1468 = vst.msk [vmem:[#allocation2 + $0x3e8] sm:$0xff] %vm123_vm0, %v1403_v30  ;;  %1872 = vmatpush.msrb.mxu3 %v1811_v13  ;;  %4072 = vmatmul.msk.f32.gmra.mxu2 %vm123_vm0, %v1487_v2  ;;  %v1784_v30 = vld [vmem:[#allocation2 + $0x109] ss:$2 sm:$0xff]  ;;  %v2116_v27 = vld [vmem:[#allocation2 + $0x128] ss:$2 sm:$0xff] }
 0x3a3   :  { %1469 = vst.msk [vmem:[#allocation2 + $0x3f0] sm:$0xff] %vm123_vm0, %v1404_v7  ;;  %v2307_v7 = vld [vmem:[#allocation9 + $0xa8] sm:$0xff]  ;;  %v1952_v13 = vld [vmem:[#allocation2 + $0x167] ss:$2 sm:$0xff] }
 0x3a4   :  { %1470 = vst.msk [vmem:[#allocation2 + $0x408] sm:$0xff] %vm123_vm0, %v1405_v46  ;;  %v1539_v55 = vld [vmem:[#allocation2 + $0x388] ss:$2 sm:$0xff]  ;;  %1873 = vmatpush.msrb.mxu3 %v1810_v16  ;;  %v1503_v38 = vld [vmem:[#allocation2 + $0x387] ss:$2 sm:$0xff] }
 0x3a5   :  { %1471 = vst.msk [vmem:[#allocation2 + $0x410] sm:$0xff] %vm123_vm0, %v1406_v11  ;;  %v1786_v46 = vld [vmem:[#allocation2 + $0x149] ss:$2 sm:$0xff] }
 0x3a6   :  { %1472 = vst.msk [vmem:[#allocation2 + $0x428] sm:$0xff] %vm123_vm0, %v1407_v53  ;;  %1874 = vmatpush.msrb.mxu3 %v1809_v6  ;;  %v2118_v53 = vld [vmem:[#allocation2 + $0x168] ss:$2 sm:$0xff]  ;;  %v1956_v2 = vld [vmem:[#allocation2 + $0x1e7] ss:$2 sm:$0xff] }
 0x3a7   :  { %1473 = vst.msk [vmem:[#allocation2 + $0x430] sm:$0xff] %vm123_vm0, %v1408_v58  ;;  %4057 = vmatmul.msk.f32.gmra.mxu1 %vm123_vm0, %v1525_v44  ;;  %v2122_v6 = vld [vmem:[#allocation2 + $0x1e8] ss:$2 sm:$0xff]  ;;  %v1798_v25 = vld [vmem:[#allocation2 + $0x309] ss:$2 sm:$0xff] }
 0x3a8   :  { %1474 = vst.msk [vmem:[#allocation2 + $0x448] sm:$0xff] %vm123_vm0, %v1409_v18  ;;  %v1541_v21 = vld [vmem:[#allocation2 + $0x3c8] ss:$2 sm:$0xff]  ;;  %1875 = vmatpush.msrb.mxu3 %v1808_v51  ;;  %v1505_v41 = vld [vmem:[#allocation2 + $0x3c7] ss:$2 sm:$0xff] }
 0x3a9   :  { %4064 = vmatmul.msk.f32.gmra.mxu3 %vm123_vm0, %v1539_v55  ;;  %v1954_v18 = vld [vmem:[#allocation2 + $0x1a7] ss:$2 sm:$0xff]  ;;  %v2120_v55 = vld [vmem:[#allocation2 + $0x1a8] ss:$2 sm:$0xff] }
 0x3aa   :  { %4073 = vmatmul.msk.f32.gmra.mxu2 %vm123_vm0, %v1489_v12  ;;  %v2306_v44 = vld [vmem:[#allocation9 + $0xa0] sm:$0xff] }
 0x3ac   :  { %v1543_v34 = vld [vmem:[#allocation2 + $0x408] ss:$2 sm:$0xff]  ;;  %v1507_v29 = vld [vmem:[#allocation2 + $0x407] ss:$2 sm:$0xff] }
 0x3af   :  { %4058 = vmatmul.msk.f32.gmra.mxu1 %vm123_vm0, %v1527_v22 }
 0x3b1   :  { %4065 = vmatmul.msk.f32.gmra.mxu3 %vm123_vm0, %v1541_v21  ;;  %v1792_v21 = vld [vmem:[#allocation2 + $0x249] ss:$2 sm:$0xff] }
 0x3b2   :  { %4074 = vmatmul.msk.f32.gmra.mxu2 %vm123_vm0, %v1491_v39  ;;  %v1794_v39 = vld [vmem:[#allocation2 + $0x289] ss:$2 sm:$0xff] }
 0x3b7   :  { %4059 = vmatmul.msk.f32.gmra.mxu1 %vm123_vm0, %v1529_v24 }
 0x3b9   :  { %4066 = vmatmul.msk.f32.gmra.mxu3 %vm123_vm0, %v1543_v34 }
 0x3ba   :  { %4075 = vmatmul.msk.f32.gmra.mxu2 %vm123_vm0, %v1493_v3 }
 0x3bf   :  { %4060 = vmatmul.msk.f32.gmra.mxu1 %vm123_vm0, %v1531_v47 }
 0x3c1   :  { %4079 = vmatmul.msk.f32.vlgmr.msra.gmra.mxu3 %vm123_vm0, %v1501_v52  ;;  %v1958_v52 = vld [vmem:[#allocation2 + $0x267] ss:$2 sm:$0xff] }
 0x3c2   :  { %2370 = vmatpush.msra.mxu3 %v2309_v8  ;;  %4076 = vmatmul.msk.f32.gmra.mxu2 %vm123_vm0, %v1495_v19  ;;  %v2124_v8 = vld [vmem:[#allocation2 + $0x268] ss:$2 sm:$0xff]  ;;  %v1796_v19 = vld [vmem:[#allocation2 + $0x2c9] ss:$2 sm:$0xff] }
 0x3c4   :  { %2371 = vmatpush.msra.mxu3 %v2308_v35  ;;  %v1800_v35 = vld [vmem:[#allocation2 + $0x349] ss:$2 sm:$0xff] }
 0x3c6   :  { %2372 = vmatpush.msra.mxu3 %v2307_v7 }
 0x3c7   :  { %4061 = vmatmul.msk.f32.gmra.mxu1 %vm123_vm0, %v1533_v23  ;;  %v2128_v23 = vld [vmem:[#allocation2 + $0x2e8] ss:$2 sm:$0xff] }
 0x3c8   :  { %2373 = vmatpush.msra.mxu3 %v2306_v44  ;;  %v2473_v44 = vld [vmem:[#allocation9 + $0xc0] sm:$0xff] }
 0x3c9   :  { %4080 = vmatmul.msk.f32.gmra.mxu3 %vm123_vm0, %v1503_v38 }
 0x3ca   :  { %4077 = vmatmul.msk.f32.gmra.mxu2 %vm123_vm0, %v1497_v31 }
 0x3cf   :  { %4062 = vmatmul.msk.f32.gmra.mxu1 %vm123_vm0, %v1535_v14  ;;  %v2642_v14 = vld [vmem:[#allocation9 + $0xf8] sm:$0xff] }
 0x3d0   :  { %2703 = vmatpush.msra.mxu2 %v2642_v14 }
 0x3d1   :  { %4081 = vmatmul.msk.f32.gmra.mxu3 %vm123_vm0, %v1505_v41  ;;  %v1960_v41 = vld [vmem:[#allocation2 + $0x2a7] ss:$2 sm:$0xff] }
 0x3d2   :  { %4078 = vmatmul.msk.f32.gmra.mxu2 %vm123_vm0, %v1499_v49  ;;  %v1964_v49 = vld [vmem:[#allocation2 + $0x327] ss:$2 sm:$0xff] }
 0x3d7   :  { %4099 = vmatmul.msk.f32.vlgmr.msrb.gmra.mxu1 %vm123_vm0, %v1942_v37  ;;  %v2130_v37 = vld [vmem:[#allocation2 + $0x328] ss:$2 sm:$0xff] }
 0x3d9   :  { %4082 = vmatmul.msk.f32.gmra.mxu3 %vm123_vm0, %v1507_v29 }
 0x3da   :  { %4115 = vmatmul.msk.f32.vlgmr.msrb.gmra.mxu2 %vm123_vm0, %v2108_v59  ;;  %v2476_v59 = vld [vmem:[#allocation9 + $0xd8] sm:$0xff] }
 0x3db   :  { %2537 = vmatpush.msra.mxu1 %v2476_v59 }
 0x3df   :  { %4100 = vmatmul.msk.f32.gmra.mxu1 %vm123_vm0, %v1944_v61 }
 0x3e1   :  { %4083 = vmatmul.msk.f32.vlgmr.msrb.gmra.mxu3 %vm123_vm0, %v1776_v33 }
 0x3e2   :  { %4116 = vmatmul.msk.f32.gmra.mxu2 %vm123_vm0, %v2110_v1 }
 0x3e7   :  { %4101 = vmatmul.msk.f32.gmra.mxu1 %vm123_vm0, %v1946_v4 }
 0x3e9   :  { %4084 = vmatmul.msk.f32.gmra.mxu3 %vm123_vm0, %v1778_v57  ;;  %v2808_v57 = vld [vmem:[#allocation9 + $0x118] sm:$0xff] }
 0x3ea   :  { %4117 = vmatmul.msk.f32.gmra.mxu2 %vm123_vm0, %v2112_v17  ;;  %2869 = vmatpush.msrb.mxu3 %v2808_v57  ;;  %v1966_v17 = vld [vmem:[#allocation2 + $0x367] ss:$2 sm:$0xff] }
 0x3ef   :  { %4102 = vmatmul.msk.f32.gmra.mxu1 %vm123_vm0, %v1948_v5  ;;  %v1802_v5 = vld [vmem:[#allocation2 + $0x389] ss:$2 sm:$0xff] }
 0x3f1   :  { %4085 = vmatmul.msk.f32.gmra.mxu3 %vm123_vm0, %v1780_v63 }
 0x3f2   :  { %4118 = vmatmul.msk.f32.gmra.mxu2 %vm123_vm0, %v2114_v48 }
 0x3f4   :  { %v1614_v28 = vpop.f32.mrf.mxu1 }
 0x3f7   :  { %4103 = vmatmul.msk.f32.gmra.mxu1 %vm123_vm0, %v1950_v9 }
 0x3f9   :  { %4086 = vmatmul.msk.f32.gmra.mxu3 %vm123_vm0, %v1782_v42 }
 0x3fa   :  { %4119 = vmatmul.msk.f32.gmra.mxu2 %vm123_vm0, %v2116_v27  ;;  %v1968_v27 = vld [vmem:[#allocation2 + $0x3a7] ss:$2 sm:$0xff] }
 0x3fc   :  { %v1617_v11 = vpop.f32.mrf.mxu1 }
 0x3fd   :  { %v1727_v10 = vpop.f32.mrf.mxu2 }
 0x3fe   :  { %v6042_v26 = vadd.f32 %v1727_v10, %v1614_v28  ;;  %v1804_v10 = vld [vmem:[#allocation2 + $0x3c9] ss:$2 sm:$0xff] }
 0x3ff   :  { %4104 = vmatmul.msk.f32.gmra.mxu1 %vm123_vm0, %v1952_v13 }
 0x401   :  { %4087 = vmatmul.msk.f32.gmra.mxu3 %vm123_vm0, %v1784_v30  ;;  %v2132_v30 = vld [vmem:[#allocation2 + $0x368] ss:$2 sm:$0xff] }
 0x402   :  { %4120 = vmatmul.msk.f32.gmra.mxu2 %vm123_vm0, %v2118_v53 }
 0x404   :  { %v1620_v15 = vpop.f32.mrf.mxu1 }
 0x405   :  { %v1730_v60 = vpop.f32.mrf.mxu2 }
 0x406   :  { %v6047_v58 = vadd.f32 %v1730_v60, %v1617_v11  ;;  %v2134_v11 = vld [vmem:[#allocation2 + $0x3a8] ss:$2 sm:$0xff] }
 0x407   :  { %4105 = vmatmul.msk.f32.gmra.mxu1 %vm123_vm0, %v1954_v18  ;;  %v2475_v18 = vld [vmem:[#allocation9 + $0xd0] sm:$0xff] }
 0x408   :  { %2538 = vmatpush.msra.mxu1 %v2475_v18 }
 0x409   :  { %4088 = vmatmul.msk.f32.gmra.mxu3 %vm123_vm0, %v1786_v46 }
 0x40a   :  { %4121 = vmatmul.msk.f32.gmra.mxu2 %vm123_vm0, %v2120_v55  ;;  %v2640_v55 = vld [vmem:[#allocation9 + $0xe8] sm:$0xff] }
 0x40c   :  { %v1623_v54 = vpop.f32.mrf.mxu1 }
 0x40d   :  { %v1733_v36 = vpop.f32.mrf.mxu2 }
 0x40e   :  { %v6052_v16 = vadd.f32 %v1733_v36, %v1620_v15  ;;  %v1970_v36 = vld [vmem:[#allocation2 + $0x3e7] ss:$2 sm:$0xff] }
 0x40f   :  { %4106 = vmatmul.msk.f32.gmra.mxu1 %vm123_vm0, %v1956_v2  ;;  %v1806_v2 = vld [vmem:[#allocation2 + $0x409] ss:$2 sm:$0xff] }
 0x411   :  { %4089 = vmatmul.msk.f32.gmra.mxu3 %vm123_vm0, %v1788_v40 }
 0x412   :  { %4122 = vmatmul.msk.f32.gmra.mxu2 %vm123_vm0, %v2122_v6  ;;  %v2136_v6 = vld [vmem:[#allocation2 + $0x3e8] ss:$2 sm:$0xff] }
 0x414   :  { %v1626_v22 = vpop.f32.mrf.mxu1 }
 0x415   :  { %v1736_v12 = vpop.f32.mrf.mxu2 }
 0x416   :  { %v6057_v51 = vadd.f32 %v1736_v12, %v1623_v54  ;;  %v2474_v54 = vld [vmem:[#allocation9 + $0xc8] sm:$0xff] }
 0x417   :  { %4107 = vmatmul.msk.f32.gmra.mxu1 %vm123_vm0, %v1958_v52 }
 0x418   :  { %2539 = vmatpush.msra.mxu1 %v2474_v54 }
 0x419   :  { %4090 = vmatmul.msk.f32.gmra.mxu3 %vm123_vm0, %v1790_v32  ;;  %v2641_v32 = vld [vmem:[#allocation9 + $0xf0] sm:$0xff] }
 0x41a   :  { %4123 = vmatmul.msk.f32.gmra.mxu2 %vm123_vm0, %v2124_v8  ;;  %2540 = vmatpush.msra.mxu1 %v2473_v44  ;;  %v1972_v8 = vld [vmem:[#allocation2 + $0x427] ss:$2 sm:$0xff] }
 0x41b   :  { %2704 = vmatpush.msra.mxu2 %v2641_v32 }
 0x41c   :  { %v1629_v47 = vpop.f32.mrf.mxu1 }
 0x41d   :  { %v1739_v3 = vpop.f32.mrf.mxu2  ;;  %2705 = vmatpush.msra.mxu2 %v2640_v55 }
 0x41e   :  { %v6062_v38 = vadd.f32 %v1739_v3, %v1626_v22  ;;  %v2138_v3 = vld [vmem:[#allocation2 + $0x428] ss:$2 sm:$0xff] }
 0x41f   :  { %4108 = vmatmul.msk.f32.gmra.mxu1 %vm123_vm0, %v1960_v41 }
 0x421   :  { %4091 = vmatmul.msk.f32.gmra.mxu3 %vm123_vm0, %v1792_v21  ;;  %v2639_v21 = vld [vmem:[#allocation9 + $0xe0] sm:$0xff] }
 0x422   :  { %4124 = vmatmul.msk.f32.gmra.mxu2 %vm123_vm0, %v2126_v62 }
 0x423   :  { %2706 = vmatpush.msra.mxu2 %v2639_v21  ;;  %v2449_v21 = vld [vmem:[#allocation2 + $0x147] ss:$2 sm:$0xff] }
 0x424   :  { %v1650_v34 = vpop.f32.mrf.mxu3  ;;  %v1632_v0 = vpop.f32.mrf.mxu1 }
 0x425   :  { %v1742_v43 = vpop.f32.mrf.mxu2 }
 0x426   :  { %v6067_v50 = vadd.f32 %v1742_v43, %v1629_v47  ;;  %v2807_v47 = vld [vmem:[#allocation9 + $0x110] sm:$0xff] }
 0x427   :  { %4109 = vmatmul.msk.f32.gmra.mxu1 %vm123_vm0, %v1962_v45  ;;  %2870 = vmatpush.msrb.mxu3 %v2807_v47  ;;  %v2276_v45 = vld [vmem:[#allocation2 + $0x69] ss:$2 sm:$0xff]  ;;  %v2617_v47 = vld [vmem:[#allocation2 + $0x188] ss:$2 sm:$0xff] }
 0x429   :  { %4092 = vmatmul.msk.f32.gmra.mxu3 %vm123_vm0, %v1794_v39 }
 0x42a   :  { %4125 = vmatmul.msk.f32.gmra.mxu2 %vm123_vm0, %v2128_v23 }
 0x42c   :  { %v1653_v24 = vpop.f32.mrf.mxu3  ;;  %v1635_v33 = vpop.f32.mrf.mxu1 }
 0x42d   :  { %v1745_v29 = vpop.f32.mrf.mxu2 }
 0x42e   :  { %v6074_v31 = vadd.f32 %v1745_v29, %v1632_v0  ;;  %v2441_v0 = vld [vmem:[#allocation2 + $0x47] ss:$2 sm:$0xff] }
 0x42f   :  { %4110 = vmatmul.msk.f32.gmra.mxu1 %vm123_vm0, %v1964_v49  ;;  %v2443_v49 = vld [vmem:[#allocation2 + $0x87] ss:$2 sm:$0xff] }
 0x431   :  { %4093 = vmatmul.msk.f32.gmra.mxu3 %vm123_vm0, %v1796_v19 }
 0x432   :  { %4126 = vmatmul.msk.f32.gmra.mxu2 %vm123_vm0, %v2130_v37  ;;  %v2609_v37 = vld [vmem:[#allocation2 + $0x88] ss:$2 sm:$0xff] }
 0x434   :  { %v1656_v56 = vpop.f32.mrf.mxu3  ;;  %v1638_v42 = vpop.f32.mrf.mxu1 }
 0x435   :  { %v1748_v63 = vpop.f32.mrf.mxu2 }
 0x436   :  { %v6081_v4 = vadd.f32 %v1748_v63, %v1635_v33 }
 0x437   :  { %4111 = vmatmul.msk.f32.gmra.mxu1 %vm123_vm0, %v1966_v17  ;;  %v2445_v17 = vld [vmem:[#allocation2 + $0xc7] ss:$2 sm:$0xff] }
 0x439   :  { %4094 = vmatmul.msk.f32.gmra.mxu3 %vm123_vm0, %v1798_v25  ;;  %v2607_v25 = vld [vmem:[#allocation2 + $0x48] ss:$2 sm:$0xff] }
 0x43a   :  { %4127 = vmatmul.msk.f32.gmra.mxu2 %vm123_vm0, %v2132_v30  ;;  %v2611_v30 = vld [vmem:[#allocation2 + $0xc8] ss:$2 sm:$0xff] }
 0x43c   :  { %v6072_v20 = vpop.f32.mrf.mxu3  ;;  %v1641_v46 = vpop.f32.mrf.mxu1 }
 0x43d   :  { %v1751_v7 = vpop.f32.mrf.mxu2 }
 0x43e   :  { %v6088_v9 = vadd.f32 %v1751_v7, %v1638_v42 }
 0x43f   :  { %4112 = vmatmul.msk.f32.gmra.mxu1 %vm123_vm0, %v1968_v27 }
 0x441   :  { %4095 = vmatmul.msk.f32.gmra.mxu3 %vm123_vm0, %v1800_v35  ;;  %v2278_v35 = vld [vmem:[#allocation2 + $0xa9] ss:$2 sm:$0xff] }
 0x442   :  { %4128 = vmatmul.msk.f32.gmra.mxu2 %vm123_vm0, %v2134_v11  ;;  %v2447_v11 = vld [vmem:[#allocation2 + $0x107] ss:$2 sm:$0xff] }
 0x444   :  { %v1763_v61 = vpop.f32.mrf.mxu3  ;;  %v1644_v15 = vpop.f32.mrf.mxu1 }
 0x445   :  { %v6079_v1 = vadd.f32 %v1763_v61, %v1650_v34  ;;  %v1754_v40 = vpop.f32.mrf.mxu2 }
 0x446   :  { %v6095_v60 = vadd.f32 %v1754_v40, %v1641_v46  ;;  %v2613_v40 = vld [vmem:[#allocation2 + $0x108] ss:$2 sm:$0xff] }
 0x447   :  { %4113 = vmatmul.msk.f32.gmra.mxu1 %vm123_vm0, %v1970_v36 }
 0x449   :  { %4096 = vmatmul.msk.f32.gmra.mxu3 %vm123_vm0, %v1802_v5  ;;  %v2280_v5 = vld [vmem:[#allocation2 + $0xe9] ss:$2 sm:$0xff] }
 0x44a   :  { %4129 = vmatmul.msk.f32.gmra.mxu2 %vm123_vm0, %v2136_v6  ;;  %v2615_v6 = vld [vmem:[#allocation2 + $0x148] ss:$2 sm:$0xff] }
 0x44c   :  { %v1766_v48 = vpop.f32.mrf.mxu3  ;;  %v1647_v39 = vpop.f32.mrf.mxu1 }
 0x44d   :  { %v6086_v28 = vadd.f32 %v1766_v48, %v1653_v24  ;;  %v1757_v12 = vpop.f32.mrf.mxu2  ;;  %v2274_v24 = vld [vmem:[#allocation2 + $0x29] ss:$2 sm:$0xff] }
 0x44e   :  { %v6103_v52 = vadd.f32 %v1757_v12, %v1644_v15  ;;  %v2806_v15 = vld [vmem:[#allocation9 + $0x108] sm:$0xff] }
 0x44f   :  { %4114 = vmatmul.msk.f32.gmra.mxu1 %vm123_vm0, %v1972_v8  ;;  %2871 = vmatpush.msrb.mxu3 %v2806_v15 }
 0x451   :  { %4097 = vmatmul.msk.f32.gmra.mxu3 %vm123_vm0, %v1804_v10 }
 0x452   :  { %4130 = vmatmul.msk.f32.gmra.mxu2 %vm123_vm0, %v2138_v3  ;;  %v2286_v3 = vld [vmem:[#allocation2 + $0x1a9] ss:$2 sm:$0xff] }
 0x454   :  { %v1769_v13 = vpop.f32.mrf.mxu3  ;;  %v2043_v43 = vpop.f32.mrf.mxu1 }
 0x455   :  { %v6093_v53 = vadd.f32 %v1769_v13, %v1656_v56  ;;  %v1760_v19 = vpop.f32.mrf.mxu2  ;;  %v2282_v13 = vld [vmem:[#allocation2 + $0x129] ss:$2 sm:$0xff] }
 0x456   :  { %v6109_v56 = vadd.f32 %v1760_v19, %v1647_v39 }
 0x457   :  { %4147 = vmatmul.msk.f32.vlgmr.msra.gmra.mxu1 %vm123_vm0, %v2441_v0 }
 0x459   :  { %4098 = vmatmul.msk.f32.gmra.mxu3 %vm123_vm0, %v1806_v2  ;;  %v2284_v2 = vld [vmem:[#allocation2 + $0x169] ss:$2 sm:$0xff] }
 0x45a   :  { %4163 = vmatmul.msk.f32.vlgmr.msra.gmra.mxu2 %vm123_vm0, %v2607_v25  ;;  %v2288_v25 = vld [vmem:[#allocation2 + $0x1e9] ss:$2 sm:$0xff] }
 0x45c   :  { %v1772_v34 = vpop.f32.mrf.mxu3 }
 0x45d   :  { %v6101_v22 = vadd.f32 %v1772_v34, %v6072_v20  ;;  %v2209_v29 = vpop.f32.mrf.mxu2 }
 0x45f   :  { %4148 = vmatmul.msk.f32.gmra.mxu1 %vm123_vm0, %v2443_v49 }
 0x461   :  { %4131 = vmatmul.msk.f32.vlgmr.msra.gmra.mxu3 %vm123_vm0, %v2274_v24  ;;  %v2451_v24 = vld [vmem:[#allocation2 + $0x187] ss:$2 sm:$0xff] }
 0x462   :  { %4164 = vmatmul.msk.f32.gmra.mxu2 %vm123_vm0, %v2609_v37  ;;  %v2290_v37 = vld [vmem:[#allocation2 + $0x269] ss:$2 sm:$0xff] }
 0x464   :  { %v1877_v41 = vpop.f32.mrf.mxu3 }
 0x465   :  { %v1925_v62 = vadd.f32 %v1877_v41, %v6042_v26  ;;  %v2046_v26 = vpop.f32.mrf.mxu1  ;;  %v2212_v61 = vpop.f32.mrf.mxu2 }
 0x467   :  { %v2091_v23 = vadd.f32 %v2043_v43, %v1925_v62  ;;  %4149 = vmatmul.msk.f32.gmra.mxu1 %vm123_vm0, %v2445_v17 }
 0x469   :  { %4132 = vmatmul.msk.f32.gmra.mxu3 %vm123_vm0, %v2276_v45  ;;  %v6115_v14 = vadd.f32 %v2209_v29, %v2091_v23  ;;  %v2453_v45 = vld [vmem:[#allocation2 + $0x1c7] ss:$2 sm:$0xff]  ;;  %v2619_v23 = vld [vmem:[#allocation2 + $0x1c8] ss:$2 sm:$0xff] }
 0x46a   :  { %4165 = vmatmul.msk.f32.gmra.mxu2 %vm123_vm0, %v2611_v30  ;;  %v2457_v30 = vld [vmem:[#allocation2 + $0x287] ss:$2 sm:$0xff] }
 0x46c   :  { %v1880_v20 = vpop.f32.mrf.mxu3 }
 0x46d   :  { %v1926_v33 = vadd.f32 %v1880_v20, %v6047_v58  ;;  %v2049_v58 = vpop.f32.mrf.mxu1  ;;  %v2215_v46 = vpop.f32.mrf.mxu2 }
 0x46f   :  { %v2092_v57 = vadd.f32 %v2046_v26, %v1926_v33  ;;  %4150 = vmatmul.msk.f32.gmra.mxu1 %vm123_vm0, %v2447_v11  ;;  %v2459_v11 = vld [vmem:[#allocation2 + $0x2c7] ss:$2 sm:$0xff] }
 0x471   :  { %4133 = vmatmul.msk.f32.gmra.mxu3 %vm123_vm0, %v2278_v35  ;;  %v6121_v42 = vadd.f32 %v2212_v61, %v2092_v57  ;;  %v2455_v35 = vld [vmem:[#allocation2 + $0x207] ss:$2 sm:$0xff]  ;;  %v2621_v57 = vld [vmem:[#allocation2 + $0x208] ss:$2 sm:$0xff] }
 0x472   :  { %4166 = vmatmul.msk.f32.gmra.mxu2 %vm123_vm0, %v2613_v40  ;;  %v2625_v40 = vld [vmem:[#allocation2 + $0x2c8] ss:$2 sm:$0xff] }
 0x474   :  { %v1883_v59 = vpop.f32.mrf.mxu3 }
 0x475   :  { %v1927_v63 = vadd.f32 %v1883_v59, %v6052_v16  ;;  %v2052_v16 = vpop.f32.mrf.mxu1  ;;  %v2218_v55 = vpop.f32.mrf.mxu2  ;;  %v2805_v59 = vld [vmem:[#allocation9 + $0x100] sm:$0xff] }
 0x476   :  { %2872 = vmatpush.msrb.mxu3 %v2805_v59 }
 0x477   :  { %v2093_v48 = vadd.f32 %v2049_v58, %v1927_v63  ;;  %4151 = vmatmul.msk.f32.gmra.mxu1 %vm123_vm0, %v2449_v21 }
 0x479   :  { %4134 = vmatmul.msk.f32.gmra.mxu3 %vm123_vm0, %v2280_v5  ;;  %v6127_v10 = vadd.f32 %v2215_v46, %v2093_v48  ;;  %v2292_v48 = vld [vmem:[#allocation2 + $0x2a9] ss:$2 sm:$0xff] }
 0x47a   :  { %4167 = vmatmul.msk.f32.gmra.mxu2 %vm123_vm0, %v2615_v6 }
 0x47c   :  { %v1886_v7 = vpop.f32.mrf.mxu3 }
 0x47d   :  { %v1928_v27 = vadd.f32 %v1886_v7, %v6057_v51  ;;  %v2055_v54 = vpop.f32.mrf.mxu1  ;;  %v2221_v12 = vpop.f32.mrf.mxu2  ;;  %v2623_v7 = vld [vmem:[#allocation2 + $0x288] ss:$2 sm:$0xff] }
 0x47f   :  { %v2094_v18 = vadd.f32 %v2052_v16, %v1928_v27  ;;  %4152 = vmatmul.msk.f32.gmra.mxu1 %vm123_vm0, %v2451_v24 }
 0x481   :  { %4135 = vmatmul.msk.f32.gmra.mxu3 %vm123_vm0, %v2282_v13  ;;  %v6133_v51 = vadd.f32 %v2218_v55, %v2094_v18  ;;  %v2294_v13 = vld [vmem:[#allocation2 + $0x2e9] ss:$2 sm:$0xff] }
 0x482   :  { %4168 = vmatmul.msk.f32.gmra.mxu2 %vm123_vm0, %v2617_v47  ;;  %v2300_v47 = vld [vmem:[#allocation2 + $0x3a9] ss:$2 sm:$0xff] }
 0x484   :  { %v1889_v32 = vpop.f32.mrf.mxu3 }
 0x485   :  { %v1929_v36 = vadd.f32 %v1889_v32, %v6062_v38  ;;  %v2058_v38 = vpop.f32.mrf.mxu1  ;;  %v2224_v62 = vpop.f32.mrf.mxu2 }
 0x487   :  { %v2095_v44 = vadd.f32 %v2055_v54, %v1929_v36  ;;  %4153 = vmatmul.msk.f32.gmra.mxu1 %vm123_vm0, %v2453_v45  ;;  %v2296_v36 = vld [vmem:[#allocation2 + $0x329] ss:$2 sm:$0xff]  ;;  %v2627_v54 = vld [vmem:[#allocation2 + $0x308] ss:$2 sm:$0xff] }
 0x488   :  { %v2302_v45 = vld [vmem:[#allocation2 + $0x3e9] ss:$2 sm:$0xff] }
 0x489   :  { %4136 = vmatmul.msk.f32.gmra.mxu3 %vm123_vm0, %v2284_v2  ;;  %v6139_v8 = vadd.f32 %v2221_v12, %v2095_v44  ;;  %v2629_v12 = vld [vmem:[#allocation2 + $0x348] ss:$2 sm:$0xff] }
 0x48a   :  { %4169 = vmatmul.msk.f32.gmra.mxu2 %vm123_vm0, %v2619_v23 }
 0x48c   :  { %v1892_v34 = vpop.f32.mrf.mxu3 }
 0x48d   :  { %v1930_v39 = vadd.f32 %v1892_v34, %v6067_v50  ;;  %v2061_v50 = vpop.f32.mrf.mxu1  ;;  %v2227_v33 = vpop.f32.mrf.mxu2  ;;  %v2298_v34 = vld [vmem:[#allocation2 + $0x369] ss:$2 sm:$0xff] }
 0x48f   :  { %v2096_v41 = vadd.f32 %v2058_v38, %v1930_v39  ;;  %4154 = vmatmul.msk.f32.gmra.mxu1 %vm123_vm0, %v2455_v35 }
 0x491   :  { %4137 = vmatmul.msk.f32.gmra.mxu3 %vm123_vm0, %v2286_v3  ;;  %v6145_v0 = vadd.f32 %v2224_v62, %v2096_v41  ;;  %v2631_v41 = vld [vmem:[#allocation2 + $0x388] ss:$2 sm:$0xff] }
 0x492   :  { %4170 = vmatmul.msk.f32.gmra.mxu2 %vm123_vm0, %v2621_v57 }
 0x494   :  { %v1895_v19 = vpop.f32.mrf.mxu3 }
 0x495   :  { %v1931_v43 = vadd.f32 %v1895_v19, %v6074_v31  ;;  %v2064_v31 = vpop.f32.mrf.mxu1  ;;  %v2230_v58 = vpop.f32.mrf.mxu2 }
 0x497   :  { %v2097_v20 = vadd.f32 %v2061_v50, %v1931_v43  ;;  %4155 = vmatmul.msk.f32.gmra.mxu1 %vm123_vm0, %v2457_v30 }
 0x499   :  { %4138 = vmatmul.msk.f32.gmra.mxu3 %vm123_vm0, %v2288_v25  ;;  %v6151_v49 = vadd.f32 %v2227_v33, %v2097_v20  ;;  %v2633_v25 = vld [vmem:[#allocation2 + $0x3c8] ss:$2 sm:$0xff] }
 0x49a   :  { %4171 = vmatmul.msk.f32.gmra.mxu2 %vm123_vm0, %v2623_v7 }
 0x49c   :  { %v1898_v29 = vpop.f32.mrf.mxu3 }
 0x49d   :  { %v1932_v26 = vadd.f32 %v1898_v29, %v6081_v4  ;;  %v6161_v5 = vpop.f32.mrf.mxu1  ;;  %v6166_v27 = vpop.f32.mrf.mxu2 }
 0x49f   :  { %v2098_v61 = vadd.f32 %v2064_v31, %v1932_v26  ;;  %4156 = vmatmul.msk.f32.gmra.mxu1 %vm123_vm0, %v2459_v11  ;;  %v2304_v26 = vld [vmem:[#allocation2 + $0x429] ss:$2 sm:$0xff]  ;;  %v2635_v31 = vld [vmem:[#allocation2 + $0x408] ss:$2 sm:$0xff] }
 0x4a1   :  { %4139 = vmatmul.msk.f32.gmra.mxu3 %vm123_vm0, %v2290_v37  ;;  %v6159_v4 = vadd.f32 %v2230_v58, %v2098_v61  ;;  %v2773_v61 = vld [vmem:[#allocation2 + $0x49] ss:$2 sm:$0xff] }
 0x4a2   :  { %4172 = vmatmul.msk.f32.gmra.mxu2 %vm123_vm0, %v2625_v40 }
 0x4a4   :  { %v1901_v63 = vpop.f32.mrf.mxu3 }
 0x4a5   :  { %v6157_v17 = vadd.f32 %v1901_v63, %v6088_v9  ;;  %v6171_v9 = vpop.f32.mrf.mxu1  ;;  %v6176_v18 = vpop.f32.mrf.mxu2  ;;  %v2637_v63 = vld [vmem:[#allocation2 + $0x448] ss:$2 sm:$0xff] }
 0x4a9   :  { %4140 = vmatmul.msk.f32.gmra.mxu3 %vm123_vm0, %v2292_v48 }
 0x4aa   :  { %4173 = vmatmul.msk.f32.gmra.mxu2 %vm123_vm0, %v2627_v54 }
 0x4ac   :  { %v1904_v46 = vpop.f32.mrf.mxu3 }
 0x4ad   :  { %v6169_v16 = vadd.f32 %v1904_v46, %v6095_v60  ;;  %v6181_v55 = vpop.f32.mrf.mxu1  ;;  %v2461_v60 = vld [vmem:[#allocation2 + $0x307] ss:$2 sm:$0xff]  ;;  %v6186_v2 = vpop.f32.mrf.mxu2 }
 0x4ae   :  { %4157 = vmatmul.msk.f32.gmra.mxu1 %vm123_vm0, %v2461_v60 }
 0x4b1   :  { %4141 = vmatmul.msk.f32.gmra.mxu3 %vm123_vm0, %v2294_v13 }
 0x4b2   :  { %4174 = vmatmul.msk.f32.gmra.mxu2 %vm123_vm0, %v2629_v12 }
 0x4b4   :  { %v1907_v15 = vpop.f32.mrf.mxu3 }
 0x4b5   :  { %v6179_v32 = vadd.f32 %v1907_v15, %v6103_v52  ;;  %v6191_v44 = vpop.f32.mrf.mxu1  ;;  %v2463_v52 = vld [vmem:[#allocation2 + $0x347] ss:$2 sm:$0xff]  ;;  %v6196_v38 = vpop.f32.mrf.mxu2 }
 0x4b6   :  { %4158 = vmatmul.msk.f32.gmra.mxu1 %vm123_vm0, %v2463_v52  ;;  %v2777_v15 = vld [vmem:[#allocation2 + $0xc9] ss:$2 sm:$0xff] }
 0x4b9   :  { %4142 = vmatmul.msk.f32.gmra.mxu3 %vm123_vm0, %v2296_v36 }
 0x4ba   :  { %4175 = vmatmul.msk.f32.gmra.mxu2 %vm123_vm0, %v2631_v41  ;;  %v2783_v41 = vld [vmem:[#allocation2 + $0x189] ss:$2 sm:$0xff] }
 0x4bc   :  { %v1910_v21 = vpop.f32.mrf.mxu3 }
 0x4bd   :  { %v6189_v6 = vadd.f32 %v1910_v21, %v6109_v56  ;;  %v6201_v3 = vpop.f32.mrf.mxu1  ;;  %v2465_v56 = vld [vmem:[#allocation2 + $0x387] ss:$2 sm:$0xff]  ;;  %v6206_v62 = vpop.f32.mrf.mxu2 }
 0x4be   :  { %4159 = vmatmul.msk.f32.gmra.mxu1 %vm123_vm0, %v2465_v56  ;;  %v2779_v21 = vld [vmem:[#allocation2 + $0x109] ss:$2 sm:$0xff] }
 0x4c1   :  { %4143 = vmatmul.msk.f32.gmra.mxu3 %vm123_vm0, %v2298_v34 }
 0x4c2   :  { %4176 = vmatmul.msk.f32.gmra.mxu2 %vm123_vm0, %v2633_v25 }
 0x4c4   :  { %v1913_v39 = vpop.f32.mrf.mxu3 }
 0x4c5   :  { %v6199_v24 = vadd.f32 %v1913_v39, %v6079_v1  ;;  %v6211_v50 = vpop.f32.mrf.mxu1  ;;  %v2467_v1 = vld [vmem:[#allocation2 + $0x3c7] ss:$2 sm:$0xff]  ;;  %v6216_v20 = vpop.f32.mrf.mxu2 }
 0x4c6   :  { %4160 = vmatmul.msk.f32.gmra.mxu1 %vm123_vm0, %v2467_v1  ;;  %v2781_v39 = vld [vmem:[#allocation2 + $0x149] ss:$2 sm:$0xff] }
 0x4c9   :  { %4144 = vmatmul.msk.f32.gmra.mxu3 %vm123_vm0, %v2300_v47 }
 0x4ca   :  { %4177 = vmatmul.msk.f32.gmra.mxu2 %vm123_vm0, %v2635_v31 }
 0x4cc   :  { %v1916_v19 = vpop.f32.mrf.mxu3 }
 0x4cd   :  { %v6209_v43 = vadd.f32 %v1916_v19, %v6086_v28  ;;  %v6221_v33 = vpop.f32.mrf.mxu1  ;;  %v2469_v28 = vld [vmem:[#allocation2 + $0x407] ss:$2 sm:$0xff]  ;;  %v6226_v37 = vpop.f32.mrf.mxu2 }
 0x4ce   :  { %4161 = vmatmul.msk.f32.gmra.mxu1 %vm123_vm0, %v2469_v28  ;;  %v2785_v28 = vld [vmem:[#allocation2 + $0x1c9] ss:$2 sm:$0xff] }
 0x4d1   :  { %4145 = vmatmul.msk.f32.gmra.mxu3 %vm123_vm0, %v2302_v45 }
 0x4d2   :  { %4178 = vmatmul.msk.f32.gmra.mxu2 %vm123_vm0, %v2637_v63 }
 0x4d4   :  { %v1919_v23 = vpop.f32.mrf.mxu3 }
 0x4d5   :  { %v6219_v29 = vadd.f32 %v1919_v23, %v6093_v53  ;;  %v6231_v59 = vpop.f32.mrf.mxu1  ;;  %v2471_v53 = vld [vmem:[#allocation2 + $0x447] ss:$2 sm:$0xff]  ;;  %v6236_v30 = vpop.f32.mrf.mxu2 }
 0x4d6   :  { %4162 = vmatmul.msk.f32.gmra.mxu1 %vm123_vm0, %v2471_v53 }
 0x4d9   :  { %4146 = vmatmul.msk.f32.gmra.mxu3 %vm123_vm0, %v2304_v26 }
 0x4dc   :  { %v1922_v35 = vpop.f32.mrf.mxu3 }
 0x4dd   :  { %v6229_v57 = vadd.f32 %v1922_v35, %v6101_v22  ;;  %v6241_v7 = vpop.f32.mrf.mxu1  ;;  %v2775_v22 = vld [vmem:[#allocation2 + $0x89] ss:$2 sm:$0xff]  ;;  %v6244_v11 = vpop.f32.mrf.mxu2 }
 0x4e1   :  { %4179 = vmatmul.msk.f32.vlgmr.msrb.gmra.mxu3 %vm123_vm0, %v2773_v61  ;;  %v2789_v61 = vld [vmem:[#allocation2 + $0x289] ss:$2 sm:$0xff] }
 0x4e4   :  { %v2375_v58 = vpop.f32.mrf.mxu3 }
 0x4e5   :  { %v6239_v48 = vadd.f32 %v2375_v58, %v6115_v14  ;;  %v6249_v40 = vpop.f32.mrf.mxu1  ;;  %v6252_v36 = vpop.f32.mrf.mxu2 }
 0x4e9   :  { %4180 = vmatmul.msk.f32.gmra.mxu3 %vm123_vm0, %v2775_v22 }
 0x4ec   :  { %v2378_v46 = vpop.f32.mrf.mxu3 }
 0x4ed   :  { %v6247_v13 = vadd.f32 %v2378_v46, %v6121_v42  ;;  %v6257_v54 = vpop.f32.mrf.mxu1  ;;  %v6260_v34 = vpop.f32.mrf.mxu2  ;;  %v2100_v46 = vadd.f32 %v6171_v9, %v6169_v16  ;;  %v2102_v16 = vadd.f32 %v6191_v44, %v6189_v6  ;;  %v2104_v6 = vadd.f32 %v6211_v50, %v6209_v43 }
 0x4ef   :  { %v2268_v9 = vadd.f32 %v6196_v38, %v2102_v16  ;;  %v2270_v44 = vadd.f32 %v6216_v20, %v2104_v6  ;;  %v2803_v20 = vld [vmem:[#allocation2 + $0x449] ss:$2 sm:$0xff]  ;;  %v3516_v16 = vld [vmem:[#allocation3 + $0xa0] ss:$2 sm:$0xff] }
 0x4f1   :  { %4181 = vmatmul.msk.f32.gmra.mxu3 %vm123_vm0, %v2777_v15 }
 0x4f4   :  { %v2381_v60 = vpop.f32.mrf.mxu3 }
 0x4f5   :  { %v6255_v14 = vadd.f32 %v2381_v60, %v6127_v10  ;;  %v6265_v12 = vpop.f32.mrf.mxu1  ;;  %v6268_v47 = vpop.f32.mrf.mxu2 }
 0x4f9   :  { %4182 = vmatmul.msk.f32.gmra.mxu3 %vm123_vm0, %v2779_v21  ;;  %v2793_v21 = vld [vmem:[#allocation2 + $0x309] ss:$2 sm:$0xff] }
 0x4fc   :  { %v2384_v52 = vpop.f32.mrf.mxu3 }
 0x4fd   :  { %v6263_v42 = vadd.f32 %v2384_v52, %v6133_v51  ;;  %v2554_v19 = vpop.f32.mrf.mxu1  ;;  %v2720_v25 = vpop.f32.mrf.mxu2 }
 0x501   :  { %4183 = vmatmul.msk.f32.gmra.mxu3 %vm123_vm0, %v2781_v39  ;;  %v2795_v39 = vld [vmem:[#allocation2 + $0x349] ss:$2 sm:$0xff] }
 0x504   :  { %v2387_v56 = vpop.f32.mrf.mxu3 }
 0x505   :  { %v2427_v10 = vadd.f32 %v2387_v56, %v6139_v8  ;;  %v2787_v8 = vld [vmem:[#allocation2 + $0x209] ss:$2 sm:$0xff] }
 0x507   :  { %v2594_v1 = vadd.f32 %v2554_v19, %v2427_v10  ;;  %v2797_v10 = vld [vmem:[#allocation2 + $0x389] ss:$2 sm:$0xff] }
 0x508   :  { %v2799_v19 = vld [vmem:[#allocation2 + $0x3c9] ss:$2 sm:$0xff] }
 0x509   :  { %4184 = vmatmul.msk.f32.gmra.mxu3 %vm123_vm0, %v2783_v41  ;;  %v6275_v23 = vadd.f32 %v2720_v25, %v2594_v1  ;;  %v3506_v25 = vld [vmem:[#allocation3] ss:$2 sm:$0xff] }
 0x50c   :  { %v2390_v45 = vpop.f32.mrf.mxu3 }
 0x50d   :  { %v6273_v51 = vadd.f32 %v2390_v45, %v6145_v0  ;;  %v2099_v0 = vadd.f32 %v6161_v5, %v6157_v17  ;;  %v2101_v17 = vadd.f32 %v6181_v55, %v6179_v32  ;;  %v2103_v32 = vadd.f32 %v6201_v3, %v6199_v24  ;;  %v2801_v45 = vld [vmem:[#allocation2 + $0x409] ss:$2 sm:$0xff]  ;;  %v3538_v24 = vld [vmem:[#allocation12 + $0x8] sm:$0xff] }
 0x50e   :  { %v3537_v3 = vld [vmem:[#allocation12] sm:$0xff]  ;;  %3601 = vmatpush.msrb.mxu2 %v3538_v24 }
 0x50f   :  { %v2265_v63 = vadd.f32 %v6166_v27, %v2099_v0  ;;  %v2267_v5 = vadd.f32 %v6186_v2, %v2101_v17  ;;  %v2269_v55 = vadd.f32 %v6206_v62, %v2103_v32  ;;  %v2105_v62 = vadd.f32 %v6221_v33, %v6219_v29 }
 0x510   :  { %3602 = vmatpush.msrb.mxu2 %v3537_v3 }
 0x511   :  { %4185 = vmatmul.msk.f32.gmra.mxu3 %vm123_vm0, %v2785_v28  ;;  %v2271_v28 = vadd.f32 %v6226_v37, %v2105_v62  ;;  %4211 = vmatmul.msk.f32.vlgmr.msrb.gmra.mxu2 %vm336_vm1, %v3506_v25  ;;  %v2590_v37 = vadd.f32 %v6241_v7, %v6239_v48 }
 0x513   :  { %v2756_v0 = vadd.f32 %v6244_v11, %v2590_v37 }
 0x514   :  { %v2393_v26 = vpop.f32.mrf.mxu3 }
 0x515   :  { %v6279_v31 = vadd.f32 %v2393_v26, %v6151_v49  ;;  %v2791_v49 = vld [vmem:[#allocation2 + $0x2c9] ss:$2 sm:$0xff]  ;;  %v2106_v26 = vadd.f32 %v6231_v59, %v6229_v57  ;;  %v2591_v59 = vadd.f32 %v6249_v40, %v6247_v13  ;;  %v2557_v13 = vpop.f32.mrf.mxu1 }
 0x517   :  { %v2272_v29 = vadd.f32 %v6236_v30, %v2106_v26  ;;  %v3512_v30 = vld [vmem:[#allocation3 + $0x60] ss:$2 sm:$0xff] }
 0x519   :  { %4186 = vmatmul.msk.f32.gmra.mxu3 %vm123_vm0, %v2787_v8  ;;  %v3508_v8 = vld [vmem:[#allocation3 + $0x20] ss:$2 sm:$0xff] }
 0x51a   :  { %4212 = vmatmul.msk.f32.gmra.mxu2 %vm336_vm1, %v3508_v8 }
 0x51c   :  { %v2396_v35 = vpop.f32.mrf.mxu3 }
 0x51d   :  { %v6283_v53 = vadd.f32 %v2396_v35, %v6159_v4  ;;  %v2266_v4 = vadd.f32 %v6176_v18, %v2100_v46 }
 0x521   :  { %4187 = vmatmul.msk.f32.gmra.mxu3 %vm123_vm0, %v2789_v61  ;;  %v3510_v61 = vld [vmem:[#allocation3 + $0x40] ss:$2 sm:$0xff] }
 0x522   :  { %4213 = vmatmul.msk.f32.gmra.mxu2 %vm336_vm1, %v3510_v61  ;;  %v3524_v61 = vld [vmem:[#allocation3 + $0x120] ss:$2 sm:$0xff] }
 0x524   :  { %v2399_v58 = vpop.f32.mrf.mxu3 }
 0x525   :  { %v6289_v22 = vadd.f32 %v2399_v58, %v2265_v63  ;;  %v2757_v58 = vadd.f32 %v6252_v36, %v2591_v59  ;;  %v2723_v36 = vpop.f32.mrf.mxu2 }
 0x529   :  { %4188 = vmatmul.msk.f32.gmra.mxu3 %vm123_vm0, %v2791_v49 }
 0x52a   :  { %4214 = vmatmul.msk.f32.gmra.mxu2 %vm336_vm1, %v3512_v30 }
 0x52c   :  { %v2402_v15 = vpop.f32.mrf.mxu3 }
 0x52d   :  { %v6295_v60 = vadd.f32 %v2402_v15, %v2266_v4  ;;  %v2592_v4 = vadd.f32 %v6257_v54, %v6255_v14  ;;  %v3514_v15 = vld [vmem:[#allocation3 + $0x80] ss:$2 sm:$0xff]  ;;  %v2560_v54 = vpop.f32.mrf.mxu1 }
 0x52f   :  { %v2758_v40 = vadd.f32 %v6260_v34, %v2592_v4 }
 0x531   :  { %4189 = vmatmul.msk.f32.gmra.mxu3 %vm123_vm0, %v2793_v21 }
 0x532   :  { %4215 = vmatmul.msk.f32.gmra.mxu2 %vm336_vm1, %v3514_v15 }
 0x534   :  { %v2405_v27 = vpop.f32.mrf.mxu3 }
 0x535   :  { %v6301_v52 = vadd.f32 %v2405_v27, %v2267_v5 }
 0x539   :  { %4190 = vmatmul.msk.f32.gmra.mxu3 %vm123_vm0, %v2795_v39  ;;  %v2593_v39 = vadd.f32 %v6265_v12, %v6263_v42  ;;  %v2563_v12 = vpop.f32.mrf.mxu1 }
 0x53a   :  { %4216 = vmatmul.msk.f32.gmra.mxu2 %vm336_vm1, %v3516_v16  ;;  %v2597_v37 = vadd.f32 %v2563_v12, %v6283_v53 }
 0x53b   :  { %v2759_v14 = vadd.f32 %v6268_v47, %v2593_v39 }
 0x53c   :  { %v2408_v18 = vpop.f32.mrf.mxu3 }
 0x53d   :  { %v6307_v56 = vadd.f32 %v2408_v18, %v2268_v9  ;;  %v2726_v18 = vpop.f32.mrf.mxu2 }
 0x541   :  { %4191 = vmatmul.msk.f32.gmra.mxu3 %vm123_vm0, %v2797_v10 }
 0x544   :  { %v2411_v2 = vpop.f32.mrf.mxu3 }
 0x545   :  { %v6313_v41 = vadd.f32 %v2411_v2, %v2269_v55  ;;  %v3518_v55 = vld [vmem:[#allocation3 + $0xc0] ss:$2 sm:$0xff] }
 0x546   :  { %4217 = vmatmul.msk.f32.gmra.mxu2 %vm336_vm1, %v3518_v55 }
 0x549   :  { %4192 = vmatmul.msk.f32.gmra.mxu3 %vm123_vm0, %v2799_v19  ;;  %v2729_v19 = vpop.f32.mrf.mxu2 }
 0x54c   :  { %v2414_v38 = vpop.f32.mrf.mxu3 }
 0x54d   :  { %v6319_v1 = vadd.f32 %v2414_v38, %v2270_v44  ;;  %v2595_v44 = vadd.f32 %v2557_v13, %v6273_v51  ;;  %v3520_v38 = vld [vmem:[#allocation3 + $0xe0] ss:$2 sm:$0xff] }
 0x54e   :  { %4218 = vmatmul.msk.f32.gmra.mxu2 %vm336_vm1, %v3520_v38 }
 0x551   :  { %4193 = vmatmul.msk.f32.gmra.mxu3 %vm123_vm0, %v2801_v45  ;;  %v2761_v45 = vadd.f32 %v2723_v36, %v2595_v44  ;;  %v3532_v44 = vld [vmem:[#allocation3 + $0x1a0] ss:$2 sm:$0xff] }
 0x554   :  { %v2417_v43 = vpop.f32.mrf.mxu3 }
 0x555   :  { %v6326_v50 = vadd.f32 %v2417_v43, %v2271_v28  ;;  %v2596_v28 = vadd.f32 %v2560_v54, %v6279_v31  ;;  %v3522_v43 = vld [vmem:[#allocation3 + $0x100] ss:$2 sm:$0xff] }
 0x556   :  { %4219 = vmatmul.msk.f32.gmra.mxu2 %vm336_vm1, %v3522_v43 }
 0x557   :  { %v2762_v26 = vadd.f32 %v2726_v18, %v2596_v28 }
 0x559   :  { %4194 = vmatmul.msk.f32.gmra.mxu3 %vm123_vm0, %v2803_v20  ;;  %v2732_v20 = vpop.f32.mrf.mxu2 }
 0x55c   :  { %v2420_v33 = vpop.f32.mrf.mxu3 }
 0x55d   :  { %v6333_v35 = vadd.f32 %v2420_v33, %v2272_v29 }
 0x55e   :  { %4220 = vmatmul.msk.f32.gmra.mxu2 %vm336_vm1, %v3524_v61 }
 0x561   :  { %v2735_v59 = vpop.f32.mrf.mxu2 }
 0x564   :  { %v2874_v63 = vpop.f32.mrf.mxu3 }
 0x565   :  { %v6339_v57 = vadd.f32 %v2874_v63, %v2756_v0  ;;  %v2763_v63 = vadd.f32 %v2729_v19, %v2597_v37 }
 0x567   :  { %v2938_v48 = vsel %vm123_vm0, %v6339_v57, 0.0 }
 0x56c   :  { %v2877_v49 = vpop.f32.mrf.mxu3 }
 0x56d   :  { %v6345_v46 = vadd.f32 %v2877_v49, %v2757_v58 }
 0x56f   :  { %v2939_v7 = vsel %vm123_vm0, %v6345_v46, 0.0 }
 0x570   :  { %v2940_v11 = vadd.f32 %v2939_v7, %v2938_v48  ;;  %v3133_v48 = vld [vmem:[#allocation11 + $0x18] sm:$0xff] }
 0x571   :  { %3194 = vmatpush.msrb.mxu1 %v3133_v48 }
 0x574   :  { %v2880_v21 = vpop.f32.mrf.mxu3 }
 0x575   :  { %v6355_v17 = vadd.f32 %v2880_v21, %v2758_v40  ;;  %v2738_v40 = vpop.f32.mrf.mxu2 }
 0x577   :  { %v2941_v5 = vsel %vm123_vm0, %v6355_v17, 0.0 }
 0x578   :  { %v2942_v27 = vadd.f32 %v2941_v5, %v2940_v11  ;;  %v3526_v11 = vld [vmem:[#allocation3 + $0x140] ss:$2 sm:$0xff] }
 0x579   :  { %4221 = vmatmul.msk.f32.gmra.mxu2 %vm336_vm1, %v3526_v11 }
 0x57c   :  { %v2883_v9 = vpop.f32.mrf.mxu3 }
 0x57d   :  { %v6363_v34 = vadd.f32 %v2883_v9, %v2759_v14  ;;  %v2741_v9 = vpop.f32.mrf.mxu2 }
 0x57f   :  { %v2943_v10 = vsel %vm123_vm0, %v6363_v34, 0.0 }
 0x580   :  { %v2944_v32 = vadd.f32 %v2943_v10, %v2942_v27  ;;  %v3528_v27 = vld [vmem:[#allocation3 + $0x160] ss:$2 sm:$0xff] }
 0x581   :  { %4222 = vmatmul.msk.f32.gmra.mxu2 %vm336_vm1, %v3528_v27 }
 0x584   :  { %v2886_v2 = vpop.f32.mrf.mxu3 }
 0x585   :  { %v6369_v42 = vadd.f32 %v2886_v2, %v6275_v23  ;;  %v2566_v23 = vpop.f32.mrf.mxu1  ;;  %v2744_v38 = vpop.f32.mrf.mxu2 }
 0x586   :  { %v2598_v7 = vadd.f32 %v2566_v23, %v6289_v22 }
 0x587   :  { %v2945_v47 = vsel %vm123_vm0, %v6369_v42, 0.0 }
 0x588   :  { %v2946_v6 = vadd.f32 %v2945_v47, %v2944_v32  ;;  %v2764_v4 = vadd.f32 %v2732_v20, %v2598_v7  ;;  %v3530_v32 = vld [vmem:[#allocation3 + $0x180] ss:$2 sm:$0xff] }
 0x589   :  { %4223 = vmatmul.msk.f32.gmra.mxu2 %vm336_vm1, %v3530_v32 }
 0x58c   :  { %v2889_v24 = vpop.f32.mrf.mxu3 }
 0x58d   :  { %v6375_v3 = vadd.f32 %v2889_v24, %v2761_v45  ;;  %v2569_v0 = vpop.f32.mrf.mxu1  ;;  %v2747_v20 = vpop.f32.mrf.mxu2 }
 0x58e   :  { %v2599_v5 = vadd.f32 %v2569_v0, %v6295_v60 }
 0x58f   :  { %v2947_v62 = vsel %vm123_vm0, %v6375_v3, 0.0 }
 0x590   :  { %v2948_v25 = vadd.f32 %v2947_v62, %v2946_v6  ;;  %v2765_v39 = vadd.f32 %v2735_v59, %v2599_v5 }
 0x591   :  { %4224 = vmatmul.msk.f32.gmra.mxu2 %vm336_vm1, %v3532_v44 }
 0x594   :  { %v2892_v8 = vpop.f32.mrf.mxu3 }
 0x595   :  { %v6381_v51 = vadd.f32 %v2892_v8, %v2762_v26  ;;  %v2572_v53 = vpop.f32.mrf.mxu1  ;;  %v2750_v59 = vpop.f32.mrf.mxu2 }
 0x596   :  { %v2600_v10 = vadd.f32 %v2572_v53, %v6301_v52 }
 0x597   :  { %v2949_v29 = vsel %vm123_vm0, %v6381_v51, 0.0 }
 0x598   :  { %v2950_v33 = vadd.f32 %v2949_v29, %v2948_v25  ;;  %v2766_v55 = vadd.f32 %v2738_v40, %v2600_v10 }
 0x59c   :  { %v2895_v30 = vpop.f32.mrf.mxu3 }
 0x59d   :  { %v6387_v31 = vadd.f32 %v2895_v30, %v2763_v63  ;;  %v2575_v14 = vpop.f32.mrf.mxu1 }
 0x59e   :  { %v2601_v6 = vadd.f32 %v2575_v14, %v6307_v56 }
 0x59f   :  { %v2951_v58 = vsel %vm123_vm0, %v6387_v31, 0.0 }
 0x5a0   :  { %v2952_v49 = vadd.f32 %v2951_v58, %v2950_v33  ;;  %v2767_v45 = vadd.f32 %v2741_v9, %v2601_v6 }
 0x5a4   :  { %v2898_v15 = vpop.f32.mrf.mxu3 }
 0x5a5   :  { %v6393_v13 = vadd.f32 %v2898_v15, %v2764_v4  ;;  %v2578_v47 = vpop.f32.mrf.mxu1 }
 0x5a6   :  { %v2602_v25 = vadd.f32 %v2578_v47, %v6313_v41 }
 0x5a7   :  { %v2953_v36 = vsel %vm123_vm0, %v6393_v13, 0.0 }
 0x5a8   :  { %v2954_v21 = vadd.f32 %v2953_v36, %v2952_v49  ;;  %v2768_v43 = vadd.f32 %v2744_v38, %v2602_v25  ;;  %v4450_v49 = vmov 128.0  }
 0x5a9   :  { %4253 = vrcp.f32 %v4450_v49 }
 0x5ac   :  { %v2901_v16 = vpop.f32.mrf.mxu3 }
 0x5ad   :  { %v6399_v22 = vadd.f32 %v2901_v16, %v2765_v39  ;;  %v2581_v28 = vpop.f32.mrf.mxu1 }
 0x5ae   :  { %v2603_v33 = vadd.f32 %v2581_v28, %v6319_v1  ;;  %v2753_v1 = vpop.f32.mrf.mxu2 }
 0x5af   :  { %v2955_v54 = vsel %vm123_vm0, %v6399_v22, 0.0  ;;  %v4254_v15 = vpop.eup %4253 }
 0x5b0   :  { %v2956_v18 = vadd.f32 %v2955_v54, %v2954_v21  ;;  %v2769_v37 = vadd.f32 %v2747_v20, %v2603_v33  ;;  %v2976_v5 = vmul.f32 128.0, %v4254_v15  ;;  %vm2980_vm6 = vweird.f32 %v4254_v15 }
 0x5b4   :  { %v2904_v2 = vpop.f32.mrf.mxu3 }
 0x5b5   :  { %v6405_v60 = vadd.f32 %v2904_v2, %v2766_v55  ;;  %v2584_v61 = vpop.f32.mrf.mxu1  ;;  %v3534_v2 = vld [vmem:[#allocation3 + $0x1c0] ss:$2 sm:$0xff] }
 0x5b6   :  { %v2604_v41 = vadd.f32 %v2584_v61, %v6326_v50  ;;  %v2977_v50 = vsub.f32 1.0, %v2976_v5  ;;  %4225 = vmatmul.msk.f32.gmra.mxu2 %vm336_vm1, %v3534_v2  ;;  %v6488_v61 = vpop.f32.mrf.mxu2 }
 0x5b7   :  { %v2957_v12 = vsel %vm123_vm0, %v6405_v60, 0.0 }
 0x5b8   :  { %v2958_v19 = vadd.f32 %v2957_v12, %v2956_v18  ;;  %v2770_v48 = vadd.f32 %v2750_v59, %v2604_v41  ;;  %v2978_v9 = vmul.f32 %v4254_v15, %v2977_v50 }
 0x5ba   :  { %v2979_v32 = vadd.f32 %v4254_v15, %v2978_v9 }
 0x5bc   :  { %v2907_v24 = vpop.f32.mrf.mxu3 }
 0x5bd   :  { %v6411_v52 = vadd.f32 %v2907_v24, %v2767_v45  ;;  %v2587_v4 = vpop.f32.mrf.mxu1  ;;  %v3536_v24 = vld [vmem:[#allocation3 + $0x1e0] ss:$2 sm:$0xff] }
 0x5be   :  { %v2605_v36 = vadd.f32 %v2587_v4, %v6333_v35  ;;  %v6424_v35 = vsel %vm2980_vm6, %v4254_v15, %v2979_v32  ;;  %4226 = vmatmul.msk.f32.gmra.mxu2 %vm336_vm1, %v3536_v24  ;;  %v6502_v15 = vpop.f32.mrf.mxu2 }
 0x5bf   :  { %v2959_v62 = vsel %vm123_vm0, %v6411_v52, 0.0 }
 0x5c0   :  { %v2960_v23 = vadd.f32 %v2959_v62, %v2958_v19  ;;  %v2771_v21 = vadd.f32 %v2753_v1, %v2605_v36 }
 0x5c4   :  { %v2910_v26 = vpop.f32.mrf.mxu3 }
 0x5c5   :  { %v2934_v8 = vadd.f32 %v2910_v26, %v2768_v43 }
 0x5c7   :  { %v2961_v56 = vsel %vm123_vm0, %v2934_v8, 0.0 }
 0x5c8   :  { %v2962_v29 = vadd.f32 %v2961_v56, %v2960_v23 }
 0x5cc   :  { %v2913_v0 = vpop.f32.mrf.mxu3 }
 0x5cd   :  { %v2935_v63 = vadd.f32 %v2913_v0, %v2769_v37 }
 0x5cf   :  { %v2963_v30 = vsel %vm123_vm0, %v2935_v63, 0.0 }
 0x5d0   :  { %v2964_v58 = vadd.f32 %v2963_v30, %v2962_v29 }
 0x5d4   :  { %v2916_v7 = vpop.f32.mrf.mxu3 }
 0x5d5   :  { %v2936_v11 = vadd.f32 %v2916_v7, %v2770_v48 }
 0x5d7   :  { %v2965_v53 = vsel %vm123_vm0, %v2936_v11, 0.0 }
 0x5d8   :  { %v2966_v40 = vadd.f32 %v2965_v53, %v2964_v58 }
 0x5dc   :  { %v2919_v27 = vpop.f32.mrf.mxu3 }
 0x5dd   :  { %v2937_v39 = vadd.f32 %v2919_v27, %v2771_v21 }
 0x5df   :  { %v2967_v16 = vsel %vm123_vm0, %v2937_v39, 0.0 }
 0x5e0   :  { %v2968_v14 = vadd.f32 %v2967_v16, %v2966_v40 }
 0x5e2   :  { %v2969_v54 = vrot.slane %v2968_v14, 4 }
 0x5e4   :  { %v2970_v18 = vadd.f32 %v2969_v54, %v2968_v14 }
 0x5e6   :  { %v2971_v10 = vrot.slane %v2970_v18, 2 }
 0x5e8   :  { %v2972_v55 = vadd.f32 %v2971_v10, %v2970_v18  ;;  %v6516_v18 = vpop.f32.mrf.mxu2 }
 0x5ea   :  { %v2973_v12 = vrot.slane %v2972_v55, 1 }
 0x5ec   :  { %v2974_v47 = vadd.f32 %v2973_v12, %v2972_v55 }
 0x5ee   :  { %v2982_v19 = vmul.f32 %v6424_v35, %v2974_v47 }
 0x5f0   :  { %v6428_v6 = vsub.f32 %v6339_v57, %v2982_v19  ;;  %v6431_v44 = vsub.f32 %v6345_v46, %v2982_v19  ;;  %v6434_v38 = vsub.f32 %v6355_v17, %v2982_v19  ;;  %v6437_v45 = vsub.f32 %v6363_v34, %v2982_v19 }
 0x5f1   :  { %v6440_v62 = vsub.f32 %v6369_v42, %v2982_v19  ;;  %v6443_v23 = vsub.f32 %v6375_v3, %v2982_v19  ;;  %v6446_v25 = vsub.f32 %v6381_v51, %v2982_v19  ;;  %v6449_v57 = vsub.f32 %v6387_v31, %v2982_v19 }
 0x5f2   :  { %v6453_v46 = vsub.f32 %v6393_v13, %v2982_v19  ;;  %v6456_v17 = vsub.f32 %v6399_v22, %v2982_v19  ;;  %v6459_v34 = vsub.f32 %v6405_v60, %v2982_v19  ;;  %v6462_v42 = vsub.f32 %v6411_v52, %v2982_v19 }
 0x5f3   :  { %v6464_v3 = vsub.f32 %v2934_v8, %v2982_v19  ;;  %v6466_v51 = vsub.f32 %v2935_v63, %v2982_v19  ;;  %v6468_v31 = vsub.f32 %v2936_v11, %v2982_v19  ;;  %v6470_v28 = vsub.f32 %v2937_v39, %v2982_v19 }
 0x5f4   :  { %v2999_v13 = vmul.f32 %v6428_v6, %v6428_v6  ;;  %v3000_v22 = vmul.f32 %v6431_v44, %v6431_v44  ;;  %v3001_v60 = vmul.f32 %v6434_v38, %v6434_v38  ;;  %v3002_v52 = vmul.f32 %v6437_v45, %v6437_v45 }
 0x5f5   :  { %v3003_v8 = vmul.f32 %v6440_v62, %v6440_v62  ;;  %v3004_v33 = vmul.f32 %v6443_v23, %v6443_v23  ;;  %v3005_v63 = vmul.f32 %v6446_v25, %v6446_v25  ;;  %v3006_v58 = vmul.f32 %v6449_v57, %v6449_v57 }
 0x5f6   :  { %v3015_v43 = vsel %vm123_vm0, %v2999_v13, 0.0  ;;  %v3016_v20 = vsel %vm123_vm0, %v3000_v22, 0.0  ;;  %v3018_v56 = vsel %vm123_vm0, %v3001_v60, 0.0  ;;  %v3020_v37 = vsel %vm123_vm0, %v3002_v52, 0.0  ;;  %v6526_v60 = vpop.f32.mrf.mxu2 }
 0x5f7   :  { %v3017_v26 = vadd.f32 %v3016_v20, %v3015_v43  ;;  %v3022_v59 = vsel %vm123_vm0, %v3003_v8, 0.0  ;;  %v3024_v41 = vsel %vm123_vm0, %v3004_v33, 0.0  ;;  %v3007_v48 = vmul.f32 %v6453_v46, %v6453_v46  ;;  %v3132_v8 = vld [vmem:[#allocation11 + $0x10] sm:$0xff] }
 0x5f8   :  { %v3026_v7 = vsel %vm123_vm0, %v3005_v63, 0.0  ;;  %v3008_v4 = vmul.f32 %v6456_v17, %v6456_v17  ;;  %v3028_v53 = vsel %vm123_vm0, %v3006_v58, 0.0  ;;  %v3009_v40 = vmul.f32 %v6459_v34, %v6459_v34  ;;  %3195 = vmatpush.msrb.mxu1 %v3132_v8 }
 0x5f9   :  { %v3019_v29 = vadd.f32 %v3018_v56, %v3017_v26  ;;  %v3030_v36 = vsel %vm123_vm0, %v3007_v48, 0.0  ;;  %v3010_v5 = vmul.f32 %v6462_v42, %v6462_v42  ;;  %v3011_v16 = vmul.f32 %v6464_v3, %v6464_v3  ;;  %v3131_v56 = vld [vmem:[#allocation11 + $0x8] sm:$0xff] }
 0x5fa   :  { %v3032_v27 = vsel %vm123_vm0, %v3008_v4, 0.0  ;;  %v3034_v50 = vsel %vm123_vm0, %v3009_v40, 0.0  ;;  %v3012_v54 = vmul.f32 %v6466_v51, %v6466_v51  ;;  %v3013_v32 = vmul.f32 %v6468_v31, %v6468_v31  ;;  %3196 = vmatpush.msrb.mxu1 %v3131_v56  ;;  %v4261_v40 = vld [vmem:[#allocation8] sm:$0xf] }
 0x5fb   :  { %v3021_v0 = vadd.f32 %v3020_v37, %v3019_v29  ;;  %v3036_v9 = vsel %vm123_vm0, %v3010_v5, 0.0  ;;  %v3038_v55 = vsel %vm123_vm0, %v3011_v16, 0.0  ;;  %v3014_v12 = vmul.f32 %v6470_v28, %v6470_v28  ;;  %v3130_v37 = vld [vmem:[#allocation11] sm:$0xff] }
 0x5fc   :  { %v3040_v47 = vsel %vm123_vm0, %v3012_v54, 0.0  ;;  %v3042_v24 = vsel %vm123_vm0, %v3013_v32, 0.0  ;;  %3197 = vmatpush.msrb.mxu1 %v3130_v37  ;;  %v3652_v16 = vsel %vm123_vm0, %v6488_v61, 0.0  ;;  %v3655_v32 = vsel %vm123_vm0, %v6516_v18, 0.0 }
 0x5fd   :  { %v3023_v30 = vadd.f32 %v3022_v59, %v3021_v0  ;;  %v3044_v22 = vsel %vm123_vm0, %v3014_v12, 0.0 }
 0x5fe   :  { %v6528_v29 = vpop.f32.mrf.mxu2 }
 0x5ff   :  { %v3025_v49 = vadd.f32 %v3024_v41, %v3023_v30 }
 0x601   :  { %v3027_v11 = vadd.f32 %v3026_v7, %v3025_v49 }
 0x603   :  { %v3029_v1 = vadd.f32 %v3028_v53, %v3027_v11 }
 0x605   :  { %v3031_v21 = vadd.f32 %v3030_v36, %v3029_v1  ;;  %v6537_v36 = vperm.slane %v4261_v40, 2 }
 0x606   :  { %v6531_v30 = vpop.f32.mrf.mxu2 }
 0x607   :  { %v3033_v39 = vadd.f32 %v3032_v27, %v3031_v21 }
 0x609   :  { %v3035_v14 = vadd.f32 %v3034_v50, %v3033_v39  ;;  %v6545_v39 = vperm.slane %v4261_v40, 3 }
 0x60b   :  { %v3037_v10 = vadd.f32 %v3036_v9, %v3035_v14  ;;  %v3653_v14 = vsel %vm123_vm0, %v6502_v15, 0.0 }
 0x60d   :  { %v3039_v2 = vadd.f32 %v3038_v55, %v3037_v10 }
 0x60e   :  { %v6533_v41 = vpop.f32.mrf.mxu2 }
 0x60f   :  { %v3041_v19 = vadd.f32 %v3040_v47, %v3039_v2 }
 0x611   :  { %v3043_v13 = vadd.f32 %v3042_v24, %v3041_v19  ;;  %v3657_v24 = vsel %vm123_vm0, %v6526_v60, 0.0 }
 0x613   :  { %v3045_v52 = vadd.f32 %v3044_v22, %v3043_v13 }
 0x615   :  { %v3046_v43 = vrot.slane %v3045_v52, 4 }
 0x616   :  { %v6535_v53 = vpop.f32.mrf.mxu2 }
 0x617   :  { %v3047_v20 = vadd.f32 %v3046_v43, %v3045_v52 }
 0x619   :  { %v3048_v26 = vrot.slane %v3047_v20, 2 }
 0x61b   :  { %v3049_v33 = vadd.f32 %v3048_v26, %v3047_v20 }
 0x61d   :  { %v3050_v0 = vrot.slane %v3049_v33, 1 }
 0x61e   :  { %v6555_v10 = vpop.f32.mrf.mxu2 }
 0x61f   :  { %v3051_v63 = vadd.f32 %v3050_v0, %v3049_v33 }
 0x621   :  { %v3052_v59 = vmul.f32 %v3051_v63, %v6424_v35 }
 0x623   :  { %v3053_v58 = vadd.f32 1e-05, %v3052_v59 }
 0x625   :  { %4255 = vrsqrt.f32 %v3053_v58  ;;  %vm3060_vm8 = vweird.f32 %v3053_v58 }
 0x626   :  { %v6578_v20 = vpop.f32.mrf.mxu2 }
 0x62b   :  { %v4256_v49 = vpop.eup %4255 }
 0x62c   :  { %v3055_v48 = vmul.f32 %v4256_v49, %v3053_v58  ;;  %vm3061_vm7 = vweird.f32 %v4256_v49 }
 0x62d   :  { %vm3062_vm9 = vmor %vm3060_vm8, %vm3061_vm7 }
 0x62e   :  { %v3056_v7 = vmul.f32 %v4256_v49, %v3055_v48 }
 0x630   :  { %v3057_v11 = vmul.f32 0.5, %v3056_v7 }
 0x632   :  { %v3058_v4 = vsub.f32 1.5, %v3057_v11 }
 0x634   :  { %v3059_v1 = vmul.f32 %v4256_v49, %v3058_v4 }
 0x636   :  { %v6539_v21 = vsel %vm3062_vm9, %v4256_v49, %v3059_v1  ;;  %v3661_v1 = vsel %vm123_vm0, %v6531_v30, 0.0 }
 0x637   :  { %v3079_v5 = vmul.f32 %v6539_v21, %v6470_v28  ;;  %v3064_v27 = vmul.f32 %v6539_v21, %v6428_v6  ;;  %v3065_v9 = vmul.f32 %v6539_v21, %v6431_v44  ;;  %v3654_v6 = vadd.f32 %v3653_v14, %v3652_v16 }
 0x638   :  { %v3072_v12 = vmul.f32 %v6539_v21, %v6453_v46  ;;  %v3073_v47 = vmul.f32 %v6539_v21, %v6456_v17  ;;  %v3074_v44 = vmul.f32 %v6539_v21, %v6459_v34  ;;  %v3066_v13 = vmul.f32 %v6539_v21, %v6434_v38 }
 0x639   :  { %v3096_v50 = vmul.f32 %v6537_v36, %v3079_v5  ;;  %v3081_v54 = vmul.f32 %v6537_v36, %v3064_v27  ;;  %v3082_v2 = vmul.f32 %v6537_v36, %v3065_v9  ;;  %v3656_v19 = vadd.f32 %v3655_v32, %v3654_v6 }
 0x63a   :  { %v3075_v22 = vmul.f32 %v6539_v21, %v6462_v42  ;;  %v3089_v46 = vmul.f32 %v6537_v36, %v3072_v12  ;;  %v3090_v43 = vmul.f32 %v6537_v36, %v3073_v47  ;;  %v3091_v17 = vmul.f32 %v6537_v36, %v3074_v44 }
 0x63b   :  { %v3098_v28 = vadd.f32 %v6545_v39, %v3081_v54  ;;  %v3099_v52 = vadd.f32 %v6545_v39, %v3082_v2  ;;  %v3076_v26 = vmul.f32 %v6539_v21, %v6464_v3  ;;  %v3077_v38 = vmul.f32 %v6539_v21, %v6466_v51 }
 0x63c   :  { %v3092_v34 = vmul.f32 %v6537_v36, %v3075_v22  ;;  %v6586_v42 = vadd.f32 %v6545_v39, %v3089_v46  ;;  %v6589_v8 = vadd.f32 %v6545_v39, %v3090_v43  ;;  %v6592_v56 = vadd.f32 %v6545_v39, %v3091_v17 }
 0x63d   :  { %v3114_v55 = vmax.f32 %v3098_v28, 0.0  ;;  %v3658_v33 = vadd.f32 %v3657_v24, %v3656_v19  ;;  %v3093_v0 = vmul.f32 %v6537_v36, %v3076_v26  ;;  %v3659_v3 = vsel %vm123_vm0, %v6528_v29, 0.0 }
 0x63e   :  { %v6595_v37 = vadd.f32 %v6545_v39, %v3092_v34  ;;  %v3115_v63 = vmax.f32 %v3099_v52, 0.0  ;;  %v3083_v51 = vmul.f32 %v6537_v36, %v3066_v13  ;;  %v3094_v59 = vmul.f32 %v6537_v36, %v3077_v38 }
 0x63f   :  { %4195 = vmatmul.msk.f32.vlgmr.msrb.gmra.mxu1 %vm123_vm0, %v3114_v55  ;;  %v6603_v58 = vadd.f32 %v6545_v39, %v3093_v0  ;;  %v3078_v49 = vmul.f32 %v6539_v21, %v6468_v31  ;;  %v6608_v48 = vadd.f32 %v6545_v39, %v3096_v50  ;;  %v3660_v11 = vadd.f32 %v3659_v3, %v3658_v33  ;;  %v6620_v31 = vpop.f32.mrf.mxu2 }
 0x640   :  { %v6612_v7 = vadd.f32 %v6545_v39, %v3094_v59  ;;  %v3100_v40 = vadd.f32 %v6545_v39, %v3083_v51  ;;  %v3067_v5 = vmul.f32 %v6539_v21, %v6437_v45  ;;  %v3663_v50 = vsel %vm123_vm0, %v6533_v41, 0.0 }
 0x641   :  { %v3095_v4 = vmul.f32 %v6537_v36, %v3078_v49  ;;  %v3662_v16 = vadd.f32 %v3661_v1, %v3660_v11  ;;  %v3665_v28 = vsel %vm123_vm0, %v6535_v53, 0.0  ;;  %v3068_v6 = vmul.f32 %v6539_v21, %v6440_v62 }
 0x642   :  { %v3116_v14 = vmax.f32 %v3100_v40, 0.0  ;;  %v3084_v54 = vmul.f32 %v6537_v36, %v3067_v5  ;;  %v3667_v2 = vsel %vm123_vm0, %v6555_v10, 0.0  ;;  %v3669_v19 = vsel %vm123_vm0, %v6578_v20, 0.0 }
 0x643   :  { %v6623_v27 = vadd.f32 %v6545_v39, %v3095_v4  ;;  %v3664_v9 = vadd.f32 %v3663_v50, %v3662_v16  ;;  %v3085_v47 = vmul.f32 %v6537_v36, %v3068_v6  ;;  %v3069_v62 = vmul.f32 %v6539_v21, %v6443_v23 }
 0x644   :  { %v3101_v45 = vadd.f32 %v6545_v39, %v3084_v54  ;;  %v3671_v52 = vsel %vm123_vm0, %v6620_v31, 0.0  ;;  %v3070_v23 = vmul.f32 %v6539_v21, %v6446_v25  ;;  %v3071_v25 = vmul.f32 %v6539_v21, %v6449_v57 }
 0x645   :  { %v3666_v55 = vadd.f32 %v3665_v28, %v3664_v9  ;;  %v3102_v24 = vadd.f32 %v6545_v39, %v3085_v47  ;;  %v3086_v43 = vmul.f32 %v6537_v36, %v3069_v62 }
 0x646   :  { %v3117_v12 = vmax.f32 %v3101_v45, 0.0  ;;  %v3088_v5 = vmul.f32 %v6537_v36, %v3071_v25 }
 0x647   :  { %4196 = vmatmul.msk.f32.gmra.mxu1 %vm123_vm0, %v3115_v63  ;;  %v6634_v32 = vpop.f32.mrf.mxu2  ;;  %v3668_v44 = vadd.f32 %v3667_v2, %v3666_v55  ;;  %v3118_v46 = vmax.f32 %v3102_v24, 0.0  ;;  %v3103_v26 = vadd.f32 %v6545_v39, %v3086_v43  ;;  %v3087_v63 = vmul.f32 %v6537_v36, %v3070_v23 }
 0x648   :  { %v3673_v34 = vsel %vm123_vm0, %v6634_v32, 0.0  ;;  %v3105_v50 = vadd.f32 %v6545_v39, %v3088_v5  ;;  %v3122_v36 = vmax.f32 %v6586_v42, 0.0 }
 0x649   :  { %v3670_v22 = vadd.f32 %v3669_v19, %v3668_v44  ;;  %v3119_v3 = vmax.f32 %v3103_v26, 0.0  ;;  %v3104_v49 = vadd.f32 %v6545_v39, %v3087_v63  ;;  %v3123_v19 = vmax.f32 %v6589_v8, 0.0 }
 0x64a   :  { %v3121_v21 = vmax.f32 %v3105_v50, 0.0 }
 0x64b   :  { %v3672_v17 = vadd.f32 %v3671_v52, %v3670_v22  ;;  %v3120_v40 = vmax.f32 %v3104_v49, 0.0 }
 0x64d   :  { %v3674_v33 = vadd.f32 %v3673_v34, %v3672_v17  ;;  %v3124_v17 = vmax.f32 %v6592_v56, 0.0 }
 0x64f   :  { %4197 = vmatmul.msk.f32.gmra.mxu1 %vm123_vm0, %v3116_v14  ;;  %v6645_v13 = vpop.f32.mrf.mxu2 }
 0x650   :  { %v3675_v0 = vsel %vm123_vm0, %v6645_v13, 0.0 }
 0x651   :  { %v3676_v51 = vadd.f32 %v3675_v0, %v3674_v33 }
 0x657   :  { %4198 = vmatmul.msk.f32.gmra.mxu1 %vm123_vm0, %v3117_v12  ;;  %v6656_v38 = vpop.f32.mrf.mxu2 }
 0x658   :  { %v3677_v59 = vsel %vm123_vm0, %v6656_v38, 0.0 }
 0x659   :  { %v3678_v4 = vadd.f32 %v3677_v59, %v3676_v51 }
 0x65f   :  { %4199 = vmatmul.msk.f32.gmra.mxu1 %vm123_vm0, %v3118_v46  ;;  %v6667_v11 = vpop.f32.mrf.mxu2 }
 0x660   :  { %v3679_v1 = vsel %vm123_vm0, %v6667_v11, 0.0 }
 0x661   :  { %v3680_v16 = vadd.f32 %v3679_v1, %v3678_v4  ;;  %v3125_v4 = vmax.f32 %v6595_v37, 0.0 }
 0x667   :  { %4200 = vmatmul.msk.f32.gmra.mxu1 %vm123_vm0, %v3119_v3  ;;  %v6674_v14 = vpop.f32.mrf.mxu2 }
 0x668   :  { %v3681_v54 = vsel %vm123_vm0, %v6674_v14, 0.0 }
 0x669   :  { %v3682_v57 = vadd.f32 %v3681_v54, %v3680_v16 }
 0x66b   :  { %v3683_v9 = vrot.slane %v3682_v57, 4 }
 0x66d   :  { %v3684_v28 = vadd.f32 %v3683_v9, %v3682_v57 }
 0x66f   :  { %4201 = vmatmul.msk.f32.gmra.mxu1 %vm123_vm0, %v3120_v40  ;;  %v3685_v45 = vrot.slane %v3684_v28, 2 }
 0x671   :  { %v3686_v6 = vadd.f32 %v3685_v45, %v3684_v28 }
 0x673   :  { %v3687_v55 = vrot.slane %v3686_v6, 1 }
 0x675   :  { %v3688_v2 = vadd.f32 %v3687_v55, %v3686_v6  ;;  %v3126_v6 = vmax.f32 %v6603_v58, 0.0 }
 0x677   :  { %4202 = vmatmul.msk.f32.gmra.mxu1 %vm123_vm0, %v3121_v21  ;;  %v3689_v39 = vmul.f32 %v3688_v2, %v6424_v35 }
 0x679   :  { %v6683_v12 = vsub.f32 %v6488_v61, %v3689_v39  ;;  %v6686_v47 = vsub.f32 %v6502_v15, %v3689_v39  ;;  %v6689_v44 = vsub.f32 %v6516_v18, %v3689_v39  ;;  %v6693_v24 = vsub.f32 %v6526_v60, %v3689_v39 }
 0x67a   :  { %v6697_v42 = vsub.f32 %v6528_v29, %v3689_v39  ;;  %v6706_v62 = vsub.f32 %v6531_v30, %v3689_v39  ;;  %v6711_v8 = vsub.f32 %v6533_v41, %v3689_v39  ;;  %v6720_v30 = vsub.f32 %v6535_v53, %v3689_v39 }
 0x67b   :  { %v3706_v61 = vmul.f32 %v6683_v12, %v6683_v12  ;;  %v3707_v15 = vmul.f32 %v6686_v47, %v6686_v47  ;;  %v3708_v18 = vmul.f32 %v6689_v44, %v6689_v44  ;;  %v3709_v60 = vmul.f32 %v6693_v24, %v6693_v24 }
 0x67c   :  { %v3710_v29 = vmul.f32 %v6697_v42, %v6697_v42  ;;  %v3711_v34 = vmul.f32 %v6706_v62, %v6706_v62  ;;  %v6727_v23 = vsub.f32 %v6555_v10, %v3689_v39  ;;  %v3712_v33 = vmul.f32 %v6711_v8, %v6711_v8 }
 0x67d   :  { %v3722_v22 = vsel %vm123_vm0, %v3706_v61, 0.0  ;;  %v3723_v52 = vsel %vm123_vm0, %v3707_v15, 0.0  ;;  %v3725_v46 = vsel %vm123_vm0, %v3708_v18, 0.0  ;;  %v3727_v41 = vsel %vm123_vm0, %v3709_v60, 0.0 }
 0x67e   :  { %v3724_v43 = vadd.f32 %v3723_v52, %v3722_v22  ;;  %v3729_v0 = vsel %vm123_vm0, %v3710_v29, 0.0  ;;  %v6733_v53 = vsub.f32 %v6578_v20, %v3689_v39  ;;  %v3713_v3 = vmul.f32 %v6720_v30, %v6720_v30 }
 0x67f   :  { %4203 = vmatmul.msk.f32.gmra.mxu1 %vm123_vm0, %v3122_v36  ;;  %v3731_v63 = vsel %vm123_vm0, %v3711_v34, 0.0  ;;  %v6739_v59 = vsub.f32 %v6620_v31, %v3689_v39  ;;  %v3714_v10 = vmul.f32 %v6727_v23, %v6727_v23  ;;  %v3733_v49 = vsel %vm123_vm0, %v3712_v33, 0.0 }
 0x680   :  { %v3726_v26 = vadd.f32 %v3725_v46, %v3724_v43  ;;  %v6746_v20 = vsub.f32 %v6634_v32, %v3689_v39  ;;  %v3715_v1 = vmul.f32 %v6733_v53, %v6733_v53  ;;  %v3735_v40 = vsel %vm123_vm0, %v3713_v3, 0.0 }
 0x681   :  { %v6753_v31 = vsub.f32 %v6645_v13, %v3689_v39  ;;  %v3716_v16 = vmul.f32 %v6739_v59, %v6739_v59  ;;  %v3737_v50 = vsel %vm123_vm0, %v3714_v10, 0.0  ;;  %v6759_v32 = vsub.f32 %v6656_v38, %v3689_v39 }
 0x682   :  { %v3728_v56 = vadd.f32 %v3727_v41, %v3726_v26  ;;  %v3717_v54 = vmul.f32 %v6746_v20, %v6746_v20  ;;  %v3739_v57 = vsel %vm123_vm0, %v3715_v1, 0.0  ;;  %v6765_v9 = vsub.f32 %v6667_v11, %v3689_v39 }
 0x683   :  { %v3718_v13 = vmul.f32 %v6753_v31, %v6753_v31  ;;  %v3741_v28 = vsel %vm123_vm0, %v3716_v16, 0.0  ;;  %v6772_v38 = vsub.f32 %v6674_v14, %v3689_v39  ;;  %v3719_v36 = vmul.f32 %v6759_v32, %v6759_v32 }
 0x684   :  { %v3730_v51 = vadd.f32 %v3729_v0, %v3728_v56  ;;  %v3743_v55 = vsel %vm123_vm0, %v3717_v54, 0.0  ;;  %v3720_v11 = vmul.f32 %v6765_v9, %v6765_v9  ;;  %v3127_v60 = vmax.f32 %v6612_v7, 0.0 }
 0x685   :  { %v3721_v58 = vmul.f32 %v6772_v38, %v6772_v38  ;;  %v3747_v14 = vsel %vm123_vm0, %v3719_v36, 0.0  ;;  %v3129_v0 = vmax.f32 %v6608_v48, 0.0 }
 0x686   :  { %v3732_v25 = vadd.f32 %v3731_v63, %v3730_v51  ;;  %v3749_v15 = vsel %vm123_vm0, %v3720_v11, 0.0 }
 0x687   :  { %4204 = vmatmul.msk.f32.gmra.mxu1 %vm123_vm0, %v3123_v19  ;;  %v3745_v19 = vsel %vm123_vm0, %v3718_v13, 0.0  ;;  %v3751_v29 = vsel %vm123_vm0, %v3721_v58, 0.0 }
 0x688   :  { %v3734_v5 = vadd.f32 %v3733_v49, %v3732_v25 }
 0x68a   :  { %v3736_v37 = vadd.f32 %v3735_v40, %v3734_v5 }
 0x68c   :  { %v3738_v21 = vadd.f32 %v3737_v50, %v3736_v37 }
 0x68e   :  { %v3740_v45 = vadd.f32 %v3739_v57, %v3738_v21 }
 0x68f   :  { %4205 = vmatmul.msk.f32.gmra.mxu1 %vm123_vm0, %v3124_v17  ;;  %v3128_v17 = vmax.f32 %v6623_v27, 0.0 }
 0x690   :  { %v3742_v2 = vadd.f32 %v3741_v28, %v3740_v45 }
 0x692   :  { %v3744_v61 = vadd.f32 %v3743_v55, %v3742_v2 }
 0x694   :  { %v3746_v39 = vadd.f32 %v3745_v19, %v3744_v61 }
 0x696   :  { %v3748_v18 = vadd.f32 %v3747_v14, %v3746_v39 }
 0x697   :  { %4206 = vmatmul.msk.f32.gmra.mxu1 %vm123_vm0, %v3125_v4 }
 0x698   :  { %v3750_v22 = vadd.f32 %v3749_v15, %v3748_v18 }
 0x69a   :  { %v3752_v52 = vadd.f32 %v3751_v29, %v3750_v22 }
 0x69c   :  { %v3753_v46 = vrot.slane %v3752_v52, 4 }
 0x69e   :  { %v3754_v43 = vadd.f32 %v3753_v46, %v3752_v52 }
 0x69f   :  { %4207 = vmatmul.msk.f32.gmra.mxu1 %vm123_vm0, %v3126_v6 }
 0x6a0   :  { %v3755_v34 = vrot.slane %v3754_v43, 2 }
 0x6a2   :  { %v3756_v41 = vadd.f32 %v3755_v34, %v3754_v43 }
 0x6a4   :  { %v3757_v26 = vrot.slane %v3756_v41, 1 }
 0x6a6   :  { %v3758_v33 = vadd.f32 %v3757_v26, %v3756_v41 }
 0x6a7   :  { %4208 = vmatmul.msk.f32.gmra.mxu1 %vm123_vm0, %v3127_v60 }
 0x6a8   :  { %v3759_v7 = vmul.f32 %v3758_v33, %v6424_v35 }
 0x6aa   :  { %v3760_v56 = vadd.f32 1e-05, %v3759_v7 }
 0x6ac   :  { %4257 = vrsqrt.f32 %v3760_v56  ;;  %vm3767_vm10 = vweird.f32 %v3760_v56 }
 0x6af   :  { %4209 = vmatmul.msk.f32.gmra.mxu1 %vm123_vm0, %v3128_v17 }
 0x6b2   :  { %v4258_v63 = vpop.eup %4257 }
 0x6b3   :  { %v3762_v51 = vmul.f32 %v4258_v63, %v3760_v56  ;;  %vm3768_vm11 = vweird.f32 %v4258_v63 }
 0x6b4   :  { %vm3769_vm12 = vmor %vm3767_vm10, %vm3768_vm11 }
 0x6b5   :  { %v3763_v27 = vmul.f32 %v4258_v63, %v3762_v51 }
 0x6b7   :  { %4210 = vmatmul.msk.f32.gmra.mxu1 %vm123_vm0, %v3129_v0  ;;  %v3764_v49 = vmul.f32 0.5, %v3763_v27 }
 0x6b9   :  { %v3765_v25 = vsub.f32 1.5, %v3764_v49 }
 0x6bb   :  { %v3766_v48 = vmul.f32 %v4258_v63, %v3765_v25 }
 0x6bc   :  { %v3199_v3 = vpop.f32.mrf.mxu1 }
 0x6bd   :  { %3250 = vst.msk [vmem:[#allocation14] sm:$0xff] %vm123_vm0, %v3199_v3  ;;  %v6795_v1 = vsel %vm3769_vm12, %v4258_v63, %v3766_v48 }
 0x6be   :  { %v6800_v40 = vmul.f32 %v6795_v1, %v6706_v62  ;;  %v6804_v5 = vmul.f32 %v6795_v1, %v6711_v8  ;;  %v6808_v16 = vmul.f32 %v6795_v1, %v6739_v59  ;;  %v6812_v50 = vmul.f32 %v6795_v1, %v6746_v20 }
 0x6c4   :  { %v3202_v10 = vpop.f32.mrf.mxu1  ;;  %v3321_v6 = vld [vmem:[#allocation14] sm:$0xff] }
 0x6c5   :  { %3251 = vst.msk [vmem:[#allocation14 + $0x8] sm:$0xff] %vm123_vm0, %v3202_v10  ;;  %v3337_v11 = vsel %vm123_vm0, %v3321_v6, 0.0 }
 0x6cc   :  { %v3205_v4 = vpop.f32.mrf.mxu1  ;;  %v6823_v28 = vld [vmem:[#allocation14 + $0x8] sm:$0xff] }
 0x6cd   :  { %3252 = vst.msk [vmem:[#allocation14 + $0x10] sm:$0xff] %vm123_vm0, %v3205_v4  ;;  %v3338_v55 = vsel %vm123_vm0, %v6823_v28, 0.0 }
 0x6ce   :  { %v3339_v61 = vadd.f32 %v3338_v55, %v3337_v11 }
 0x6d4   :  { %v3208_v37 = vpop.f32.mrf.mxu1  ;;  %v3323_v36 = vld [vmem:[#allocation14 + $0x10] sm:$0xff] }
 0x6d5   :  { %3253 = vst.msk [vmem:[#allocation14 + $0x18] sm:$0xff] %vm123_vm0, %v3208_v37  ;;  %v3340_v19 = vsel %vm123_vm0, %v3323_v36, 0.0 }
 0x6d6   :  { %v3341_v39 = vadd.f32 %v3340_v19, %v3339_v61 }
 0x6dc   :  { %v3211_v54 = vpop.f32.mrf.mxu1  ;;  %v3324_v2 = vld [vmem:[#allocation14 + $0x18] sm:$0xff] }
 0x6dd   :  { %3254 = vst.msk [vmem:[#allocation14 + $0x20] sm:$0xff] %vm123_vm0, %v3211_v54  ;;  %v3342_v14 = vsel %vm123_vm0, %v3324_v2, 0.0 }
 0x6de   :  { %v3343_v29 = vadd.f32 %v3342_v14, %v3341_v39 }
 0x6e4   :  { %v3214_v62 = vpop.f32.mrf.mxu1  ;;  %v3325_v58 = vld [vmem:[#allocation14 + $0x20] sm:$0xff] }
 0x6e5   :  { %3255 = vst.msk [vmem:[#allocation14 + $0x28] sm:$0xff] %vm123_vm0, %v3214_v62  ;;  %v3344_v60 = vsel %vm123_vm0, %v3325_v58, 0.0 }
 0x6e6   :  { %v3345_v46 = vadd.f32 %v3344_v60, %v3343_v29 }
 0x6ec   :  { %v3217_v57 = vpop.f32.mrf.mxu1  ;;  %v3326_v15 = vld [vmem:[#allocation14 + $0x28] sm:$0xff] }
 0x6ed   :  { %3256 = vst.msk [vmem:[#allocation14 + $0x30] sm:$0xff] %vm123_vm0, %v3217_v57  ;;  %v3346_v52 = vsel %vm123_vm0, %v3326_v15, 0.0 }
 0x6ee   :  { %v3347_v34 = vadd.f32 %v3346_v52, %v3345_v46 }
 0x6f4   :  { %v3220_v8 = vpop.f32.mrf.mxu1  ;;  %v3327_v22 = vld [vmem:[#allocation14 + $0x30] sm:$0xff] }
 0x6f5   :  { %3257 = vst.msk [vmem:[#allocation14 + $0x38] sm:$0xff] %vm123_vm0, %v3220_v8  ;;  %v3348_v17 = vsel %vm123_vm0, %v3327_v22, 0.0 }
 0x6f6   :  { %v3349_v7 = vadd.f32 %v3348_v17, %v3347_v34 }
 0x6fc   :  { %v3223_v59 = vpop.f32.mrf.mxu1  ;;  %v3328_v43 = vld [vmem:[#allocation14 + $0x38] sm:$0xff] }
 0x6fd   :  { %3258 = vst.msk [vmem:[#allocation14 + $0x40] sm:$0xff] %vm123_vm0, %v3223_v59  ;;  %v3350_v26 = vsel %vm123_vm0, %v3328_v43, 0.0 }
 0x6fe   :  { %v3351_v63 = vadd.f32 %v3350_v26, %v3349_v7 }
 0x704   :  { %v3226_v20 = vpop.f32.mrf.mxu1  ;;  %v3329_v41 = vld [vmem:[#allocation14 + $0x40] sm:$0xff] }
 0x705   :  { %3259 = vst.msk [vmem:[#allocation14 + $0x48] sm:$0xff] %vm123_vm0, %v3226_v20  ;;  %v3352_v56 = vsel %vm123_vm0, %v3329_v41, 0.0 }
 0x706   :  { %v3353_v10 = vadd.f32 %v3352_v56, %v3351_v63 }
 0x70c   :  { %v3229_v21 = vpop.f32.mrf.mxu1  ;;  %v3330_v0 = vld [vmem:[#allocation14 + $0x48] sm:$0xff] }
 0x70d   :  { %3260 = vst.msk [vmem:[#allocation14 + $0x50] sm:$0xff] %vm123_vm0, %v3229_v21  ;;  %v3354_v51 = vsel %vm123_vm0, %v3330_v0, 0.0 }
 0x70e   :  { %v3355_v48 = vadd.f32 %v3354_v51, %v3353_v10 }
 0x714   :  { %v3232_v13 = vpop.f32.mrf.mxu1  ;;  %v3331_v3 = vld [vmem:[#allocation14 + $0x50] sm:$0xff] }
 0x715   :  { %3261 = vst.msk [vmem:[#allocation14 + $0x58] sm:$0xff] %vm123_vm0, %v3232_v13  ;;  %v3356_v49 = vsel %vm123_vm0, %v3331_v3, 0.0 }
 0x716   :  { %v3357_v62 = vadd.f32 %v3356_v49, %v3355_v48 }
 0x71c   :  { %v3235_v45 = vpop.f32.mrf.mxu1  ;;  %v3332_v27 = vld [vmem:[#allocation14 + $0x58] sm:$0xff] }
 0x71d   :  { %3262 = vst.msk [vmem:[#allocation14 + $0x60] sm:$0xff] %vm123_vm0, %v3235_v45  ;;  %v3358_v4 = vsel %vm123_vm0, %v3332_v27, 0.0 }
 0x71e   :  { %v3359_v59 = vadd.f32 %v3358_v4, %v3357_v62 }
 0x724   :  { %v3238_v18 = vpop.f32.mrf.mxu1  ;;  %v3333_v25 = vld [vmem:[#allocation14 + $0x60] sm:$0xff] }
 0x725   :  { %3263 = vst.msk [vmem:[#allocation14 + $0x68] sm:$0xff] %vm123_vm0, %v3238_v18  ;;  %v3360_v57 = vsel %vm123_vm0, %v3333_v25, 0.0 }
 0x726   :  { %v3361_v21 = vadd.f32 %v3360_v57, %v3359_v59 }
 0x72c   :  { %v3241_v33 = vpop.f32.mrf.mxu1  ;;  %v3334_v54 = vld [vmem:[#allocation14 + $0x68] sm:$0xff] }
 0x72d   :  { %3264 = vst.msk [vmem:[#allocation14 + $0x70] sm:$0xff] %vm123_vm0, %v3241_v33  ;;  %v3362_v20 = vsel %vm123_vm0, %v3334_v54, 0.0 }
 0x72e   :  { %v3363_v45 = vadd.f32 %v3362_v20, %v3361_v21 }
 0x734   :  { %v3244_v37 = vpop.f32.mrf.mxu1  ;;  %v3335_v8 = vld [vmem:[#allocation14 + $0x70] sm:$0xff] }
 0x735   :  { %3265 = vst.msk [vmem:[#allocation14 + $0x78] sm:$0xff] %vm123_vm0, %v3244_v37  ;;  %v3364_v13 = vsel %vm123_vm0, %v3335_v8, 0.0 }
 0x736   :  { %v3365_v11 = vadd.f32 %v3364_v13, %v3363_v45 }
 0x73c   :  { %v3336_v55 = vld [vmem:[#allocation14 + $0x78] sm:$0xff] }
 0x73d   :  { %v3366_v19 = vsel %vm123_vm0, %v3336_v55, 0.0 }
 0x73e   :  { %v3367_v61 = vadd.f32 %v3366_v19, %v3365_v11 }
 0x740   :  { %v3368_v14 = vrot.slane %v3367_v61, 4 }
 0x742   :  { %v3369_v39 = vadd.f32 %v3368_v14, %v3367_v61 }
 0x744   :  { %v3370_v18 = vrot.slane %v3369_v39, 2 }
 0x746   :  { %v3371_v60 = vadd.f32 %v3370_v18, %v3369_v39 }
 0x748   :  { %v3372_v29 = vrot.slane %v3371_v60, 1 }
 0x74a   :  { %v3373_v52 = vadd.f32 %v3372_v29, %v3371_v60 }
 0x74c   :  { %v3374_v46 = vmul.f32 %v3373_v52, %v6424_v35 }
 0x74e   :  { %v6847_v17 = vsub.f32 %v3321_v6, %v3374_v46  ;;  %v6850_v34 = vsub.f32 %v6823_v28, %v3374_v46  ;;  %v6852_v26 = vsub.f32 %v3323_v36, %v3374_v46  ;;  %v6854_v33 = vsub.f32 %v3324_v2, %v3374_v46 }
 0x74f   :  { %v6860_v63 = vsub.f32 %v3325_v58, %v3374_v46  ;;  %v6864_v6 = vsub.f32 %v3326_v15, %v3374_v46  ;;  %v6870_v49 = vsub.f32 %v3327_v22, %v3374_v46  ;;  %v6875_v37 = vsub.f32 %v3328_v43, %v3374_v46 }
 0x750   :  { %v3391_v7 = vmul.f32 %v6847_v17, %v6847_v17  ;;  %v3392_v56 = vmul.f32 %v6850_v34, %v6850_v34  ;;  %v3393_v51 = vmul.f32 %v6852_v26, %v6852_v26  ;;  %v3394_v28 = vmul.f32 %v6854_v33, %v6854_v33 }
 0x751   :  { %v3395_v48 = vmul.f32 %v6860_v63, %v6860_v63  ;;  %v3396_v15 = vmul.f32 %v6864_v6, %v6864_v6  ;;  %v6880_v59 = vsub.f32 %v3329_v41, %v3374_v46  ;;  %v3397_v22 = vmul.f32 %v6870_v49, %v6870_v49 }
 0x752   :  { %v3407_v36 = vsel %vm123_vm0, %v3391_v7, 0.0  ;;  %v3408_v2 = vsel %vm123_vm0, %v3392_v56, 0.0  ;;  %v3410_v58 = vsel %vm123_vm0, %v3393_v51, 0.0  ;;  %v3412_v62 = vsel %vm123_vm0, %v3394_v28, 0.0 }
 0x753   :  { %v3409_v10 = vadd.f32 %v3408_v2, %v3407_v36  ;;  %v3414_v20 = vsel %vm123_vm0, %v3395_v48, 0.0  ;;  %v6885_v13 = vsub.f32 %v3330_v0, %v3374_v46  ;;  %v3398_v43 = vmul.f32 %v6875_v37, %v6875_v37 }
 0x754   :  { %v3416_v45 = vsel %vm123_vm0, %v3396_v15, 0.0  ;;  %v6890_v19 = vsub.f32 %v3331_v3, %v3374_v46  ;;  %v3399_v41 = vmul.f32 %v6880_v59, %v6880_v59  ;;  %v3418_v61 = vsel %vm123_vm0, %v3397_v22, 0.0 }
 0x755   :  { %v3411_v4 = vadd.f32 %v3410_v58, %v3409_v10  ;;  %v6895_v39 = vsub.f32 %v3332_v27, %v3374_v46  ;;  %v3400_v0 = vmul.f32 %v6885_v13, %v6885_v13  ;;  %v3420_v18 = vsel %vm123_vm0, %v3398_v43, 0.0 }
 0x756   :  { %v6900_v29 = vsub.f32 %v3333_v25, %v3374_v46  ;;  %v3401_v3 = vmul.f32 %v6890_v19, %v6890_v19  ;;  %v3422_v52 = vsel %vm123_vm0, %v3399_v41, 0.0  ;;  %v6905_v56 = vsub.f32 %v3334_v54, %v3374_v46 }
 0x757   :  { %v3413_v57 = vadd.f32 %v3412_v62, %v3411_v4  ;;  %v3402_v27 = vmul.f32 %v6895_v39, %v6895_v39  ;;  %v3424_v51 = vsel %vm123_vm0, %v3400_v0, 0.0  ;;  %v6910_v36 = vsub.f32 %v3335_v8, %v3374_v46 }
 0x758   :  { %v3403_v25 = vmul.f32 %v6900_v29, %v6900_v29  ;;  %v3426_v2 = vsel %vm123_vm0, %v3401_v3, 0.0  ;;  %v6915_v48 = vsub.f32 %v3336_v55, %v3374_v46  ;;  %v3404_v54 = vmul.f32 %v6905_v56, %v6905_v56 }
 0x759   :  { %v3415_v21 = vadd.f32 %v3414_v20, %v3413_v57  ;;  %v3428_v58 = vsel %vm123_vm0, %v3402_v27, 0.0  ;;  %v3405_v15 = vmul.f32 %v6910_v36, %v6910_v36 }
 0x75a   :  { %v3430_v8 = vsel %vm123_vm0, %v3403_v25, 0.0  ;;  %v3406_v57 = vmul.f32 %v6915_v48, %v6915_v48  ;;  %v3432_v22 = vsel %vm123_vm0, %v3404_v54, 0.0  ;;  %v3771_v25 = vmul.f32 %v6795_v1, %v6683_v12 }
 0x75b   :  { %v3417_v11 = vadd.f32 %v3416_v45, %v3415_v21  ;;  %v3434_v55 = vsel %vm123_vm0, %v3405_v15, 0.0  ;;  %v3775_v15 = vmul.f32 %v6795_v1, %v6697_v42  ;;  %v3779_v12 = vmul.f32 %v6795_v1, %v6727_v23 }
 0x75c   :  { %v3436_v21 = vsel %vm123_vm0, %v3406_v57, 0.0  ;;  %v3785_v42 = vmul.f32 %v6795_v1, %v6765_v9 }
 0x75d   :  { %v3419_v14 = vadd.f32 %v3418_v61, %v3417_v11 }
 0x75f   :  { %v3421_v60 = vadd.f32 %v3420_v18, %v3419_v14 }
 0x761   :  { %v3423_v7 = vadd.f32 %v3422_v52, %v3421_v60  ;;  %v333_v52 = vld [vmem:[%s7075_s5] sm:$0xf]  ;;  %s4451_s5 = smov [#allocation14]  }
 0x762   :  { %v6942_v54 = vperm.slane %v333_v52, 3  ;;  %s3873_s29 = sshll.u32 %s4451_s5, 4  ;;  %s3874_s29 = int_to_ptr.vmem [resolvable:$true] %s3873_s29 }
 0x763   :  { %v3425_v28 = vadd.f32 %v3424_v51, %v3423_v7  ;;  %v6932_v51 = vperm.slane %v333_v52, 0 }
 0x765   :  { %v3427_v10 = vadd.f32 %v3426_v2, %v3425_v28  ;;  %v6934_v28 = vperm.slane %v333_v52, 1  ;;  %v3787_v2 = vperm.slane %v333_v52, 2 }
 0x767   :  { %v3429_v4 = vadd.f32 %v3428_v58, %v3427_v10  ;;  %v3773_v10 = vmul.f32 %v6795_v1, %v6689_v44  ;;  %v3783_v44 = vmul.f32 %v6795_v1, %v6753_v31  ;;  %v3788_v57 = vmul.f32 %v3787_v2, %v3771_v25 }
 0x768   :  { %v3793_v31 = vmul.f32 %v3787_v2, %v6800_v40  ;;  %v6965_v9 = vmul.f32 %v3787_v2, %v6808_v16  ;;  %v6980_v16 = vmul.f32 %v3787_v2, %v3785_v42 }
 0x769   :  { %v3431_v62 = vadd.f32 %v3430_v8, %v3429_v4  ;;  %v3774_v4 = vmul.f32 %v6795_v1, %v6693_v24  ;;  %v3778_v8 = vmul.f32 %v6795_v1, %v6720_v30  ;;  %v3784_v24 = vmul.f32 %v6795_v1, %v6759_v32 }
 0x76a   :  { %v3786_v30 = vmul.f32 %v6795_v1, %v6772_v38  ;;  %v3790_v23 = vmul.f32 %v3787_v2, %v3773_v10  ;;  %v3796_v32 = vmul.f32 %v3787_v2, %v3779_v12  ;;  %v3810_v25 = vadd.f32 %v6942_v54, %v3793_v31 }
 0x76b   :  { %v3433_v20 = vadd.f32 %v3432_v22, %v3431_v62 }
 0x76d   :  { %v3435_v46 = vadd.f32 %v3434_v55, %v3433_v20  ;;  %v3792_v55 = vmul.f32 %v3787_v2, %v3775_v15 }
 0x76f   :  { %v3437_v43 = vadd.f32 %v3436_v21, %v3435_v46  ;;  %v3794_v46 = vmul.f32 %v3787_v2, %v6804_v5  ;;  %v3795_v21 = vmul.f32 %v3787_v2, %v3778_v8 }
 0x771   :  { %v3438_v45 = vrot.slane %v3437_v43, 4  ;;  %v3811_v10 = vadd.f32 %v6942_v54, %v3794_v46 }
 0x773   :  { %v3439_v11 = vadd.f32 %v3438_v45, %v3437_v43 }
 0x775   :  { %v3440_v41 = vrot.slane %v3439_v11, 2 }
 0x777   :  { %v3441_v61 = vadd.f32 %v3440_v41, %v3439_v11  ;;  %v6971_v41 = vmul.f32 %v3787_v2, %v6812_v50 }
 0x779   :  { %v3442_v14 = vrot.slane %v3441_v61, 1 }
 0x77b   :  { %v3443_v0 = vadd.f32 %v3442_v14, %v3441_v61  ;;  %v6976_v14 = vmul.f32 %v3787_v2, %v3783_v44 }
 0x77d   :  { %v3444_v18 = vmul.f32 %v3443_v0, %v6424_v35  ;;  %v3772_v35 = vmul.f32 %v6795_v1, %v6686_v47  ;;  %v3780_v47 = vmul.f32 %v6795_v1, %v6733_v53  ;;  %v3791_v53 = vmul.f32 %v3787_v2, %v3774_v4 }
 0x77e   :  { %v6978_v0 = vmul.f32 %v3787_v2, %v3784_v24 }
 0x77f   :  { %v3445_v60 = vadd.f32 1e-05, %v3444_v18  ;;  %v3789_v22 = vmul.f32 %v3787_v2, %v3772_v35  ;;  %v3797_v43 = vmul.f32 %v3787_v2, %v3780_v47 }
 0x781   :  { %4259 = vrsqrt.f32 %v3445_v60  ;;  %vm3452_vm14 = vweird.f32 %v3445_v60  ;;  %v3806_v50 = vadd.f32 %v6942_v54, %v3789_v22 }
 0x787   :  { %v4260_v3 = vpop.eup %4259 }
 0x788   :  { %v3447_v7 = vmul.f32 %v4260_v3, %v3445_v60  ;;  %vm3453_vm13 = vweird.f32 %v4260_v3 }
 0x789   :  { %vm3454_vm15 = vmor %vm3452_vm14, %vm3453_vm13 }
 0x78a   :  { %v3448_v27 = vmul.f32 %v4260_v3, %v3447_v7 }
 0x78c   :  { %v3449_v58 = vmul.f32 0.5, %v3448_v27  ;;  %v3809_v27 = vadd.f32 %v6942_v54, %v3792_v55 }
 0x78e   :  { %v3450_v62 = vsub.f32 1.5, %v3449_v58  ;;  %v3812_v58 = vadd.f32 %v6942_v54, %v3795_v21 }
 0x790   :  { %v3451_v20 = vmul.f32 %v4260_v3, %v3450_v62 }
 0x792   :  { %v3455_v45 = vsel %vm3454_vm15, %v4260_v3, %v3451_v20 }
 0x793   :  { %v3456_v38 = vmul.f32 %v3455_v45, %v6847_v17  ;;  %v3457_v1 = vmul.f32 %v3455_v45, %v6850_v34  ;;  %v3458_v11 = vmul.f32 %v3455_v45, %v6852_v26  ;;  %v3459_v40 = vmul.f32 %v3455_v45, %v6854_v33 }
 0x794   :  { %v3461_v5 = vmul.f32 %v3455_v45, %v6864_v6  ;;  %v3462_v61 = vmul.f32 %v3455_v45, %v6870_v49  ;;  %v3460_v17 = vmul.f32 %v3455_v45, %v6860_v63  ;;  %v6983_v34 = vmul.f32 %v3787_v2, %v3786_v30 }
 0x795   :  { %v3805_v26 = vadd.f32 %v6942_v54, %v3788_v57  ;;  %v3807_v33 = vadd.f32 %v6942_v54, %v3790_v23  ;;  %v3808_v6 = vadd.f32 %v6942_v54, %v3791_v53  ;;  %v3473_v49 = vmul.f32 %v6932_v51, %v3456_v38 }
 0x796   :  { %v3474_v18 = vmul.f32 %v6932_v51, %v3457_v1  ;;  %v3475_v60 = vmul.f32 %v6932_v51, %v3458_v11  ;;  %v3463_v3 = vmul.f32 %v3455_v45, %v6875_v37  ;;  %v3476_v63 = vmul.f32 %v6932_v51, %v3459_v40 }
 0x797   :  { %v3478_v52 = vmul.f32 %v6932_v51, %v3461_v5  ;;  %v3479_v7 = vmul.f32 %v6932_v51, %v3462_v61  ;;  %v3464_v2 = vmul.f32 %v3455_v45, %v6880_v59  ;;  %v3477_v35 = vmul.f32 %v6932_v51, %v3460_v17 }
 0x798   :  { %v3465_v37 = vmul.f32 %v3455_v45, %v6885_v13  ;;  %v3466_v4 = vmul.f32 %v3455_v45, %v6890_v19  ;;  %v3467_v15 = vmul.f32 %v3455_v45, %v6895_v39  ;;  %v3490_v8 = vadd.f32 %v6934_v28, %v3473_v49 }
 0x799   :  { %v3491_v12 = vadd.f32 %v6934_v28, %v3474_v18  ;;  %v3492_v47 = vadd.f32 %v6934_v28, %v3475_v60  ;;  %v3480_v59 = vmul.f32 %v6932_v51, %v3463_v3  ;;  %v3493_v44 = vadd.f32 %v6934_v28, %v3476_v63 }
 0x79a   :  { %v3495_v62 = vadd.f32 %v6934_v28, %v3478_v52  ;;  %v3496_v24 = vadd.f32 %v6934_v28, %v3479_v7  ;;  %v3468_v13 = vmul.f32 %v3455_v45, %v6900_v29  ;;  %v3469_v19 = vmul.f32 %v3455_v45, %v6905_v56 }
 0x79b   :  { %v3481_v39 = vmul.f32 %v6932_v51, %v3464_v2  ;;  %v3494_v42 = vadd.f32 %v6934_v28, %v3477_v35  ;;  %v3470_v30 = vmul.f32 %v3455_v45, %v6910_v36  ;;  %v3471_v57 = vmul.f32 %v3455_v45, %v6915_v48 }
 0x79c   :  { %v3482_v22 = vmul.f32 %v6932_v51, %v3465_v37  ;;  %v3483_v23 = vmul.f32 %v6932_v51, %v3466_v4  ;;  %v3484_v20 = vmul.f32 %v6932_v51, %v3467_v15  ;;  %v3821_v53 = vadd.f32 %v3805_v26, %v3490_v8 }
 0x79d   :  { %v3822_v55 = vadd.f32 %v3806_v50, %v3491_v12  ;;  %v3823_v31 = vadd.f32 %v3807_v33, %v3492_v47  ;;  %v3497_v29 = vadd.f32 %v6934_v28, %v3480_v59  ;;  %v3824_v56 = vadd.f32 %v3808_v6, %v3493_v44 }
 0x79e   :  { %v3826_v46 = vadd.f32 %v3810_v25, %v3495_v62  ;;  %v3827_v21 = vadd.f32 %v3811_v10, %v3496_v24  ;;  %v3813_v38 = vadd.f32 %v6942_v54, %v3796_v32  ;;  %v3485_v36 = vmul.f32 %v6932_v51, %v3468_v13 }
 0x79f   :  { %v3498_v48 = vadd.f32 %v6934_v28, %v3481_v39  ;;  %v3825_v45 = vadd.f32 %v3809_v27, %v3494_v42  ;;  %v3814_v1 = vadd.f32 %v6942_v54, %v3797_v43  ;;  %v3486_v11 = vmul.f32 %v6932_v51, %v3469_v19 }
 0x7a0   :  { %v3487_v40 = vmul.f32 %v6932_v51, %v3470_v30  ;;  %v3499_v5 = vadd.f32 %v6934_v28, %v3482_v22  ;;  %v3500_v61 = vadd.f32 %v6934_v28, %v3483_v23  ;;  %v3837_v17 = vmax.f32 %v3821_v53, 0.0 }
 0x7a1   :  { %v3838_v26 = vmax.f32 %v3822_v55, 0.0  ;;  %v3839_v50 = vmax.f32 %v3823_v31, 0.0  ;;  %v3488_v32 = vmul.f32 %v6932_v51, %v3471_v57  ;;  %v3501_v33 = vadd.f32 %v6934_v28, %v3484_v20 }
 0x7a2   :  { %v3828_v6 = vadd.f32 %v3812_v58, %v3497_v29  ;;  %v3840_v49 = vmax.f32 %v3824_v56, 0.0  ;;  %v3815_v43 = vadd.f32 %v6942_v54, %v6965_v9  ;;  %v3502_v18 = vadd.f32 %v6934_v28, %v3485_v36  ;;  %3853 = vst.msk [vmem:[#allocation14] sm:$0xff] %vm123_vm0, %v3837_v17 }
 0x7a3   :  { %v3829_v60 = vadd.f32 %v3813_v38, %v3498_v48  ;;  %v3841_v3 = vmax.f32 %v3825_v45, 0.0  ;;  %v3816_v63 = vadd.f32 %v6942_v54, %v6971_v41  ;;  %v3503_v52 = vadd.f32 %v6934_v28, %v3486_v11  ;;  %3854 = vst.msk [vmem:[#allocation14 + $0x8] sm:$0xff] %vm123_vm0, %v3838_v26 }
 0x7a4   :  { %v3830_v7 = vadd.f32 %v3814_v1, %v3499_v5  ;;  %v3842_v51 = vmax.f32 %v3826_v46, 0.0  ;;  %v3817_v27 = vadd.f32 %v6942_v54, %v6976_v14  ;;  %v3504_v9 = vadd.f32 %v6934_v28, %v3487_v40  ;;  %3855 = vst.msk [vmem:[#allocation14 + $0x10] sm:$0xff] %vm123_vm0, %v3839_v50 }
 0x7a5   :  { %v3831_v25 = vadd.f32 %v3815_v43, %v3500_v61  ;;  %v3843_v2 = vmax.f32 %v3827_v21, 0.0  ;;  %v3818_v35 = vadd.f32 %v6942_v54, %v6978_v0  ;;  %v3505_v41 = vadd.f32 %v6934_v28, %v3488_v32  ;;  %3856 = vst.msk [vmem:[#allocation14 + $0x18] sm:$0xff] %vm123_vm0, %v3840_v49 }
 0x7a6   :  { %v3832_v10 = vadd.f32 %v3816_v63, %v3501_v33  ;;  %v3844_v58 = vmax.f32 %v3828_v6, 0.0  ;;  %v3819_v37 = vadd.f32 %v6942_v54, %v6980_v16  ;;  %v3833_v4 = vadd.f32 %v3817_v27, %v3502_v18  ;;  %3857 = vst.msk [vmem:[#allocation14 + $0x20] sm:$0xff] %vm123_vm0, %v3841_v3 }
 0x7a7   :  { %v3845_v14 = vmax.f32 %v3829_v60, 0.0  ;;  %v3820_v15 = vadd.f32 %v6942_v54, %v6983_v34  ;;  %v3834_v8 = vadd.f32 %v3818_v35, %v3503_v52  ;;  %v3846_v12 = vmax.f32 %v3830_v7, 0.0  ;;  %3858 = vst.msk [vmem:[#allocation14 + $0x28] sm:$0xff] %vm123_vm0, %v3842_v51 }
 0x7a8   :  { %v3835_v0 = vadd.f32 %v3819_v37, %v3504_v9  ;;  %v3847_v28 = vmax.f32 %v3831_v25, 0.0  ;;  %3859 = vst.msk [vmem:[#allocation14 + $0x30] sm:$0xff] %vm123_vm0, %v3843_v2  ;;  %v3848_v59 = vmax.f32 %v3832_v10, 0.0  ;;  %v3849_v16 = vmax.f32 %v3833_v4, 0.0 }
 0x7a9   :  { %v3836_v47 = vadd.f32 %v3820_v15, %v3505_v41  ;;  %3860 = vst.msk [vmem:[#allocation14 + $0x38] sm:$0xff] %vm123_vm0, %v3844_v58  ;;  %v3850_v44 = vmax.f32 %v3834_v8, 0.0 }
 0x7aa   :  { %3861 = vst.msk [vmem:[#allocation14 + $0x40] sm:$0xff] %vm123_vm0, %v3845_v14  ;;  %v3851_v62 = vmax.f32 %v3835_v0, 0.0 }
 0x7ab   :  { %3862 = vst.msk [vmem:[#allocation14 + $0x48] sm:$0xff] %vm123_vm0, %v3846_v12  ;;  %v3852_v54 = vmax.f32 %v3836_v47, 0.0 }
 0x7ac   :  { %3863 = vst.msk [vmem:[#allocation14 + $0x50] sm:$0xff] %vm123_vm0, %v3847_v28 }
 0x7ad   :  { %3864 = vst.msk [vmem:[#allocation14 + $0x58] sm:$0xff] %vm123_vm0, %v3848_v59 }
 0x7ae   :  { %3865 = vst.msk [vmem:[#allocation14 + $0x60] sm:$0xff] %vm123_vm0, %v3849_v16 }
 0x7af   :  { %3866 = vst.msk [vmem:[#allocation14 + $0x68] sm:$0xff] %vm123_vm0, %v3850_v44 }
 0x7b0   :  { %3867 = vst.msk [vmem:[#allocation14 + $0x70] sm:$0xff] %vm123_vm0, %v3851_v62 }
 0x7b1   :  { %3868 = vst.msk [vmem:[#allocation14 + $0x78] sm:$0xff] %vm123_vm0, %v3852_v54 }
 0x7b2   :  { %3881 = dma.vmem_to_hbm [thread:$0]  %s3874_s29, 2048, %s3876_s11, [#allocation5], %s4441_s9, %s4441_s9, %s4442_s10  }
 0x7b3   :  { %4438 = dma.done.wait [#allocation5], 2048  }
 0x7b4   :  { %4439 = vsyncadd [#allocation5], 4294965248 }
 0x7b5   :  { %3886 = vsyncpa [#allocation4], 1 }
 0x7b6   :  { %3887 = vsyncpa [#allocation7], 1 }
 0x7b7   :  { %3888 = vsyncpa [#allocation10], 1 }
 0x7b8   :  { %3889 = vsyncpa [#allocation13], 1 }
 0x7b9   :  { %3890 = vsyncpa [#allocation5], 1 }

</bundles_post_ra>
